<compile_context>
chip_gen: v7x
topology: tpu7x:2x2x1
jax: 0.10.0
libtpu: 0.0.40
codegen_flags: <defaults>
</compile_context>

<pallas_src>
import functools

import jax
import jax.numpy as jnp
import numpy as np
from jax.experimental import pallas as pl
from jax.experimental.pallas import tpu as pltpu


# ----------------------------------------------------------------------------
# Fused ResBlock kernel: one sample per grid step.
# ----------------------------------------------------------------------------
def _resblock_kernel(x_ref, w1_ref, w2_ref, o_ref, ypad_ref, *, eps):
    # x_ref   : (1, H, W, C)   f32   NHWC input block
    # w*_ref  : (3, 3*C, C)    bf16  K-folded weights: [dy, dx*C + cin, cout]
    # o_ref   : (1, H, W, C)   f32   output block
    # ypad_ref: (H+2, W, 3*C)  bf16  VMEM scratch: normalized activation stacked
    #                                with its two W-shifts; rows 0 / H+1 = dy halo.
    _, H, W, C = x_ref.shape
    HW = H * W
    C3 = 3 * C

    # Zero only the two dy-halo rows, every step (tiny: 2*W*3C bf16).  Done
    # unconditionally (not gated on program_id) so each TensorCore's private
    # scratch is valid under megacore "parallel" grid partitioning.
    zrow = jnp.zeros((W, C3), jnp.bfloat16)
    ypad_ref[0] = zrow
    ypad_ref[H + 1] = zrow

    # Layout-preserving collapse (W % 8 == 0 keeps sublanes aligned, C on lanes).
    x2 = x_ref[0].reshape(HW, C)

    # Column-border masks for the W halo, computed once and reused by both convs.
    # Rolling the *flattened* (HW, C) view wraps exactly at the masked columns.
    col = jax.lax.broadcasted_iota(jnp.int32, (HW, C), 0) % W
    first_col = col == 0
    last_col = col == W - 1

    inv_hw = 1.0 / HW

    def inorm_relu(v):
        # Single reduction sweep: E[x], E[x^2]; biased variance (InstanceNorm2d).
        s = jnp.sum(v, axis=0, keepdims=True)
        s2 = jnp.sum(v * v, axis=0, keepdims=True)
        mean = s * inv_hw
        var = s2 * inv_hw - mean * mean
        return jnp.maximum((v - mean) * jax.lax.rsqrt(var + eps), 0.0)

    def stack_shifts(y):
        # Write [y(w-1), y(w), y(w+1)] into channel thirds of rows 1..H (bf16).
        # pltpu.roll -> XLU sublane rotate (no misaligned sublane slices);
        # masks zero the wrap-around columns.  Lane offsets 0/C/2C are aligned.
        y_m1 = jnp.where(first_col, 0.0, pltpu.roll(y, 1, axis=0))
        y_p1 = jnp.where(last_col, 0.0, pltpu.roll(y, HW - 1, axis=0))
        ypad_ref[1:H + 1, :, 0:C] = y_m1.astype(jnp.bfloat16).reshape(H, W, C)
        ypad_ref[1:H + 1, :, C:2 * C] = y.astype(jnp.bfloat16).reshape(H, W, C)
        ypad_ref[1:H + 1, :, 2 * C:C3] = y_p1.astype(jnp.bfloat16).reshape(H, W, C)

    def conv3x3(w_ref):
        # 3 MXU matmuls, K = 3*C, bf16 operands, f32 accumulation.
        # dy taps are leading-axis slices of ypad_ref -> free address offsets.
        acc = jnp.zeros((HW, C), jnp.float32)
        for dy in range(3):
            patch = ypad_ref[dy:dy + H].reshape(HW, C3)
            acc = acc + jnp.dot(patch, w_ref[dy],
                                preferred_element_type=jnp.float32)
        return acc

    # --- InstanceNorm -> ReLU -> conv #1 ---
    stack_shifts(inorm_relu(x2))
    h1 = conv3x3(w1_ref)

    # --- InstanceNorm -> ReLU -> conv #2 ---
    stack_shifts(inorm_relu(h1))
    h2 = conv3x3(w2_ref)

    # --- residual on the un-normalized input ---
    o_ref[0] = (h2 + x2).reshape(H, W, C)


def resblock_pallas(x_nchw, w1_oihw, w2_oihw, eps=1e-5):
    """ResBlock forward. x: (N, C, H, W); w: (C, C, 3, 3) torch OIHW layout."""
    n, c, h, w = x_nchw.shape

    # NCHW -> NHWC (channels on lanes).
    # TODO(synk): if the surrounding model keeps NHWC activations these transposes
    # (a full extra HBM read+write of the activation) should be dropped.
    x = jnp.transpose(x_nchw, (0, 2, 3, 1)).astype(jnp.float32)

    def fold(w_oihw):
        # OIHW -> HWIO -> (dy, dx*Cin + cin, cout), bf16 (MXU-native operand).
        return (jnp.transpose(w_oihw, (2, 3, 1, 0))
                .reshape(3, 3 * c, c).astype(jnp.bfloat16))

    w1 = fold(w1_oihw)
    w2 = fold(w2_oihw)

    # VMEM budget: double-buffered in/out blocks + 2 x double-buffered bf16 weights
    # + halo scratch + headroom; cap is generation-aware (v7x only has 64 MiB).
    blk = h * w * c * 4
    wbytes = 3 * (3 * c) * c * 2
    scratch = (h + 2) * w * (3 * c) * 2
    need = 4 * blk + 4 * wbytes + scratch + (8 << 20)
    try:
        cap = pltpu.get_tpu_info().vmem_capacity_bytes
    except Exception:
        cap = 64 << 20          # conservative fallback (v7x-sized)
    vmem_limit = int(min(max(need, 32 << 20), 0.75 * cap))

    kern = functools.partial(_resblock_kernel, eps=eps)
    out = pl.pallas_call(
        kern,
        out_shape=jax.ShapeDtypeStruct((n, h, w, c), jnp.float32),
        grid_spec=pltpu.PrefetchScalarGridSpec(
            num_scalar_prefetch=0,
            grid=(n,),
            in_specs=[
                pl.BlockSpec((1, h, w, c), lambda i: (i, 0, 0, 0)),
                # Constant block index -> Pallas does not re-DMA the weights
                # across grid steps.  (pl.Buffered(1) would also drop the second
                # buffer; left at the default for lowering safety.)
                pl.BlockSpec((3, 3 * c, c), lambda i: (0, 0, 0)),
                pl.BlockSpec((3, 3 * c, c), lambda i: (0, 0, 0)),
            ],
            out_specs=pl.BlockSpec((1, h, w, c), lambda i: (i, 0, 0, 0)),
            scratch_shapes=[pltpu.VMEM((h + 2, w, 3 * c), jnp.bfloat16)],
        ),
        compiler_params=pltpu.CompilerParams(
            dimension_semantics=("parallel",),
            vmem_limit_bytes=vmem_limit,
        ),
    )(x, w1, w2)
    return jnp.transpose(out, (0, 3, 1, 2))                  # NHWC -> NCHW


# ----------------------------------------------------------------------------
# Pure-JAX reference (correctness check only)
# ----------------------------------------------------------------------------
def resblock_ref(x_nchw, w1_oihw, w2_oihw, eps=1e-5):
    def inorm(v):
        mean = jnp.mean(v, axis=(2, 3), keepdims=True)
        var = jnp.mean((v - mean) ** 2, axis=(2, 3), keepdims=True)
        return (v - mean) * jax.lax.rsqrt(var + eps)

    dn = ("NCHW", "OIHW", "NCHW")
    y = jnp.maximum(inorm(x_nchw), 0.0)
    y = jax.lax.conv_general_dilated(y, w1_oihw, (1, 1), "SAME",
                                     dimension_numbers=dn,
                                     precision=jax.lax.Precision.HIGHEST)
    y = jnp.maximum(inorm(y), 0.0)
    y = jax.lax.conv_general_dilated(y, w2_oihw, (1, 1), "SAME",
                                     dimension_numbers=dn,
                                     precision=jax.lax.Precision.HIGHEST)
    return y + x_nchw


if __name__ == "__main__":
    # Small demo shapes consistent with AFWM's ResBlock usage; C=128 keeps the
    # channel (lane) dim fully dense and W=16 keeps sublanes aligned.
    n, c, h, w = 2, 128, 16, 16

    key = jax.random.PRNGKey(0)
    k1, k2, k3 = jax.random.split(key, 3)
    x = jax.random.normal(k1, (n, c, h, w), jnp.float32)
    fan = 3 * 3 * c
    w1 = jax.random.normal(k2, (c, c, 3, 3), jnp.float32) / np.sqrt(fan)
    w2 = jax.random.normal(k3, (c, c, 3, 3), jnp.float32) / np.sqrt(fan)

    out = resblock_pallas(x, w1, w2)
    out = jax.block_until_ready(out)

    ref = resblock_ref(x, w1, w2)
    # bf16 MXU operands vs the f32 HIGHEST-precision reference -> ~1e-2 tolerance.
    np.testing.assert_allclose(np.asarray(out), np.asarray(ref),
                               rtol=2e-2, atol=2e-2)
    print("KERNEL_OK")
</pallas_src>

<mosaic_0001>
module attributes {stable_mosaic.version = 11 : i64} {
  func.func @_resblock_kernel(%arg0: i32, %arg1: memref<1x16x16x128xf32, #tpu.memory_space<vmem>>, %arg2: memref<3x384x128xbf16, #tpu.memory_space<vmem>>, %arg3: memref<3x384x128xbf16, #tpu.memory_space<vmem>>, %arg4: memref<1x16x16x128xf32, #tpu.memory_space<vmem>>, %arg5: memref<18x16x384xbf16, #tpu.memory_space<vmem>>) attributes {dimension_semantics = [#tpu.dimension_semantics<parallel>], iteration_bounds = array<i64: 2>, scalar_prefetch = 0 : i64, scratch_operands = 1 : i64, tpu.core_type = #tpu.core_type<tc>, window_params = [{transform_indices = @transform_0, window_bounds = array<i64: 1, 16, 16, 128>}, {pipeline_mode = #tpu.pipeline_mode<synchronous>, transform_indices = @transform_1, window_bounds = array<i64: 3, 384, 128>}, {pipeline_mode = #tpu.pipeline_mode<synchronous>, transform_indices = @transform_2, window_bounds = array<i64: 3, 384, 128>}, {transform_indices = @transform_3, window_bounds = array<i64: 1, 16, 16, 128>}]} {
    %cst = arith.constant 0.000000e+00 : bf16
    %0 = vector.broadcast %cst : bf16 to vector<16x384xbf16>
    %c0 = arith.constant 0 : index
    %c0_0 = arith.constant 0 : index
    %c0_1 = arith.constant 0 : index
    %1 = vector.load %arg5[%c0, %c0_0, %c0_1] : memref<18x16x384xbf16, #tpu.memory_space<vmem>>, vector<1x16x384xbf16>
    %2 = vector.shape_cast %1 : vector<1x16x384xbf16> to vector<16x384xbf16>
    %3 = vector.shape_cast %0 : vector<16x384xbf16> to vector<1x16x384xbf16>
    tpu.vector_store %arg5[%c0, %c0_0, %c0_1], %3 {strides = array<i32>} : memref<18x16x384xbf16, #tpu.memory_space<vmem>>, vector<1x16x384xbf16>,
    %c17 = arith.constant 17 : index
    %c0_2 = arith.constant 0 : index
    %c0_3 = arith.constant 0 : index
    %4 = vector.load %arg5[%c17, %c0_2, %c0_3] : memref<18x16x384xbf16, #tpu.memory_space<vmem>>, vector<1x16x384xbf16>
    %5 = vector.shape_cast %4 : vector<1x16x384xbf16> to vector<16x384xbf16>
    %6 = vector.shape_cast %0 : vector<16x384xbf16> to vector<1x16x384xbf16>
    tpu.vector_store %arg5[%c17, %c0_2, %c0_3], %6 {strides = array<i32>} : memref<18x16x384xbf16, #tpu.memory_space<vmem>>, vector<1x16x384xbf16>,
    %c0_4 = arith.constant 0 : index
    %c0_5 = arith.constant 0 : index
    %c0_6 = arith.constant 0 : index
    %c0_7 = arith.constant 0 : index
    %7 = vector.load %arg1[%c0_4, %c0_5, %c0_6, %c0_7] : memref<1x16x16x128xf32, #tpu.memory_space<vmem>>, vector<1x16x16x128xf32>
    %8 = vector.shape_cast %7 : vector<1x16x16x128xf32> to vector<16x16x128xf32>
    %9 = vector.shape_cast %8 : vector<16x16x128xf32> to vector<256x128xf32>
    %10 = tpu.iota {dimensions = array<i32: 0>} : vector<256x128xi32>
    %c16_i32 = arith.constant 16 : i32
    %c0_i32 = arith.constant 0 : i32
    %11 = arith.cmpi eq, %c16_i32, %c0_i32 : i32
    %c1_i32 = arith.constant 1 : i32
    %12 = arith.select %11, %c1_i32, %c16_i32 : i32
    %13 = vector.broadcast %12 : i32 to vector<256x128xi32>
    %14 = arith.remsi %10, %13 : vector<256x128xi32>
    %c0_i32_8 = arith.constant 0 : i32
    %15 = vector.broadcast %c0_i32_8 : i32 to vector<256x128xi32>
    %16 = arith.cmpi ne, %14, %15 : vector<256x128xi32>
    %c0_i32_9 = arith.constant 0 : i32
    %17 = vector.broadcast %c0_i32_9 : i32 to vector<256x128xi32>
    %18 = arith.cmpi slt, %14, %17 : vector<256x128xi32>
    %c0_i32_10 = arith.constant 0 : i32
    %19 = arith.cmpi slt, %12, %c0_i32_10 : i32
    %20 = vector.broadcast %19 : i1 to vector<256x128xi1>
    %21 = vector.broadcast %20 : vector<256x128xi1> to vector<256x128xi1>
    %22 = arith.xori %18, %21 : vector<256x128xi1>
    %23 = arith.andi %22, %16 : vector<256x128xi1>
    %24 = vector.broadcast %12 : i32 to vector<256x128xi32>
    %25 = arith.addi %14, %24 : vector<256x128xi32>
    %26 = arith.select %23, %25, %14 : vector<256x128xi1>, vector<256x128xi32>
    %c0_i32_11 = arith.constant 0 : i32
    %27 = vector.broadcast %c0_i32_11 : i32 to vector<256x128xi32>
    %28 = arith.cmpi eq, %26, %27 : vector<256x128xi32>
    %c15_i32 = arith.constant 15 : i32
    %29 = vector.broadcast %c15_i32 : i32 to vector<256x128xi32>
    %30 = arith.cmpi eq, %26, %29 : vector<256x128xi32>
    %cst_12 = arith.constant dense<0.000000e+00> : vector<128xf32>
    %31 = vector.multi_reduction <add>, %9, %cst_12 [0] : vector<256x128xf32> to vector<128xf32>
    %32 = vector.shape_cast %31 : vector<128xf32> to vector<1x128xf32>
    %33 = arith.mulf %9, %9 : vector<256x128xf32>
    %cst_13 = arith.constant dense<0.000000e+00> : vector<128xf32>
    %34 = vector.multi_reduction <add>, %33, %cst_13 [0] : vector<256x128xf32> to vector<128xf32>
    %35 = vector.shape_cast %34 : vector<128xf32> to vector<1x128xf32>
    %cst_14 = arith.constant 3.906250e-03 : f32
    %36 = vector.broadcast %cst_14 : f32 to vector<1x128xf32>
    %37 = arith.mulf %32, %36 : vector<1x128xf32>
    %cst_15 = arith.constant 3.906250e-03 : f32
    %38 = vector.broadcast %cst_15 : f32 to vector<1x128xf32>
    %39 = arith.mulf %35, %38 : vector<1x128xf32>
    %40 = arith.mulf %37, %37 : vector<1x128xf32>
    %41 = arith.subf %39, %40 : vector<1x128xf32>
    %42 = vector.broadcast %37 : vector<1x128xf32> to vector<256x128xf32>
    %43 = arith.subf %9, %42 : vector<256x128xf32>
    %cst_16 = arith.constant 9.99999974E-6 : f32
    %44 = vector.broadcast %cst_16 : f32 to vector<1x128xf32>
    %45 = arith.addf %41, %44 : vector<1x128xf32>
    %46 = math.rsqrt %45 : vector<1x128xf32>
    %47 = vector.broadcast %46 : vector<1x128xf32> to vector<256x128xf32>
    %48 = arith.mulf %43, %47 : vector<256x128xf32>
    %cst_17 = arith.constant 0.000000e+00 : f32
    %49 = vector.broadcast %cst_17 : f32 to vector<256x128xf32>
    %50 = arith.maximumf %48, %49 : vector<256x128xf32>
    %c1_i32_18 = arith.constant 1 : i32
    %51 = tpu.dynamic_rotate %50 by %c1_i32_18 dim 0 : vector<256x128xf32>, i32 -> vector<256x128xf32>
    %cst_19 = arith.constant 0.000000e+00 : f32
    %52 = vector.broadcast %cst_19 : f32 to vector<256x128xf32>
    %53 = arith.select %28, %52, %51 : vector<256x128xi1>, vector<256x128xf32>
    %c255_i32 = arith.constant 255 : i32
    %54 = tpu.dynamic_rotate %50 by %c255_i32 dim 0 : vector<256x128xf32>, i32 -> vector<256x128xf32>
    %cst_20 = arith.constant 0.000000e+00 : f32
    %55 = vector.broadcast %cst_20 : f32 to vector<256x128xf32>
    %56 = arith.select %30, %55, %54 : vector<256x128xi1>, vector<256x128xf32>
    %57 = arith.truncf %53 : vector<256x128xf32> to vector<256x128xbf16>
    %58 = vector.shape_cast %57 : vector<256x128xbf16> to vector<16x16x128xbf16>
    %c1 = arith.constant 1 : index
    %c0_21 = arith.constant 0 : index
    %c0_22 = arith.constant 0 : index
    %59 = vector.load %arg5[%c1, %c0_21, %c0_22] : memref<18x16x384xbf16, #tpu.memory_space<vmem>>, vector<16x16x128xbf16>
    tpu.vector_store %arg5[%c1, %c0_21, %c0_22], %58 {strides = array<i32>} : memref<18x16x384xbf16, #tpu.memory_space<vmem>>, vector<16x16x128xbf16>,
    %60 = arith.truncf %50 : vector<256x128xf32> to vector<256x128xbf16>
    %61 = vector.shape_cast %60 : vector<256x128xbf16> to vector<16x16x128xbf16>
    %c1_23 = arith.constant 1 : index
    %c0_24 = arith.constant 0 : index
    %c128 = arith.constant 128 : index
    %62 = vector.load %arg5[%c1_23, %c0_24, %c128] : memref<18x16x384xbf16, #tpu.memory_space<vmem>>, vector<16x16x128xbf16>
    tpu.vector_store %arg5[%c1_23, %c0_24, %c128], %61 {strides = array<i32>} : memref<18x16x384xbf16, #tpu.memory_space<vmem>>, vector<16x16x128xbf16>,
    %63 = arith.truncf %56 : vector<256x128xf32> to vector<256x128xbf16>
    %64 = vector.shape_cast %63 : vector<256x128xbf16> to vector<16x16x128xbf16>
    %c1_25 = arith.constant 1 : index
    %c0_26 = arith.constant 0 : index
    %c256 = arith.constant 256 : index
    %65 = vector.load %arg5[%c1_25, %c0_26, %c256] : memref<18x16x384xbf16, #tpu.memory_space<vmem>>, vector<16x16x128xbf16>
    tpu.vector_store %arg5[%c1_25, %c0_26, %c256], %64 {strides = array<i32>} : memref<18x16x384xbf16, #tpu.memory_space<vmem>>, vector<16x16x128xbf16>,
    %cst_27 = arith.constant 0.000000e+00 : f32
    %66 = vector.broadcast %cst_27 : f32 to vector<256x128xf32>
    %c0_28 = arith.constant 0 : index
    %c0_29 = arith.constant 0 : index
    %c0_30 = arith.constant 0 : index
    %67 = vector.load %arg5[%c0_28, %c0_29, %c0_30] : memref<18x16x384xbf16, #tpu.memory_space<vmem>>, vector<16x16x384xbf16>
    %68 = vector.shape_cast %67 : vector<16x16x384xbf16> to vector<256x384xbf16>
    %c0_31 = arith.constant 0 : index
    %c0_32 = arith.constant 0 : index
    %c0_33 = arith.constant 0 : index
    %69 = vector.load %arg2[%c0_31, %c0_32, %c0_33] : memref<3x384x128xbf16, #tpu.memory_space<vmem>>, vector<1x384x128xbf16>
    %70 = vector.shape_cast %69 : vector<1x384x128xbf16> to vector<384x128xbf16>
    %cst_34 = arith.constant dense<0.000000e+00> : vector<256x128xf32>
    %71 = tpu.matmul %68, %70, %cst_34 {dimension_numbers = #tpu.dot_dimension_numbers<[1], [0], [0], [1], [0, 0, 1, 1], [], []>} : vector<256x384xbf16>, vector<384x128xbf16>, vector<256x128xf32> -> vector<256x128xf32>
    %72 = arith.addf %66, %71 : vector<256x128xf32>
    %c1_35 = arith.constant 1 : index
    %c0_36 = arith.constant 0 : index
    %c0_37 = arith.constant 0 : index
    %73 = vector.load %arg5[%c1_35, %c0_36, %c0_37] : memref<18x16x384xbf16, #tpu.memory_space<vmem>>, vector<16x16x384xbf16>
    %74 = vector.shape_cast %73 : vector<16x16x384xbf16> to vector<256x384xbf16>
    %c1_38 = arith.constant 1 : index
    %c0_39 = arith.constant 0 : index
    %c0_40 = arith.constant 0 : index
    %75 = vector.load %arg2[%c1_38, %c0_39, %c0_40] : memref<3x384x128xbf16, #tpu.memory_space<vmem>>, vector<1x384x128xbf16>
    %76 = vector.shape_cast %75 : vector<1x384x128xbf16> to vector<384x128xbf16>
    %cst_41 = arith.constant dense<0.000000e+00> : vector<256x128xf32>
    %77 = tpu.matmul %74, %76, %cst_41 {dimension_numbers = #tpu.dot_dimension_numbers<[1], [0], [0], [1], [0, 0, 1, 1], [], []>} : vector<256x384xbf16>, vector<384x128xbf16>, vector<256x128xf32> -> vector<256x128xf32>
    %78 = arith.addf %72, %77 : vector<256x128xf32>
    %c2 = arith.constant 2 : index
    %c0_42 = arith.constant 0 : index
    %c0_43 = arith.constant 0 : index
    %79 = vector.load %arg5[%c2, %c0_42, %c0_43] : memref<18x16x384xbf16, #tpu.memory_space<vmem>>, vector<16x16x384xbf16>
    %80 = vector.shape_cast %79 : vector<16x16x384xbf16> to vector<256x384xbf16>
    %c2_44 = arith.constant 2 : index
    %c0_45 = arith.constant 0 : index
    %c0_46 = arith.constant 0 : index
    %81 = vector.load %arg2[%c2_44, %c0_45, %c0_46] : memref<3x384x128xbf16, #tpu.memory_space<vmem>>, vector<1x384x128xbf16>
    %82 = vector.shape_cast %81 : vector<1x384x128xbf16> to vector<384x128xbf16>
    %cst_47 = arith.constant dense<0.000000e+00> : vector<256x128xf32>
    %83 = tpu.matmul %80, %82, %cst_47 {dimension_numbers = #tpu.dot_dimension_numbers<[1], [0], [0], [1], [0, 0, 1, 1], [], []>} : vector<256x384xbf16>, vector<384x128xbf16>, vector<256x128xf32> -> vector<256x128xf32>
    %84 = arith.addf %78, %83 : vector<256x128xf32>
    %cst_48 = arith.constant dense<0.000000e+00> : vector<128xf32>
    %85 = vector.multi_reduction <add>, %84, %cst_48 [0] : vector<256x128xf32> to vector<128xf32>
    %86 = vector.shape_cast %85 : vector<128xf32> to vector<1x128xf32>
    %87 = arith.mulf %84, %84 : vector<256x128xf32>
    %cst_49 = arith.constant dense<0.000000e+00> : vector<128xf32>
    %88 = vector.multi_reduction <add>, %87, %cst_49 [0] : vector<256x128xf32> to vector<128xf32>
    %89 = vector.shape_cast %88 : vector<128xf32> to vector<1x128xf32>
    %cst_50 = arith.constant 3.906250e-03 : f32
    %90 = vector.broadcast %cst_50 : f32 to vector<1x128xf32>
    %91 = arith.mulf %86, %90 : vector<1x128xf32>
    %cst_51 = arith.constant 3.906250e-03 : f32
    %92 = vector.broadcast %cst_51 : f32 to vector<1x128xf32>
    %93 = arith.mulf %89, %92 : vector<1x128xf32>
    %94 = arith.mulf %91, %91 : vector<1x128xf32>
    %95 = arith.subf %93, %94 : vector<1x128xf32>
    %96 = vector.broadcast %91 : vector<1x128xf32> to vector<256x128xf32>
    %97 = arith.subf %84, %96 : vector<256x128xf32>
    %cst_52 = arith.constant 9.99999974E-6 : f32
    %98 = vector.broadcast %cst_52 : f32 to vector<1x128xf32>
    %99 = arith.addf %95, %98 : vector<1x128xf32>
    %100 = math.rsqrt %99 : vector<1x128xf32>
    %101 = vector.broadcast %100 : vector<1x128xf32> to vector<256x128xf32>
    %102 = arith.mulf %97, %101 : vector<256x128xf32>
    %cst_53 = arith.constant 0.000000e+00 : f32
    %103 = vector.broadcast %cst_53 : f32 to vector<256x128xf32>
    %104 = arith.maximumf %102, %103 : vector<256x128xf32>
    %c1_i32_54 = arith.constant 1 : i32
    %105 = tpu.dynamic_rotate %104 by %c1_i32_54 dim 0 : vector<256x128xf32>, i32 -> vector<256x128xf32>
    %cst_55 = arith.constant 0.000000e+00 : f32
    %106 = vector.broadcast %cst_55 : f32 to vector<256x128xf32>
    %107 = arith.select %28, %106, %105 : vector<256x128xi1>, vector<256x128xf32>
    %c255_i32_56 = arith.constant 255 : i32
    %108 = tpu.dynamic_rotate %104 by %c255_i32_56 dim 0 : vector<256x128xf32>, i32 -> vector<256x128xf32>
    %cst_57 = arith.constant 0.000000e+00 : f32
    %109 = vector.broadcast %cst_57 : f32 to vector<256x128xf32>
    %110 = arith.select %30, %109, %108 : vector<256x128xi1>, vector<256x128xf32>
    %111 = arith.truncf %107 : vector<256x128xf32> to vector<256x128xbf16>
    %112 = vector.shape_cast %111 : vector<256x128xbf16> to vector<16x16x128xbf16>
    %c1_58 = arith.constant 1 : index
    %c0_59 = arith.constant 0 : index
    %c0_60 = arith.constant 0 : index
    %113 = vector.load %arg5[%c1_58, %c0_59, %c0_60] : memref<18x16x384xbf16, #tpu.memory_space<vmem>>, vector<16x16x128xbf16>
    tpu.vector_store %arg5[%c1_58, %c0_59, %c0_60], %112 {strides = array<i32>} : memref<18x16x384xbf16, #tpu.memory_space<vmem>>, vector<16x16x128xbf16>,
    %114 = arith.truncf %104 : vector<256x128xf32> to vector<256x128xbf16>
    %115 = vector.shape_cast %114 : vector<256x128xbf16> to vector<16x16x128xbf16>
    %c1_61 = arith.constant 1 : index
    %c0_62 = arith.constant 0 : index
    %c128_63 = arith.constant 128 : index
    %116 = vector.load %arg5[%c1_61, %c0_62, %c128_63] : memref<18x16x384xbf16, #tpu.memory_space<vmem>>, vector<16x16x128xbf16>
    tpu.vector_store %arg5[%c1_61, %c0_62, %c128_63], %115 {strides = array<i32>} : memref<18x16x384xbf16, #tpu.memory_space<vmem>>, vector<16x16x128xbf16>,
    %117 = arith.truncf %110 : vector<256x128xf32> to vector<256x128xbf16>
    %118 = vector.shape_cast %117 : vector<256x128xbf16> to vector<16x16x128xbf16>
    %c1_64 = arith.constant 1 : index
    %c0_65 = arith.constant 0 : index
    %c256_66 = arith.constant 256 : index
    %119 = vector.load %arg5[%c1_64, %c0_65, %c256_66] : memref<18x16x384xbf16, #tpu.memory_space<vmem>>, vector<16x16x128xbf16>
    tpu.vector_store %arg5[%c1_64, %c0_65, %c256_66], %118 {strides = array<i32>} : memref<18x16x384xbf16, #tpu.memory_space<vmem>>, vector<16x16x128xbf16>,
    %cst_67 = arith.constant 0.000000e+00 : f32
    %120 = vector.broadcast %cst_67 : f32 to vector<256x128xf32>
    %c0_68 = arith.constant 0 : index
    %c0_69 = arith.constant 0 : index
    %c0_70 = arith.constant 0 : index
    %121 = vector.load %arg5[%c0_68, %c0_69, %c0_70] : memref<18x16x384xbf16, #tpu.memory_space<vmem>>, vector<16x16x384xbf16>
    %122 = vector.shape_cast %121 : vector<16x16x384xbf16> to vector<256x384xbf16>
    %c0_71 = arith.constant 0 : index
    %c0_72 = arith.constant 0 : index
    %c0_73 = arith.constant 0 : index
    %123 = vector.load %arg3[%c0_71, %c0_72, %c0_73] : memref<3x384x128xbf16, #tpu.memory_space<vmem>>, vector<1x384x128xbf16>
    %124 = vector.shape_cast %123 : vector<1x384x128xbf16> to vector<384x128xbf16>
    %cst_74 = arith.constant dense<0.000000e+00> : vector<256x128xf32>
    %125 = tpu.matmul %122, %124, %cst_74 {dimension_numbers = #tpu.dot_dimension_numbers<[1], [0], [0], [1], [0, 0, 1, 1], [], []>} : vector<256x384xbf16>, vector<384x128xbf16>, vector<256x128xf32> -> vector<256x128xf32>
    %126 = arith.addf %120, %125 : vector<256x128xf32>
    %c1_75 = arith.constant 1 : index
    %c0_76 = arith.constant 0 : index
    %c0_77 = arith.constant 0 : index
    %127 = vector.load %arg5[%c1_75, %c0_76, %c0_77] : memref<18x16x384xbf16, #tpu.memory_space<vmem>>, vector<16x16x384xbf16>
    %128 = vector.shape_cast %127 : vector<16x16x384xbf16> to vector<256x384xbf16>
    %c1_78 = arith.constant 1 : index
    %c0_79 = arith.constant 0 : index
    %c0_80 = arith.constant 0 : index
    %129 = vector.load %arg3[%c1_78, %c0_79, %c0_80] : memref<3x384x128xbf16, #tpu.memory_space<vmem>>, vector<1x384x128xbf16>
    %130 = vector.shape_cast %129 : vector<1x384x128xbf16> to vector<384x128xbf16>
    %cst_81 = arith.constant dense<0.000000e+00> : vector<256x128xf32>
    %131 = tpu.matmul %128, %130, %cst_81 {dimension_numbers = #tpu.dot_dimension_numbers<[1], [0], [0], [1], [0, 0, 1, 1], [], []>} : vector<256x384xbf16>, vector<384x128xbf16>, vector<256x128xf32> -> vector<256x128xf32>
    %132 = arith.addf %126, %131 : vector<256x128xf32>
    %c2_82 = arith.constant 2 : index
    %c0_83 = arith.constant 0 : index
    %c0_84 = arith.constant 0 : index
    %133 = vector.load %arg5[%c2_82, %c0_83, %c0_84] : memref<18x16x384xbf16, #tpu.memory_space<vmem>>, vector<16x16x384xbf16>
    %134 = vector.shape_cast %133 : vector<16x16x384xbf16> to vector<256x384xbf16>
    %c2_85 = arith.constant 2 : index
    %c0_86 = arith.constant 0 : index
    %c0_87 = arith.constant 0 : index
    %135 = vector.load %arg3[%c2_85, %c0_86, %c0_87] : memref<3x384x128xbf16, #tpu.memory_space<vmem>>, vector<1x384x128xbf16>
    %136 = vector.shape_cast %135 : vector<1x384x128xbf16> to vector<384x128xbf16>
    %cst_88 = arith.constant dense<0.000000e+00> : vector<256x128xf32>
    %137 = tpu.matmul %134, %136, %cst_88 {dimension_numbers = #tpu.dot_dimension_numbers<[1], [0], [0], [1], [0, 0, 1, 1], [], []>} : vector<256x384xbf16>, vector<384x128xbf16>, vector<256x128xf32> -> vector<256x128xf32>
    %138 = arith.addf %132, %137 : vector<256x128xf32>
    %139 = arith.addf %138, %9 : vector<256x128xf32>
    %140 = vector.shape_cast %139 : vector<256x128xf32> to vector<16x16x128xf32>
    %c0_89 = arith.constant 0 : index
    %c0_90 = arith.constant 0 : index
    %c0_91 = arith.constant 0 : index
    %c0_92 = arith.constant 0 : index
    %141 = vector.load %arg4[%c0_89, %c0_90, %c0_91, %c0_92] : memref<1x16x16x128xf32, #tpu.memory_space<vmem>>, vector<1x16x16x128xf32>
    %142 = vector.shape_cast %141 : vector<1x16x16x128xf32> to vector<16x16x128xf32>
    %143 = vector.shape_cast %140 : vector<16x16x128xf32> to vector<1x16x16x128xf32>
    tpu.vector_store %arg4[%c0_89, %c0_90, %c0_91, %c0_92], %143 {strides = array<i32>} : memref<1x16x16x128xf32, #tpu.memory_space<vmem>>, vector<1x16x16x128xf32>,
    return
  }
  func.func @transform_0(%arg0: i32) -> (i32, i32, i32, i32) {
    %c0_i32 = arith.constant 0 : i32
    %c0_i32_0 = arith.constant 0 : i32
    %c0_i32_1 = arith.constant 0 : i32
    %c0_i32_2 = arith.constant 0 : i32
    return %arg0, %c0_i32, %c0_i32_0, %c0_i32_1 : i32, i32, i32, i32
  }
  func.func @transform_1(%arg0: i32) -> (i32, i32, i32) {
    %c0_i32 = arith.constant 0 : i32
    %c0_i32_0 = arith.constant 0 : i32
    %c0_i32_1 = arith.constant 0 : i32
    %c0_i32_2 = arith.constant 0 : i32
    return %c0_i32, %c0_i32_0, %c0_i32_1 : i32, i32, i32
  }
  func.func @transform_2(%arg0: i32) -> (i32, i32, i32) {
    %c0_i32 = arith.constant 0 : i32
    %c0_i32_0 = arith.constant 0 : i32
    %c0_i32_1 = arith.constant 0 : i32
    %c0_i32_2 = arith.constant 0 : i32
    return %c0_i32, %c0_i32_0, %c0_i32_1 : i32, i32, i32
  }
  func.func @transform_3(%arg0: i32) -> (i32, i32, i32, i32) {
    %c0_i32 = arith.constant 0 : i32
    %c0_i32_0 = arith.constant 0 : i32
    %c0_i32_1 = arith.constant 0 : i32
    %c0_i32_2 = arith.constant 0 : i32
    return %arg0, %c0_i32, %c0_i32_0, %c0_i32_1 : i32, i32, i32, i32
  }
}

</mosaic_0001>

<bundles_post_ra>
// kernel: tpu_custom_call.1
= control target key start
LH: loop header
LB: loop body
LE: loop exit
PB: predicated region body
PF: predicated region fallthrough
CT: control target
= control target key end

     0   :  { %8 = vsyncpa [#allocation4], 0  ;;  %s11491_s0 = inlined_call_operand.hbm [shape: f32[2,16,16,128], index: 0, kind: input, shape index: {}]   ;;  %s11492_s1 = inlined_call_operand.hbm [shape: bf16[3,384,128], index: 1, kind: input, shape index: {}]   ;;  %s11493_s2 = inlined_call_operand.hbm [shape: bf16[3,384,128], index: 2, kind: input, shape index: {}]   ;;  %s11494_s3 = inlined_call_operand.hbm [shape: f32[2,16,16,128], index: 3, kind: output, shape index: {}]  }
   0x1   :  { %10 = vsyncpa [#allocation4 + $0x1], 0 }
   0x2   :  { %11 = vsyncpa [#allocation7], 0 }
   0x3   :  { %12 = vsyncpa [#allocation5], 0 }
   0x4   :  { %14 = vsyncpa [#allocation5 + $0x1], 0  ;;  %s8146_s12 = smov 0   ;;  %s8148_s13 = smov 0  }
   0x5   :  { %s8150_s14 = smov 0   ;;  %s8152_s15 = smov 0  }
   0x6 LB: > { %s8167_s16 = sadd.s32 4294967295, %s8112_s15   ;;  %s5345_s17 = sadd.s32 4294967294, %s8112_s15   ;;  %s8112_s15 = sphi %s8152_s15, %s12214_s15   ;;  %s8108_s14 = sphi %s8150_s14, %s12213_s14   ;;  %s8104_s13 = sphi %s8148_s13, %s12212_s13   ;;  %s8100_s12 = sphi %s8146_s12, %s12211_s12  }
   0x7   : > { %p40_p0 = scmp.ne.s32.totalorder %s8104_s13, %s8100_s12  ;;  %p11495_p1 = scmp.eq.s32.totalorder %s8167_s16, 0 }
   0x8   : > { %p112_p3 = scmp.eq.s32.totalorder %s5345_s17, 1  ;;  %p5346_p5 = scmp.ge.s32.totalorder %s8112_s15, 1 }
   0x9   : > { %p8176_p4 = por %p11495_p1, %p40_p0  ;;  %p119_p7 = scmp.lt.s32.totalorder %s8112_s15, 3 }
   0xa   : > { %p8181_p6 = por %p112_p3, %p40_p0  ;;  %s8114_s21 = smov [#allocation6]  }
   0xb   : > { %s11713_s18 = scalar_select %p8176_p4, 1, 0 }
   0xc   : > { %s11714_s19 = scalar_select %p8181_p6, 1, 0 }
   0xd   : > { %p8186_p8 = pnand %p5346_p5, %p119_p7  ;;  %s131_s22 = sshll.u32 %s8114_s21, 4  ;;  %s8190_s22 = int_to_ptr.vmem [resolvable:$true] %s131_s22 }
   0xe   : > { %s8115_s24 = smov [#allocation8]   ;;  %s7956_s28 = scalar_lea.hbm %s11492_s1, 9216 }
   0xf   : > { %p7681_p9 = pneg %p8186_p8  ;;  %s144_s25 = sshll.u32 %s8115_s24, 4  ;;  %s8201_s25 = int_to_ptr.vmem [resolvable:$true] %s144_s25 }
  0x10   : > { %p7957_p12 = scmp.ne.s32.totalorder %s11492_s1, %s7956_s28  ;;  %p7963_p5 = scmp.lt.u32.totalorder %s7956_s28, %s11492_s1 }
  0x11   : > { %p8197_p11 = pnand %p7681_p9, %p11495_p1 }
  0x13   : > { %p7958_p13 = pneg %p8197_p11 }
  0x15   : > { %p7959_p0 = pnand %p7958_p13, %p7957_p12 }
  0x17   : > { %p7960_p3 = pneg %p7959_p0 }
  0x19   : > { %p7965_p7 = pnand %p7963_p5, %p7960_p3 }
  0x1b   : > { %7968 = shalt.err (!%p7965_p7)
}
  0x1c   : > { %s7969_s6 = scalar_lea.vmem %s8190_s22, 9216  ;;  %p7977_p2 = scmp.lt.s32.totalorder %s8190_s22, %s8190_s22 }
  0x1d   : > { %p7970_p9 = scmp.ne.s32.totalorder %s8190_s22, %s7969_s6  ;;  %p7978_p12 = scmp.lt.s32.totalorder %s7969_s6, %s7969_s6 }
  0x1f   : > { %p7972_p10 = pnand %p7970_p9, %p7958_p13  ;;  %p7979_p0 = por %p7978_p12, %p7977_p2 }
  0x21   : > { %p7973_p1 = pneg %p7972_p10 }
  0x23   : > { %p7980_p6 = pnand %p7979_p0, %p7973_p1 }
  0x25   : > { %7983 = shalt.err (!%p7980_p6)
}
  0x26   : > { %s8116_s7 = smov 64   ;;  %s8117_s8 = smov 4  }
  0x27   : > { %7684 = dma.hbm_to_vmem [thread:$0]  (!%p8197_p11), %s11492_s1, 9216, %s8190_s22, [#allocation7], %s8116_s7, %s8116_s7, %s8117_s8  }
  0x28   : > { %s7984_s21 = scalar_lea.hbm %s11493_s2, 9216 }
  0x29   : > { %p7985_p2 = scmp.ne.s32.totalorder %s11493_s2, %s7984_s21  ;;  %p7991_p10 = scmp.lt.u32.totalorder %s7984_s21, %s11493_s2 }
  0x2b   : > { %p7987_p1 = pnand %p7985_p2, %p7958_p13 }
  0x2d   : > { %p7988_p6 = pneg %p7987_p1 }
  0x2f   : > { %p7993_p3 = pnand %p7991_p10, %p7988_p6 }
  0x31   : > { %7996 = shalt.err (!%p7993_p3)
}
  0x32   : > { %s7997_s22 = scalar_lea.vmem %s8201_s25, 9216  ;;  %p8005_p12 = scmp.lt.s32.totalorder %s8201_s25, %s8201_s25 }
  0x33   : > { %p7998_p5 = scmp.ne.s32.totalorder %s8201_s25, %s7997_s22  ;;  %p8006_p0 = scmp.lt.s32.totalorder %s7997_s22, %s7997_s22 }
  0x35   : > { %p8000_p7 = pnand %p7998_p5, %p7958_p13  ;;  %p8007_p2 = por %p8006_p0, %p8005_p12 }
  0x37   : > { %p8001_p9 = pneg %p8000_p7 }
  0x39   : > { %p8008_p1 = pnand %p8007_p2, %p8001_p9 }
  0x3b   : > { %8011 = shalt.err (!%p8008_p1)
}
  0x3c   : > { %7687 = dma.hbm_to_vmem [thread:$0]  (!%p8197_p11), %s11493_s2, 9216, %s8201_s25, [#allocation7], %s8116_s7, %s8116_s7, %s8117_s8  }
  0x3d   : > { %s8256_s4 = sadd.s32 1, %s8112_s15   ;;  %s27_s23 = sadd.s32 1, %s8108_s14 }
  0x3e   : > { %s24_s5 = ssub.s32 %s8112_s15, %s8256_s4  ;;  %p34_p13 = scmp.ne.s32.totalorder %s8108_s14, %s8104_s13 }
  0x3f   : > { %p25_p6 = scmp.eq.s32.totalorder %s24_s5, 0  ;;  %p35_p10 = scmp.eq.s32.totalorder %s8112_s15, 0 }
  0x40   : > { %p11717_p3 = scmp.eq.s32.totalorder %s8167_s16, 1  ;;  %p7698_p7 = scmp.lt.s32.totalorder %s8112_s15, 2 }
  0x41   : > { %s8272_s9 = scalar_select %p25_p6, %s8108_s14, %s27_s23  }
  0x42   : > { %p8266_p5 = por %p11717_p3, %p34_p13  ;;  %p36_p9 = por %p35_p10, %p34_p13 }
  0x43   : > { %s158_s10 = sand.u32 1, %s8108_s14   ;;  %s5507_s25 = sshll.u32 %s8112_s15, 12 }
  0x44   : > { %s11718_s6 = scalar_select %p8266_p5, 1, 0 }
  0x45   : > { %s5350_s11 = sshll.u32 %s158_s10, 8  ;;  %s8279_s17 = scalar_lea.hbm %s11491_s0, %s5507_s25 }
  0x46   : > { %s162_s21 = scalar_lea.vmem [#allocation3], %s5350_s11  ;;  %p8283_p11 = pnand %p7698_p7, %p36_p9 }
  0x47   : > { %s169_s24 = sshll.u32 %s162_s21, 4  ;;  %s8287_s27 = scalar_lea.sflag [#allocation4], %s158_s10  ;;  %s8281_s24 = int_to_ptr.vmem [resolvable:$true] %s169_s24 }
  0x48   : > { %s8012_s28 = scalar_lea.hbm %s8279_s17, 4096  ;;  %p8014_p0 = pneg %p8283_p11 }
  0x49   : > { %p8013_p12 = scmp.ne.s32.totalorder %s8279_s17, %s8012_s28  ;;  %s8017_s30 = scalar_lea.hbm %s11491_s0, 8192 }
  0x4a   : > { %p8018_p13 = scmp.lt.u32.totalorder %s8279_s17, %s11491_s0  ;;  %p8019_p6 = scmp.lt.u32.totalorder %s8017_s30, %s8012_s28 }
  0x4b   : > { %p8015_p2 = pnand %p8014_p0, %p8013_p12  ;;  %p8021_p3 = scmp.lt.u32.totalorder %s8012_s28, %s8279_s17 }
  0x4c   : > { %p8020_p10 = por %p8019_p6, %p8018_p13 }
  0x4d   : > { %p8016_p1 = pneg %p8015_p2 }
  0x4e   : > { %p8022_p7 = por %p8021_p3, %p8020_p10 }
  0x50   : > { %p8023_p9 = pnand %p8022_p7, %p8016_p1 }
  0x52   : > { %8026 = shalt.err (!%p8023_p9)
}
  0x53   : > { %s8027_s10 = scalar_lea.vmem %s8281_s24, 4096  ;;  %s8118_s11 = smov [#allocation3]  }
  0x54   : > { %p8028_p12 = scmp.ne.s32.totalorder %s8281_s24, %s8027_s10  ;;  %s8032_s25 = sshll.u32 %s8118_s11, 4  ;;  %s8033_s25 = int_to_ptr.vmem [resolvable:$false] %s8032_s25 }
  0x55   : > { %s8034_s7 = scalar_lea.vmem %s8033_s25, 8192  ;;  %p8035_p4 = scmp.lt.s32.totalorder %s8281_s24, %s8033_s25 }
  0x56   : > { %p8030_p2 = pnand %p8028_p12, %p8014_p0  ;;  %p8036_p13 = scmp.lt.s32.totalorder %s8034_s7, %s8027_s10 }
  0x58   : > { %p8031_p5 = pneg %p8030_p2  ;;  %p8037_p6 = por %p8036_p13, %p8035_p4 }
  0x5a   : > { %p8038_p10 = pnand %p8037_p6, %p8031_p5 }
  0x5c   : > { %8041 = shalt.err (!%p8038_p10)
}
  0x5d   : > { %s8119_s8 = smov 128   ;;  %s8120_s21 = smov 8  }
  0x5e   : > { %7691 = dma.hbm_to_vmem [thread:$0]  (!%p8283_p11), %s8279_s17, 4096, %s8281_s24, %s8287_s27, %s8119_s8, %s8119_s8, %s8120_s21  }
  0x5f   : > { %181 = sbr.rel (%p8186_p8) target bundleno = 1369 (0x559), region = 32 }
  0x66   : > { %s8318_s28 = sand.u32 1, %s8104_s13   ;;  %p11720_p4 = scmp.ne.s32.totalorder %s11713_s18, 0 }
  0x67   : > { %s5354_s22 = sshll.u32 %s8318_s28, 8  ;;  %s184_s29 = scalar_lea.sflag [#allocation4], %s8318_s28 }
  0x68   : > { %s8324_s30 = scalar_lea.vmem [#allocation3], %s5354_s22 }
  0x69   : > { %8087 = dma.done.wait (%p11720_p4), %s184_s29, 4096  }
  0x6a   : > { %8089 = vsyncadd (%p11720_p4), %s184_s29, 4294963200  ;;  %p11721_p5 = scmp.eq.s32.totalorder %s8167_s16, 0 }
  0x6c   : > { %8091 = dma.done.wait (%p11721_p5), [#allocation7], 18432   ;;  %p11722_p8 = pmov %p11721_p5 }
  0x6d   : > { %v11498_v0 = vmov 0   ;;  %v258_v1 = vlaneseq  ;;  %v7776_v2 = vld [vmem:[#allocation6 + $0x40] sm:$0xff]   ;;  %v7780_v7 = vld [vmem:[#allocation6 + $0x48] sm:$0xff]   ;;  %v7784_v12 = vld [vmem:[#allocation6 + $0x50] sm:$0xff]   ;;  %vm11551_vm4 = vmmov 1   ;;  %s11348_s18 = scalar_lea.vmem [#allocation9], %s5354_s22 }
  0x6e   : > { %8093 = vsyncadd (%p11722_p8), [#allocation7], 4294948864  ;;  %2073 = vmatprep.mubr.bf16.mxu1 %v11498_v0  ;;  %v7777_v4 = vld [vmem:[#allocation6] sm:$0xff]   ;;  %6381 = vmatprep.subr.bf16.mxu1 %v7776_v2  ;;  %v7781_v9 = vld [vmem:[#allocation6 + $0x8] sm:$0xff]   ;;  %s5508_s20 = sshll.u32 %s8167_s16, 12  ;;  %s5253_s17 = sshll.u32 %s11348_s18, 4  ;;  %s11443_s17 = int_to_ptr.vmem [resolvable:$true] %s5253_s17 }
  0x6f   : > { %v8335_v3 = vshrl.u32 %v258_v1, 7  ;;  %v7778_v5 = vld [vmem:[#allocation6 + $0x100] sm:$0xff]   ;;  %6382 = vmatpush3.bf16.msra.mxu1 %v7777_v4  ;;  %v7782_v10 = vld [vmem:[#allocation6 + $0x108] sm:$0xff]   ;;  %v7785_v13 = vld [vmem:[#allocation6 + $0x10] sm:$0xff]   ;;  %s11441_s16 = scalar_lea.hbm %s11494_s3, %s5508_s20  ;;  %s5240_s27 = scalar_lea.sflag [#allocation5], %s8318_s28 }
  0x70   : > { %v7779_v6 = vld [vmem:[#allocation6 + $0xc0] sm:$0xff]   ;;  %6245 = vmatprep.subr.bf16.mxu0 %v7778_v5  ;;  %6383 = vmatprep.subr.bf16.mxu1 %v7780_v7  ;;  %v7783_v11 = vld [vmem:[#allocation6 + $0xc8] sm:$0xff]   ;;  %v7786_v14 = vld [vmem:[#allocation6 + $0x110] sm:$0xff]   ;;  %s8042_s23 = scalar_lea.vmem %s11443_s17, 4096  ;;  %p12208_p0 = scmp.ne.s32.totalorder %s11718_s6, 0 }
  0x71   : > { %11723 = vst [vmem:[#allocation13_spill] sm:$0xff] %v8335_v3  ;;  %6246 = vmatpush3.bf16.msra.mxu0 %v7779_v6  ;;  %v8339_v15 = vadd.s32 16, %v8335_v3  ;;  %v7787_v16 = vld [vmem:[#allocation6 + $0xd0] sm:$0xff]   ;;  %v7788_v17 = vld [vmem:[#allocation6 + $0x58] sm:$0xff]   ;;  %v7792_v22 = vld [vmem:[#allocation6 + $0x60] sm:$0xff]   ;;  %v8343_v25 = vadd.s32 32, %v8335_v3  ;;  %p8043_p11 = scmp.ne.s32.totalorder %s11443_s17, %s8042_s23 }
  0x72   : > { %6247 = vmatprep.subr.bf16.mxu0 %v7782_v10  ;;  %v7789_v19 = vld [vmem:[#allocation6 + $0x18] sm:$0xff]   ;;  %v7793_v23 = vld [vmem:[#allocation6 + $0x20] sm:$0xff]   ;;  %v7796_v27 = vld [vmem:[#allocation6 + $0x68] sm:$0xff]   ;;  %v8347_v35 = vadd.s32 48, %v8335_v3  ;;  %v8388_v60 = vadd.s32 64, %v8335_v3  ;;  %vm11542_vm0 = vcmp.lt.s32.totalorder %v8335_v3, 7 }
  0x73   : > { %6384 = vmatpush3.bf16.msra.mxu1 %v7781_v9  ;;  %v7790_v20 = vld [vmem:[#allocation6 + $0x118] sm:$0xff]   ;;  %v7794_v24 = vld [vmem:[#allocation6 + $0x120] sm:$0xff]   ;;  %v7797_v29 = vld [vmem:[#allocation6 + $0x28] sm:$0xff]   ;;  %vm11541_vm1 = vcmp.lt.s32.totalorder %v8335_v3, 1  ;;  %p8044_p1 = pnand %p8043_p11, %p12208_p0  ;;  %s8123_s5 = smov [#allocation9]  }
  0x74   : > { %6385 = vmatprep.subr.bf16.mxu1 %v7784_v12  ;;  %v7791_v21 = vld [vmem:[#allocation6 + $0xd8] sm:$0xff]   ;;  %v7795_v26 = vld [vmem:[#allocation6 + $0xe0] sm:$0xff]   ;;  %v7798_v30 = vld [vmem:[#allocation6 + $0x128] sm:$0xff]   ;;  %v8408_v12 = vadd.s32 80, %v8335_v3  ;;  %s8046_s10 = sshll.u32 %s8123_s5, 4  ;;  %s8047_s10 = int_to_ptr.vmem [resolvable:$false] %s8046_s10 }
  0x75   : > { %6248 = vmatpush3.bf16.msra.mxu0 %v7783_v11  ;;  %v7799_v31 = vld [vmem:[#allocation6 + $0xe8] sm:$0xff]   ;;  %v7800_v32 = vld [vmem:[#allocation6 + $0x70] sm:$0xff]   ;;  %v7804_v37 = vld [vmem:[#allocation6 + $0x78] sm:$0xff]   ;;  %p8045_p3 = pneg %p8044_p1  ;;  %s8048_s11 = scalar_lea.vmem %s8047_s10, 8192 }
  0x76   : > { %6249 = vmatprep.subr.bf16.mxu0 %v7786_v14  ;;  %v7801_v33 = vld [vmem:[#allocation6 + $0x30] sm:$0xff]   ;;  %v7805_v39 = vld [vmem:[#allocation6 + $0x38] sm:$0xff]   ;;  %v8351_v42 = vld [vmem:[%s8324_s30] sm:$0xff]  ;;  %p8049_p7 = scmp.lt.s32.totalorder %s11443_s17, %s8047_s10  ;;  %p8050_p9 = scmp.lt.s32.totalorder %s8048_s11, %s8042_s23 }
  0x77   : > { %6386 = vmatpush3.bf16.msra.mxu1 %v7785_v13  ;;  %v7802_v34 = vld [vmem:[#allocation6 + $0x130] sm:$0xff]   ;;  %v7806_v40 = vld [vmem:[#allocation6 + $0x138] sm:$0xff]   ;;  %v8354_v43 = vld [vmem:[%s8324_s30 + $0x8] sm:$0xff]  ;;  %v776_v47 = vmul.f32 %v8351_v42, %v8351_v42 }
  0x78   : > { %6387 = vmatprep.subr.bf16.mxu1 %v7788_v17  ;;  %v7803_v36 = vld [vmem:[#allocation6 + $0xf0] sm:$0xff]   ;;  %v7807_v41 = vld [vmem:[#allocation6 + $0xf8] sm:$0xff]   ;;  %v739_v46 = vadd.f32 %v8354_v43, %v8351_v42  ;;  %v777_v48 = vmul.f32 %v8354_v43, %v8354_v43  ;;  %v8372_v50 = vld [vmem:[%s8324_s30 + $0x20] sm:$0xff]  ;;  %p8051_p12 = por %p8050_p9, %p8049_p7 }
  0x79   : > { %6250 = vmatpush3.bf16.msra.mxu0 %v7787_v16  ;;  %v8357_v44 = vld [vmem:[%s8324_s30 + $0x10] sm:$0xff]  ;;  %v8360_v45 = vld [vmem:[%s8324_s30 + $0x18] sm:$0xff]  ;;  %v8378_v54 = vld [vmem:[%s8324_s30 + $0x28] sm:$0xff]  ;;  %v780_v56 = vmul.f32 %v8372_v50, %v8372_v50 }
  0x7a   : > { %6251 = vmatprep.subr.bf16.mxu0 %v7790_v20  ;;  %v778_v49 = vmul.f32 %v8357_v44, %v8357_v44  ;;  %v740_v51 = vadd.f32 %v739_v46, %v8357_v44  ;;  %v779_v52 = vmul.f32 %v8360_v45, %v8360_v45  ;;  %v808_v53 = vadd.f32 %v777_v48, %v776_v47  ;;  %v8384_v58 = vld [vmem:[%s8324_s30 + $0x30] sm:$0xff]  ;;  %v8393_v63 = vld [vmem:[%s8324_s30 + $0x38] sm:$0xff]  ;;  %v8399_v5 = vld [vmem:[%s8324_s30 + $0x40] sm:$0xff]  ;;  %p8052_p2 = pnand %p8051_p12, %p8045_p3 }
  0x7b   : > { %6388 = vmatpush3.bf16.msra.mxu1 %v7789_v19  ;;  %v781_v61 = vmul.f32 %v8378_v54, %v8378_v54  ;;  %v782_v2 = vmul.f32 %v8384_v58, %v8384_v58  ;;  %v8402_v7 = vld [vmem:[#allocation6 + $0x140] sm:$0xff]   ;;  %v783_v10 = vmul.f32 %v8393_v63, %v8393_v63  ;;  %v8411_v13 = vld [vmem:[%s8324_s30 + $0x48] sm:$0xff]  ;;  %v784_v16 = vmul.f32 %v8399_v5, %v8399_v5  ;;  %v8419_v20 = vld [vmem:[%s8324_s30 + $0x50] sm:$0xff] }
  0x7c   : > { %6389 = vmatprep.subr.bf16.mxu1 %v7792_v22  ;;  %v741_v55 = vadd.f32 %v740_v51, %v8360_v45  ;;  %v809_v57 = vadd.f32 %v808_v53, %v778_v49  ;;  %v785_v22 = vmul.f32 %v8411_v13, %v8411_v13  ;;  %v8450_v47 = vld [vmem:[%s8324_s30 + $0x78] sm:$0xff]  ;;  %v8457_v53 = vld [vmem:[%s8324_s30 + $0x80] sm:$0xff]  ;;  %v7817_v28 = vld [vmem:[#allocation6 + $0x90] sm:$0xff]  }
  0x7d   : > { %6252 = vmatpush3.bf16.msra.mxu0 %v7791_v21 }
  0x7e   : > { %6253 = vmatprep.subr.bf16.mxu0 %v7794_v24  ;;  %v742_v59 = vadd.f32 %v741_v55, %v8372_v50  ;;  %v810_v62 = vadd.f32 %v809_v57, %v779_v52  ;;  %v8425_v24 = vld [vmem:[%s8324_s30 + $0x58] sm:$0xff]  ;;  %v8462_v57 = vadd.s32 112, %v8335_v3 }
  0x7f   : > { %6390 = vmatpush3.bf16.msra.mxu1 %v7793_v23 }
  0x80   : > { %6391 = vmatprep.subr.bf16.mxu1 %v7796_v27  ;;  %v743_v1 = vadd.f32 %v742_v59, %v8378_v54  ;;  %v811_v4 = vadd.f32 %v810_v62, %v780_v56  ;;  %v8429_v27 = vld [vmem:[%s8324_s30 + $0x60] sm:$0xff]  ;;  %v791_v62 = vmul.f32 %v8450_v47, %v8450_v47 }
  0x81   : > { %6254 = vmatpush3.bf16.msra.mxu0 %v7795_v26 }
  0x82   : > { %6255 = vmatprep.subr.bf16.mxu0 %v7798_v30  ;;  %v744_v6 = vadd.f32 %v743_v1, %v8384_v58  ;;  %v812_v11 = vadd.f32 %v811_v4, %v781_v61  ;;  %v8466_v61 = vld [vmem:[%s8324_s30 + $0x88] sm:$0xff] }
  0x83   : > { %6392 = vmatpush3.bf16.msra.mxu1 %v7797_v29  ;;  %v786_v29 = vmul.f32 %v8419_v20, %v8419_v20 }
  0x84   : > { %6393 = vmatprep.subr.bf16.mxu1 %v7800_v32  ;;  %v745_v14 = vadd.f32 %v744_v6, %v8393_v63  ;;  %v813_v17 = vadd.f32 %v812_v11, %v782_v2  ;;  %v8473_v6 = vld [vmem:[%s8324_s30 + $0x90] sm:$0xff] }
  0x85   : > { %6256 = vmatpush3.bf16.msra.mxu0 %v7799_v31  ;;  %v8434_v31 = vadd.s32 96, %v8335_v3 }
  0x86   : > { %6257 = vmatprep.subr.bf16.mxu0 %v7802_v34  ;;  %v746_v21 = vadd.f32 %v745_v14, %v8399_v5  ;;  %v814_v23 = vadd.f32 %v813_v17, %v783_v10  ;;  %v787_v34 = vmul.f32 %v8425_v24, %v8425_v24  ;;  %v792_v10 = vmul.f32 %v8457_v53, %v8457_v53  ;;  %v8478_v14 = vld [vmem:[%s8324_s30 + $0x98] sm:$0xff] }
  0x87   : > { %6394 = vmatpush3.bf16.msra.mxu1 %v7801_v33  ;;  %v8438_v33 = vld [vmem:[%s8324_s30 + $0x68] sm:$0xff]  ;;  %v793_v17 = vmul.f32 %v8466_v61, %v8466_v61 }
  0x88   : > { %6395 = vmatprep.subr.bf16.mxu1 %v7804_v37  ;;  %v747_v26 = vadd.f32 %v746_v21, %v8411_v13  ;;  %v815_v30 = vadd.f32 %v814_v23, %v784_v16  ;;  %v789_v49 = vmul.f32 %v8438_v33, %v8438_v33  ;;  %v8485_v23 = vld [vmem:[%s8324_s30 + $0xa0] sm:$0xff] }
  0x89   : > { %6258 = vmatpush3.bf16.msra.mxu0 %v7803_v36 }
  0x8a   : > { %6259 = vmatprep.subr.bf16.mxu0 %v7806_v40  ;;  %v748_v32 = vadd.f32 %v747_v26, %v8419_v20  ;;  %v816_v36 = vadd.f32 %v815_v30, %v785_v22  ;;  %v8445_v40 = vld [vmem:[%s8324_s30 + $0x70] sm:$0xff]  ;;  %v794_v26 = vmul.f32 %v8473_v6, %v8473_v6  ;;  %v7813_v30 = vld [vmem:[#allocation6 + $0x80] sm:$0xff]  }
  0x8b   : > { %6396 = vmatpush3.bf16.msra.mxu1 %v7805_v39  ;;  %v790_v55 = vmul.f32 %v8445_v40, %v8445_v40 }
  0x8c   : > { %v749_v39 = vadd.f32 %v748_v32, %v8425_v24  ;;  %v817_v46 = vadd.f32 %v816_v36, %v786_v29  ;;  %v8490_v32 = vadd.s32 128, %v8335_v3  ;;  %v8494_v36 = vld [vmem:[%s8324_s30 + $0xa8] sm:$0xff]  ;;  %7109 = vmatprep.subr.bf16.mxu1 %v7813_v30 }
  0x8d   : > { %6260 = vmatpush3.bf16.msra.mxu0 %v7807_v41  ;;  %v788_v41 = vmul.f32 %v8429_v27, %v8429_v27 }
  0x8e   : > { %2074 = vmatmul.mubr.bf16.vlgmr.msra.gmra.mrb[0].mxu1 %v11498_v0  ;;  %7061 = vmatprep.subr.bf16.mxu0 %v8402_v7  ;;  %v750_v48 = vadd.f32 %v749_v39, %v8429_v27  ;;  %v818_v51 = vadd.f32 %v817_v46, %v787_v34  ;;  %v795_v39 = vmul.f32 %v8478_v14, %v8478_v14  ;;  %v8562_v46 = vld [vmem:[%s8324_s30 + $0xf8] sm:$0xff] }
  0x8f   : > { %7110 = vmatpush3.bf16.msra.mxu1 %v7813_v30 }
  0x90   : > { %v751_v52 = vadd.f32 %v750_v48, %v8438_v33  ;;  %v819_v56 = vadd.f32 %v818_v51, %v788_v41  ;;  %v796_v51 = vmul.f32 %v8485_v23, %v8485_v23 }
  0x92   : > { %v752_v59 = vadd.f32 %v751_v52, %v8445_v40  ;;  %v820_v1 = vadd.f32 %v819_v56, %v789_v49  ;;  %v8501_v49 = vld [vmem:[%s8324_s30 + $0xb0] sm:$0xff] }
  0x94   : > { %v753_v4 = vadd.f32 %v752_v59, %v8450_v47  ;;  %v821_v11 = vadd.f32 %v820_v1, %v790_v55  ;;  %v8506_v55 = vld [vmem:[%s8324_s30 + $0xb8] sm:$0xff]  ;;  %v797_v59 = vmul.f32 %v8494_v36, %v8494_v36 }
  0x96   : > { %v754_v16 = vadd.f32 %v753_v4, %v8457_v53  ;;  %v822_v21 = vadd.f32 %v821_v11, %v791_v62  ;;  %v8513_v4 = vld [vmem:[%s8324_s30 + $0xc0] sm:$0xff] }
  0x98   : > { %v755_v22 = vadd.f32 %v754_v16, %v8466_v61  ;;  %v823_v29 = vadd.f32 %v822_v21, %v792_v10  ;;  %v798_v10 = vmul.f32 %v8501_v49, %v8501_v49  ;;  %v8518_v16 = vadd.s32 144, %v8335_v3  ;;  %v8522_v21 = vld [vmem:[%s8324_s30 + $0xc8] sm:$0xff] }
  0x9a   : > { %v756_v34 = vadd.f32 %v755_v22, %v8473_v6  ;;  %v824_v41 = vadd.f32 %v823_v29, %v793_v17  ;;  %11724 = vst [vmem:[#allocation14_spill] sm:$0xff] %v8518_v16  ;;  %v799_v22 = vmul.f32 %v8506_v55, %v8506_v55  ;;  %v8557_v29 = vld [vmem:[%s8324_s30 + $0xf0] sm:$0xff] }
  0x9c   : > { %v757_v48 = vadd.f32 %v756_v34, %v8478_v14  ;;  %v825_v52 = vadd.f32 %v824_v41, %v794_v26  ;;  %v8529_v34 = vld [vmem:[%s8324_s30 + $0xd0] sm:$0xff] }
  0x9e   : > { %v758_v56 = vadd.f32 %v757_v48, %v8485_v23  ;;  %v826_v62 = vadd.f32 %v825_v52, %v795_v39  ;;  %v800_v39 = vmul.f32 %v8513_v4, %v8513_v4  ;;  %v8534_v48 = vld [vmem:[%s8324_s30 + $0xd8] sm:$0xff]  ;;  %v801_v52 = vmul.f32 %v8522_v21, %v8522_v21 }
  0xa0   : > { %v759_v1 = vadd.f32 %v758_v56, %v8494_v36  ;;  %v827_v11 = vadd.f32 %v826_v62, %v796_v51  ;;  %v8541_v62 = vld [vmem:[%s8324_s30 + $0xe0] sm:$0xff] }
  0xa2   : > { %v760_v17 = vadd.f32 %v759_v1, %v8501_v49  ;;  %v828_v26 = vadd.f32 %v827_v11, %v797_v59  ;;  %v802_v1 = vmul.f32 %v8529_v34, %v8529_v34 }
  0xa4   : > { %v761_v30 = vadd.f32 %v760_v17, %v8506_v55  ;;  %v829_v41 = vadd.f32 %v828_v26, %v798_v10  ;;  %v7815_v17 = vld [vmem:[#allocation6 + $0x88] sm:$0xff]   ;;  %v8546_v10 = vadd.s32 160, %v8335_v3 }
  0xa5   : > { %7111 = vmatprep.subr.bf16.mxu1 %v7815_v17 }
  0xa6   : > { %v762_v51 = vadd.f32 %v761_v30, %v8513_v4  ;;  %v830_v56 = vadd.f32 %v829_v41, %v799_v22  ;;  %11725 = vst [vmem:[#allocation15_spill] sm:$0xff] %v8546_v10  ;;  %v8550_v30 = vld [vmem:[%s8324_s30 + $0xe8] sm:$0xff]  ;;  %v803_v22 = vmul.f32 %v8534_v48, %v8534_v48  ;;  %7112 = vmatpush3.bf16.msra.mxu1 %v7815_v17 }
  0xa7   : > { %v805_v2 = vmul.f32 %v8550_v30, %v8550_v30  ;;  %7113 = vmatprep.subr.bf16.mxu1 %v7817_v28 }
  0xa8   : > { %v763_v59 = vadd.f32 %v762_v51, %v8522_v21  ;;  %v831_v11 = vadd.f32 %v830_v56, %v800_v39  ;;  %v804_v39 = vmul.f32 %v8541_v62, %v8541_v62  ;;  %v8571_v51 = vadd.s32 176, %v8335_v3 }
  0xaa   : > { %v764_v26 = vadd.f32 %v763_v59, %v8529_v34  ;;  %v832_v41 = vadd.f32 %v831_v11, %v801_v52  ;;  %11726 = vst [vmem:[#allocation16_spill] sm:$0xff] %v8571_v51  ;;  %7114 = vmatpush3.bf16.msra.mxu1 %v7817_v28 }
  0xac   : > { %v765_v0 = vadd.f32 %v764_v26, %v8534_v48  ;;  %v833_v56 = vadd.f32 %v832_v41, %v802_v1  ;;  %v806_v26 = vmul.f32 %v8557_v29, %v8557_v29  ;;  %v807_v1 = vmul.f32 %v8562_v46, %v8562_v46 }
  0xae   : > { %v766_v59 = vadd.f32 %v765_v0, %v8541_v62  ;;  %v834_v52 = vadd.f32 %v833_v56, %v803_v22 }
  0xb0   : > { %v767_v11 = vadd.f32 %v766_v59, %v8550_v30  ;;  %v835_v17 = vadd.f32 %v834_v52, %v804_v39  ;;  %v8579_v39 = vadd.s32 192, %v8335_v3 }
  0xb2   : > { %v768_v37 = vadd.f32 %v767_v11, %v8557_v29  ;;  %v836_v41 = vadd.f32 %v835_v17, %v805_v2  ;;  %11727 = vst [vmem:[#allocation17_spill] sm:$0xff] %v8579_v39  ;;  %v7819_v11 = vld [vmem:[#allocation6 + $0xa0] sm:$0xff]  }
  0xb4   : > { %v769_v19 = vadd.f32 %v768_v37, %v8562_v46  ;;  %v837_v22 = vadd.f32 %v836_v41, %v806_v26 }
  0xb6   : > { %v770_v56 = vrot.slane %v769_v19, 4  ;;  %v838_v59 = vadd.f32 %v837_v22, %v807_v1 }
  0xb8   : > { %v771_v9 = vadd.f32 %v770_v56, %v769_v19  ;;  %v839_v38 = vrot.slane %v838_v59, 4  ;;  %v8587_v56 = vadd.s32 208, %v8335_v3 }
  0xba   : > { %v772_v52 = vrot.slane %v771_v9, 2  ;;  %v840_v18 = vadd.f32 %v839_v38, %v838_v59  ;;  %11728 = vst [vmem:[#allocation18_spill] sm:$0xff] %v8587_v56  ;;  %v7818_v59 = vld [vmem:[#allocation6 + $0x98] sm:$0xff]  }
  0xbb   : > { %7115 = vmatprep.subr.bf16.mxu1 %v7818_v59 }
  0xbc   : > { %v773_v8 = vadd.f32 %v772_v52, %v771_v9  ;;  %v841_v2 = vrot.slane %v840_v18, 2  ;;  %7116 = vmatpush3.bf16.msra.mxu1 %v7818_v59 }
  0xbd   : > { %7117 = vmatprep.subr.bf16.mxu1 %v7819_v11 }
  0xbe   : > { %v774_v17 = vrot.slane %v773_v8, 1  ;;  %v842_v0 = vadd.f32 %v841_v2, %v840_v18 }
  0xc0   : > { %v775_v37 = vadd.f32 %v774_v17, %v773_v8  ;;  %v843_v26 = vrot.slane %v842_v0, 1  ;;  %v8591_v8 = vadd.s32 224, %v8335_v3  ;;  %7118 = vmatpush3.bf16.msra.mxu1 %v7819_v11  ;;  %v7822_v11 = vld [vmem:[#allocation6 + $0xb0] sm:$0xff]  }
  0xc2   : > { %v8582_v41 = vmul.f32 0.00390625, %v775_v37  ;;  %v844_v19 = vadd.f32 %v843_v26, %v842_v0  ;;  %11729 = vst [vmem:[#allocation19_spill] sm:$0xff] %v8591_v8  ;;  %v7821_v37 = vld [vmem:[#allocation6 + $0xa8] sm:$0xff]  }
  0xc3   : > { %7119 = vmatprep.subr.bf16.mxu1 %v7821_v37 }
  0xc4   : > { %v847_v1 = vmul.f32 %v8582_v41, %v8582_v41  ;;  %v846_v22 = vmul.f32 0.00390625, %v844_v19  ;;  %v849_v18 = vsub.f32 %v8351_v42, %v8582_v41  ;;  %v850_v0 = vsub.f32 %v8354_v43, %v8582_v41  ;;  %7120 = vmatpush3.bf16.msra.mxu1 %v7821_v37 }
  0xc5   : > { %v880_v52 = vsub.f32 %v8562_v46, %v8582_v41  ;;  %v851_v2 = vsub.f32 %v8357_v44, %v8582_v41  ;;  %v852_v26 = vsub.f32 %v8360_v45, %v8582_v41  ;;  %v853_v19 = vsub.f32 %v8372_v50, %v8582_v41  ;;  %7121 = vmatprep.subr.bf16.mxu1 %v7822_v11 }
  0xc6   : > { %v848_v38 = vsub.f32 %v846_v22, %v847_v1  ;;  %v854_v42 = vsub.f32 %v8378_v54, %v8582_v41  ;;  %v855_v43 = vsub.f32 %v8384_v58, %v8582_v41  ;;  %v856_v44 = vsub.f32 %v8393_v63, %v8582_v41  ;;  %v7823_v58 = vld [vmem:[#allocation6 + $0xb8] sm:$0xff]  }
  0xc7   : > { %v8617_v50 = vadd.s32 240, %v8335_v3  ;;  %v11731_v54 = vand.u32 15, %v8335_v3  ;;  %v11747_v39 = vsub.f32 %v8429_v27, %v8582_v41 }
  0xc8   : > { %v881_v9 = vadd.f32 1e-05, %v848_v38  ;;  %7122 = vmatpush3.bf16.msra.mxu1 %v7822_v11 }
  0xc9   : > { %11730 = vst [vmem:[#allocation20_spill] sm:$0xff] %v8617_v50  ;;  %vm8621_vm2 = vcmp.ne.s32.totalorder %v11731_v54, 0  ;;  %7123 = vmatprep.subr.bf16.mxu1 %v7823_v58 }
  0xca   : > { %7920 = vrsqrt.f32 %v881_v9  ;;  %vm8700_vm5 = vmpackc.low %vm11551_vm4, %vm8621_vm2 }
  0xcc   : > { %7124 = vmatpush3.bf16.msra.mxu1 %v7823_v58  ;;  %v11739_v58 = vmov 0 }
  0xcd   : > { %v11740_v58 = vsel %vm8700_vm5, 4294967295, %v11739_v58 }
  0xce   : > { %11741 = vst [vmem:[#allocation23_spill] sm:$0xff] %v11740_v58 }
  0xd4   : > { %v8648_v22 = vpop.eup %7920 }
  0xd5   : > { %v883_v9 = vmul.f32 %v8648_v22, %v849_v18  ;;  %v884_v28 = vmul.f32 %v8648_v22, %v850_v0  ;;  %v914_v37 = vmul.f32 %v8648_v22, %v880_v52  ;;  %v885_v63 = vmul.f32 %v8648_v22, %v851_v2 }
  0xd6   : > { %v886_v38 = vmul.f32 %v8648_v22, %v852_v26  ;;  %v887_v1 = vmul.f32 %v8648_v22, %v853_v19  ;;  %v888_v59 = vmul.f32 %v8648_v22, %v854_v42  ;;  %v889_v54 = vmul.f32 %v8648_v22, %v855_v43 }
  0xd7   : > { %v8664_v45 = vmax.f32 %v883_v9, 0.0  ;;  %v916_v17 = vmax.f32 %v884_v28, 0.0  ;;  %v8666_v18 = vmax.f32 %v914_v37, 0.0  ;;  %v917_v0 = vmax.f32 %v885_v63, 0.0 }
  0xd8   : > { %v918_v50 = vmax.f32 %v886_v38, 0.0  ;;  %v8668_v52 = vmax.f32 %v887_v1, 0.0  ;;  %v8670_v2 = vmax.f32 %v888_v59, 0.0  ;;  %v890_v26 = vmul.f32 %v8648_v22, %v856_v44 }
  0xd9   : > { %11734 = vst [vmem:[#allocation21_spill] sm:$0xff] %v8664_v45  ;;  %v947_v19 = vrot.slane %v8664_v45, 7  ;;  %v948_v42 = vrot.slane %v916_v17, 7  ;;  %v11501_v43 = vrot.slane %v8664_v45, 1  ;;  %v1045_v11 = vrot.slane %v916_v17, 1 }
  0xda   : > { %v11735_v9 = vand.u32 15, %v8339_v15  ;;  %v1174_v1 = vpack.c.bf16 %v916_v17, %v8664_v45  ;;  %v11504_v63 = vrot.slane %v8666_v18, 7  ;;  %v1046_v38 = vrot.slane %v917_v0, 1 }
  0xdb   : > { %v1047_v44 = vrot.slane %v918_v50, 1  ;;  %v8687_v59 = vsel %vm11542_vm0, %v11501_v43, %v1045_v11  ;;  %v1010_v15 = vsel %vm11541_vm1, %v947_v19, %v948_v42  ;;  %v8691_v37 = vpack.c.bf16 %v918_v50, %v917_v0 }
  0xdc   : > { %vm8677_vm3 = vcmp.ne.s32.totalorder %v11735_v9, 0  ;;  %v949_v9 = vrot.slane %v917_v0, 7  ;;  %1607 = vmatprep.mubr.bf16.mxu0 %v1174_v1  ;;  %v1011_v17 = vsel %vm11541_vm1, %v11504_v63, %v947_v19  ;;  %2081 = vmatprep.mubr.bf16.mxu1 %v1174_v1  ;;  %v8710_v0 = vsel %vm11542_vm0, %v1045_v11, %v1046_v38  ;;  %v7809_v63 = vld [vmem:[#allocation6 + $0x148] sm:$0xff]  }
  0xdd   : > { %11738 = vst [vmem:[#allocation22_spill] sm:$0xff] %v8691_v37  ;;  %v8706_v43 = vsel %vm11542_vm0, %v1046_v38, %v1047_v44  ;;  %v950_v8 = vrot.slane %v918_v50, 7  ;;  %v5511_v56 = vpack.c.bf16 %v1010_v15, %v1011_v17  ;;  %v11508_v46 = vrot.slane %v8668_v52, 1  ;;  %vm8786_vm6 = vmpackc.low %vm11551_vm4, %vm8677_vm3 }
  0xde   : > { %v1009_v19 = vsel %vm11541_vm1, %v948_v42, %v949_v9  ;;  %v951_v51 = vrot.slane %v8668_v52, 7  ;;  %v952_v10 = vrot.slane %v8670_v2, 7  ;;  %v8721_v11 = vmax.f32 %v889_v54, 0.0 }
  0xdf   : > { %v1008_v1 = vsel %vm11541_vm1, %v949_v9, %v950_v8  ;;  %5512 = vmatmul.mubr.msk.bf16.vlgmr.msra.gmra.mrb[0].mxu0 %vm8700_vm5, %v5511_v56  ;;  %5640 = vmatmul.mubr.msk.bf16.gmra.mrb[4].mxu1 %vm8700_vm5, %v5511_v56  ;;  %v8731_v50 = vsel %vm11542_vm0, %v1047_v44, %v11508_v46  ;;  %v8733_v42 = vmax.f32 %v890_v26, 0.0  ;;  %v11742_v38 = vsub.f32 %v8399_v5, %v8582_v41  ;;  %v7810_v9 = vld [vmem:[#allocation6 + $0x150] sm:$0xff]  }
  0xe0   : > { %7062 = vmatpush3.bf16.msra.mxu0 %v8402_v7  ;;  %1615 = vmatprep.mubr.bf16.mxu0 %v8691_v37  ;;  %v953_v56 = vrot.slane %v8721_v11, 7  ;;  %v11743_v44 = vsub.f32 %v8411_v13, %v8582_v41  ;;  %v11745_v17 = vsub.f32 %v8419_v20, %v8582_v41  ;;  %v11748_v20 = vsub.f32 %v8438_v33, %v8582_v41  ;;  %v7811_v33 = vld [vmem:[#allocation6 + $0x158] sm:$0xff]  }
  0xe1   : > { %v891_v54 = vmul.f32 %v8648_v22, %v11742_v38  ;;  %v8752_v38 = vpack.c.bf16 %v1008_v1, %v1009_v19  ;;  %2089 = vmatprep.mubr.bf16.mxu1 %v8691_v37  ;;  %7063 = vmatprep.subr.bf16.mxu0 %v7809_v63  ;;  %v954_v7 = vrot.slane %v8733_v42, 7  ;;  %v11746_v1 = vsub.f32 %v8425_v24, %v8582_v41 }
  0xe2   : > { %v892_v26 = vmul.f32 %v8648_v22, %v11743_v44  ;;  %v1006_v44 = vsel %vm11541_vm1, %v951_v51, %v952_v10  ;;  %v893_v19 = vmul.f32 %v8648_v22, %v11745_v17  ;;  %v896_v17 = vmul.f32 %v8648_v22, %v11748_v20 }
  0xe3   : > { %11744 = vst [vmem:[#allocation24_spill] sm:$0xff] %v8752_v38  ;;  %v8756_v46 = vmax.f32 %v891_v54, 0.0  ;;  %v894_v5 = vmul.f32 %v8648_v22, %v11746_v1  ;;  %v1007_v54 = vsel %vm11541_vm1, %v950_v8, %v951_v51  ;;  %v11749_v24 = vmov 0 }
  0xe4   : > { %v8762_v15 = vmax.f32 %v892_v26, 0.0  ;;  %v895_v26 = vmul.f32 %v8648_v22, %v11747_v39  ;;  %v11750_v24 = vsel %vm8786_vm6, 4294967295, %v11749_v24  ;;  %v8792_v51 = vpack.c.bf16 %v8670_v2, %v8668_v52  ;;  %7064 = vmatpush3.bf16.msra.mxu0 %v7809_v63 }
  0xe5   : > { %v955_v13 = vrot.slane %v8756_v46, 7  ;;  %11751 = vst [vmem:[#allocation25_spill] sm:$0xff] %v11750_v24  ;;  %v8795_v39 = vmax.f32 %v893_v19, 0.0  ;;  %v1004_v8 = vsel %vm11541_vm1, %v953_v56, %v954_v7  ;;  %v1005_v28 = vsel %vm11541_vm1, %v952_v10, %v953_v56  ;;  %7065 = vmatprep.subr.bf16.mxu0 %v7810_v9 }
  0xe6   : > { %11752 = vst [vmem:[#allocation26_spill] sm:$0xff] %v8792_v51  ;;  %v956_v27 = vrot.slane %v8762_v15, 7  ;;  %v8807_v20 = vpack.c.bf16 %v1006_v44, %v1007_v54  ;;  %v8811_v58 = vmax.f32 %v894_v5, 0.0  ;;  %v11754_v37 = vsub.f32 %v8450_v47, %v8582_v41 }
  0xe7   : > { %v1003_v19 = vsel %vm11541_vm1, %v954_v7, %v955_v13  ;;  %5516 = vmatmul.mubr.msk.bf16.gmra.mrb[4].mxu0 %vm8786_vm6, %v8752_v38  ;;  %5644 = vmatmul.mubr.msk.bf16.gmra.mrb[8].mxu1 %vm8786_vm6, %v8752_v38  ;;  %v957_v5 = vrot.slane %v8795_v39, 7  ;;  %v8826_v7 = vmax.f32 %v895_v26, 0.0  ;;  %v8828_v44 = vmax.f32 %v896_v17, 0.0 }
  0xe8   : > { %11753 = vst [vmem:[#allocation27_spill] sm:$0xff] %v8807_v20  ;;  %v898_v10 = vmul.f32 %v8648_v22, %v11754_v37  ;;  %v1002_v56 = vsel %vm11541_vm1, %v955_v13, %v956_v27  ;;  %1623 = vmatprep.mubr.bf16.mxu0 %v8792_v51  ;;  %v11755_v47 = vand.u32 15, %v8343_v25  ;;  %2097 = vmatprep.mubr.bf16.mxu1 %v8792_v51  ;;  %v11761_v63 = vand.u32 15, %v8347_v35 }
  0xe9   : > { %v8840_v54 = vpack.c.bf16 %v8733_v42, %v8721_v11  ;;  %v8842_v13 = vpack.c.bf16 %v1004_v8, %v1005_v28  ;;  %v11760_v26 = vsub.f32 %v8445_v40, %v8582_v41  ;;  %7066 = vmatpush3.bf16.msra.mxu0 %v7810_v9  ;;  %v11765_v8 = vsub.f32 %v8457_v53, %v8582_v41  ;;  %v7812_v53 = vld [vmem:[#allocation6 + $0x160] sm:$0xff]  }
  0xea   : > { %vm8833_vm7 = vcmp.ne.s32.totalorder %v11755_v47, 0  ;;  %vm8850_vm8 = vcmp.ne.s32.totalorder %v11761_v63, 0  ;;  %v8856_v47 = vpack.c.bf16 %v8762_v15, %v8756_v46  ;;  %v8858_v1 = vmax.f32 %v898_v10, 0.0  ;;  %7067 = vmatprep.subr.bf16.mxu0 %v7811_v33 }
  0xeb   : > { %11758 = vst [vmem:[#allocation28_spill] sm:$0xff] %v8840_v54  ;;  %11759 = vst [vmem:[#allocation29_spill] sm:$0xff] %v8842_v13  ;;  %v897_v17 = vmul.f32 %v8648_v22, %v11760_v26  ;;  %v899_v40 = vmul.f32 %v8648_v22, %v11765_v8  ;;  %v11766_v28 = vsub.f32 %v8466_v61, %v8582_v41  ;;  %v11776_v38 = vrot.slane %v8811_v58, 7 }
  0xec   : > { %11764 = vst [vmem:[#allocation30_spill] sm:$0xff] %v8856_v47  ;;  %v8868_v63 = vpack.c.bf16 %v1002_v56, %v1003_v19  ;;  %v8872_v26 = vpack.c.bf16 %v8811_v58, %v8795_v39  ;;  %v8877_v10 = vpack.c.bf16 %v8828_v44, %v8826_v7  ;;  %v8881_v8 = vsel %vm11541_vm1, %v956_v27, %v957_v5  ;;  %vm8890_vm9 = vmpackc.low %vm11551_vm4, %vm8833_vm7 }
  0xed   : > { %v900_v35 = vmul.f32 %v8648_v22, %v11766_v28  ;;  %v8885_v56 = vmax.f32 %v899_v40, 0.0  ;;  %v11769_v28 = vmov 0  ;;  %v8894_v9 = vmax.f32 %v897_v17, 0.0  ;;  %7068 = vmatpush3.bf16.msra.mxu0 %v7811_v33  ;;  %vm8996_vm11 = vmpackc.low %vm11551_vm4, %vm8850_vm8 }
  0xee   : > { %11767 = vst [vmem:[#allocation31_spill] sm:$0xff] %v8872_v26  ;;  %11768 = vst [vmem:[#allocation32_spill] sm:$0xff] %v8877_v10  ;;  %v11770_v28 = vsel %vm8890_vm9, 4294967295, %v11769_v28  ;;  %v11772_v27 = vsub.f32 %v8473_v6, %v8582_v41  ;;  %v11773_v40 = vsub.f32 %v8478_v14, %v8582_v41  ;;  %v11519_v37 = vrot.slane %v8858_v1, 7  ;;  %7069 = vmatprep.subr.bf16.mxu0 %v7812_v53 }
  0xef   : > { %11771 = vst [vmem:[#allocation33_spill] sm:$0xff] %v11770_v28  ;;  %v8896_v51 = vmax.f32 %v900_v35, 0.0  ;;  %v963_v24 = vrot.slane %v8885_v56, 7  ;;  %v11774_v17 = vsub.f32 %v8485_v23, %v8582_v41  ;;  %v11775_v6 = vsub.f32 %v8494_v36, %v8582_v41  ;;  %5520 = vmatmul.mubr.msk.bf16.gmra.mrb[8].mxu0 %vm8890_vm9, %v8807_v20  ;;  %5648 = vmatmul.mubr.msk.bf16.gmra.mrb[12].mxu1 %vm8890_vm9, %v8807_v20 }
  0xf0   : > { %v901_v61 = vmul.f32 %v8648_v22, %v11772_v27  ;;  %v902_v19 = vmul.f32 %v8648_v22, %v11773_v40  ;;  %v8920_v14 = vsel %vm11541_vm1, %v957_v5, %v11776_v38  ;;  %1631 = vmatprep.mubr.bf16.mxu0 %v8840_v54  ;;  %2105 = vmatprep.mubr.bf16.mxu1 %v8840_v54  ;;  %v1057_v16 = vrot.slane %v8828_v44, 1 }
  0xf1   : > { %v903_v35 = vmul.f32 %v8648_v22, %v11774_v17  ;;  %v904_v27 = vmul.f32 %v8648_v22, %v11775_v6  ;;  %v8924_v33 = vpack.c.bf16 %v8896_v51, %v8885_v56  ;;  %v964_v23 = vrot.slane %v8896_v51, 7  ;;  %v7814_v17 = vld [vmem:[#allocation6 + $0x168] sm:$0xff]   ;;  %7070 = vmatpush3.bf16.msra.mxu0 %v7812_v53  ;;  %v7816_v53 = vld [vmem:[#allocation6 + $0x170] sm:$0xff]  }
  0xf2   : > { %v8927_v40 = vmax.f32 %v901_v61, 0.0  ;;  %v995_v36 = vsel %vm11541_vm1, %v11519_v37, %v963_v24  ;;  %v8939_v38 = vmax.f32 %v902_v19, 0.0  ;;  %v11778_v20 = vsub.f32 %v8501_v49, %v8582_v41  ;;  %7071 = vmatprep.subr.bf16.mxu0 %v7814_v17 }
  0xf3   : > { %11777 = vst [vmem:[#allocation34_spill] sm:$0xff] %v8924_v33  ;;  %v8941_v5 = vmax.f32 %v903_v35, 0.0  ;;  %v8943_v61 = vmax.f32 %v904_v27, 0.0  ;;  %v994_v6 = vsel %vm11541_vm1, %v963_v24, %v964_v23  ;;  %v11779_v19 = vsub.f32 %v8506_v55, %v8582_v41 }
  0xf4   : > { %v965_v28 = vrot.slane %v8927_v40, 7  ;;  %v905_v37 = vmul.f32 %v8648_v22, %v11778_v20  ;;  %v11780_v27 = vand.u32 15, %v8388_v60  ;;  %v8964_v54 = vpack.c.bf16 %v994_v6, %v995_v36 }
  0xf5   : > { %v906_v35 = vmul.f32 %v8648_v22, %v11779_v19  ;;  %v8968_v24 = vpack.c.bf16 %v8939_v38, %v8927_v40  ;;  %v966_v49 = vrot.slane %v8939_v38, 7  ;;  %v8973_v55 = vpack.c.bf16 %v8943_v61, %v8941_v5  ;;  %7072 = vmatpush3.bf16.msra.mxu0 %v7814_v17 }
  0xf6   : > { %vm8960_vm10 = vcmp.ne.s32.totalorder %v11780_v27, 0  ;;  %11783 = vst [vmem:[#allocation35_spill] sm:$0xff] %v8964_v54  ;;  %v993_v60 = vsel %vm11541_vm1, %v964_v23, %v965_v28  ;;  %v967_v20 = vrot.slane %v8941_v5, 7  ;;  %v968_v36 = vrot.slane %v8943_v61, 7  ;;  %7073 = vmatprep.subr.bf16.mxu0 %v7816_v53 }
  0xf7   : > { %11784 = vst [vmem:[#allocation36_spill] sm:$0xff] %v8968_v24  ;;  %11785 = vst [vmem:[#allocation37_spill] sm:$0xff] %v8973_v55  ;;  %v8979_v6 = vmax.f32 %v905_v37, 0.0  ;;  %v992_v19 = vsel %vm11541_vm1, %v965_v28, %v966_v49  ;;  %v8983_v27 = vmax.f32 %v906_v35, 0.0  ;;  %v11786_v45 = vsub.f32 %v8513_v4, %v8582_v41  ;;  %5524 = vmatmul.mubr.msk.bf16.gmra.mrb[12].mxu0 %vm8996_vm11, %v8842_v13 }
  0xf8   : > { %v11787_v23 = vsub.f32 %v8522_v21, %v8582_v41  ;;  %v11788_v37 = vmov 0  ;;  %v9000_v28 = vpack.c.bf16 %v992_v19, %v993_v60  ;;  %v990_v35 = vsel %vm11541_vm1, %v967_v20, %v968_v36  ;;  %5652 = vmatmul.mubr.msk.bf16.gmra.mrb[16].mxu1 %vm8996_vm11, %v8842_v13  ;;  %1639 = vmatprep.mubr.bf16.mxu0 %v8856_v47  ;;  %vm9097_vm13 = vmpackc.low %vm11551_vm4, %vm8960_vm10 }
  0xf9   : > { %v907_v55 = vmul.f32 %v8648_v22, %v11786_v45  ;;  %v11789_v37 = vsel %vm8996_vm11, 4294967295, %v11788_v37  ;;  %v991_v4 = vsel %vm11541_vm1, %v966_v49, %v967_v20  ;;  %v969_v45 = vrot.slane %v8979_v6, 7  ;;  %2113 = vmatprep.mubr.bf16.mxu1 %v8856_v47  ;;  %7074 = vmatpush3.bf16.msra.mxu0 %v7816_v53 }
  0xfa   : > { %v908_v24 = vmul.f32 %v8648_v22, %v11787_v23  ;;  %11790 = vst [vmem:[#allocation38_spill] sm:$0xff] %v11789_v37  ;;  %v9007_v21 = vpack.c.bf16 %v990_v35, %v991_v4  ;;  %v9011_v25 = vpack.c.bf16 %v8983_v27, %v8979_v6  ;;  %v970_v23 = vrot.slane %v8983_v27, 7  ;;  %v7820_v4 = vld [vmem:[#allocation6 + $0x178] sm:$0xff]  }
  0xfb   : > { %v9014_v54 = vmax.f32 %v907_v55, 0.0  ;;  %v989_v60 = vsel %vm11541_vm1, %v968_v36, %v969_v45  ;;  %v11791_v49 = vsub.f32 %v8529_v34, %v8582_v41  ;;  %v11792_v17 = vsub.f32 %v8534_v48, %v8582_v41  ;;  %7075 = vmatprep.subr.bf16.mxu0 %v7820_v4 }
  0xfc   : > { %v9018_v19 = vmax.f32 %v908_v24, 0.0  ;;  %v988_v24 = vsel %vm11541_vm1, %v969_v45, %v970_v23  ;;  %v11793_v55 = vsub.f32 %v8541_v62, %v8582_v41  ;;  %v11794_v36 = vsub.f32 %v8550_v30, %v8582_v41 }
  0xfd   : > { %v909_v20 = vmul.f32 %v8648_v22, %v11791_v49  ;;  %v910_v35 = vmul.f32 %v8648_v22, %v11792_v17  ;;  %v971_v34 = vrot.slane %v9014_v54, 7  ;;  %v9045_v17 = vld [vmem:[#allocation6 + $0x200] sm:$0xff]   ;;  %v9049_v37 = vpack.c.bf16 %v988_v24, %v989_v60  ;;  %7076 = vmatpush3.bf16.msra.mxu0 %v7820_v4 }
  0xfe   : > { %v911_v48 = vmul.f32 %v8648_v22, %v11793_v55  ;;  %v912_v49 = vmul.f32 %v8648_v22, %v11794_v36  ;;  %11795 = vst [vmem:[#allocation39_spill] sm:$0xff] %v9045_v17  ;;  %v9053_v45 = vpack.c.bf16 %v9018_v19, %v9014_v54  ;;  %v972_v62 = vrot.slane %v9018_v19, 7  ;;  %7157 = vmatprep.subr.bf16.mxu1 %v9045_v17 }
  0xff   : > { %v9056_v55 = vmax.f32 %v909_v20, 0.0  ;;  %v11797_v30 = vand.u32 15, %v8408_v12  ;;  %v987_v13 = vsel %vm11541_vm1, %v970_v23, %v971_v34  ;;  %v9066_v60 = vmax.f32 %v910_v35, 0.0  ;;  %v7824_v35 = vld [vmem:[#allocation6 + $0x1c0] sm:$0xff]   ;;  %5528 = vmatmul.mubr.msk.bf16.gmra.mrb[16].mxu0 %vm9097_vm13, %v8868_v63 }
 0x100   : > { %11796 = vst [vmem:[#allocation40_spill] sm:$0xff] %v9053_v45  ;;  %v9068_v24 = vmax.f32 %v911_v48, 0.0  ;;  %v9070_v47 = vmax.f32 %v912_v49, 0.0  ;;  %v986_v20 = vsel %vm11541_vm1, %v971_v34, %v972_v62  ;;  %v9081_v53 = vadd.s32 8, %v8335_v3  ;;  %6517 = vmatprep.subr.bf16.mxu0 %v7824_v35  ;;  %5656 = vmatmul.mubr.msk.bf16.gmra.mrb[20].mxu1 %vm9097_vm13, %v8868_v63 }
 0x101   : > { %vm9060_vm12 = vcmp.ne.s32.totalorder %v11797_v30, 0  ;;  %v973_v12 = vrot.slane %v9056_v55, 7  ;;  %v11800_v30 = vsub.f32 %v8557_v29, %v8582_v41  ;;  %v9083_v48 = vpack.c.bf16 %v986_v20, %v987_v13  ;;  %1647 = vmatprep.mubr.bf16.mxu0 %v8872_v26  ;;  %2121 = vmatprep.mubr.bf16.mxu1 %v8872_v26 }
 0x102   : > { %v9087_v49 = vpack.c.bf16 %v9066_v60, %v9056_v55  ;;  %v974_v34 = vrot.slane %v9066_v60, 7  ;;  %v9092_v17 = vpack.c.bf16 %v9070_v47, %v9068_v24  ;;  %v11804_v29 = vmov 0  ;;  %vm9189_vm15 = vmpackc.low %vm11551_vm4, %vm9060_vm12 }
 0x103   : > { %v913_v23 = vmul.f32 %v8648_v22, %v11800_v30  ;;  %11801 = vst [vmem:[#allocation41_spill] sm:$0xff] %v9083_v48  ;;  %v11805_v29 = vsel %vm9097_vm13, 4294967295, %v11804_v29  ;;  %v985_v41 = vsel %vm11541_vm1, %v972_v62, %v973_v12  ;;  %v975_v22 = vrot.slane %v9068_v24, 7 }
 0x104   : > { %11802 = vst [vmem:[#allocation42_spill] sm:$0xff] %v9087_v49  ;;  %11803 = vst [vmem:[#allocation43_spill] sm:$0xff] %v9092_v17  ;;  %v976_v13 = vrot.slane %v9070_v47, 7  ;;  %v984_v30 = vsel %vm11541_vm1, %v973_v12, %v974_v34  ;;  %v9112_v17 = vpack.c.bf16 %v8710_v0, %v8687_v59  ;;  %v9115_v49 = vadd.s32 24, %v8335_v3 }
 0x105   : > { %11806 = vst [vmem:[#allocation44_spill] sm:$0xff] %v11805_v29  ;;  %v9105_v20 = vmax.f32 %v913_v23, 0.0  ;;  %v9119_v62 = vpack.c.bf16 %v8920_v14, %v8881_v8  ;;  %v9121_v48 = vpack.c.bf16 %v984_v30, %v985_v41  ;;  %v983_v4 = vsel %vm11541_vm1, %v974_v34, %v975_v22 }
 0x106   : > { %v982_v23 = vsel %vm11541_vm1, %v975_v22, %v976_v13  ;;  %v11808_v59 = vrot.slane %v8828_v44, 7  ;;  %v11809_v0 = vrot.slane %v8826_v7, 7  ;;  %v9147_v34 = vpack.c.bf16 %v8731_v50, %v8706_v43 }
 0x107   : > { %11807 = vst [vmem:[#allocation45_spill] sm:$0xff] %v9121_v48  ;;  %v9139_v14 = vpack.c.bf16 %v982_v23, %v983_v4  ;;  %v977_v12 = vrot.slane %v9105_v20, 7  ;;  %v9150_v41 = vadd.s32 40, %v8335_v3  ;;  %v1049_v22 = vrot.slane %v8670_v2, 1  ;;  %5532 = vmatmul.mubr.msk.bf16.gmra.mrb[20].mxu0 %vm9189_vm15, %v9119_v62 }
 0x108   : > { %v998_v8 = vsel %vm11541_vm1, %v11809_v0, %v11808_v59  ;;  %v11811_v30 = vand.u32 15, %v8434_v31  ;;  %v11814_v4 = vrot.slane %v8666_v18, 7  ;;  %v1050_v50 = vrot.slane %v8721_v11, 1  ;;  %5660 = vmatmul.mubr.msk.bf16.gmra.mrb[24].mxu1 %vm9189_vm15, %v9119_v62  ;;  %1655 = vmatprep.mubr.bf16.mxu0 %v8877_v10 }
 0x109   : > { %11810 = vst [vmem:[#allocation46_spill] sm:$0xff] %v9139_v14  ;;  %v981_v43 = vsel %vm11541_vm1, %v976_v13, %v977_v12  ;;  %v9167_v0 = vadd.s32 56, %v8335_v3  ;;  %v11815_v2 = vrot.slane %v8826_v7, 7  ;;  %v11816_v31 = vrot.slane %v8811_v58, 7  ;;  %2129 = vmatprep.mubr.bf16.mxu1 %v8877_v10 }
 0x10a   : > { %vm9155_vm14 = vcmp.ne.s32.totalorder %v11811_v30, 0  ;;  %v980_v59 = vsel %vm11541_vm1, %v977_v12, %v11814_v4  ;;  %v1102_v4 = vsel %vm11542_vm0, %v1049_v22, %v1050_v50  ;;  %v11818_v13 = vrot.slane %v8668_v52, 1 }
 0x10b   : > { %v999_v30 = vsel %vm11541_vm1, %v11816_v31, %v11815_v2  ;;  %v9175_v35 = vpack.c.bf16 %v980_v59, %v981_v43  ;;  %v1051_v26 = vrot.slane %v8733_v42, 1  ;;  %v11819_v59 = vmov 0  ;;  %vm9257_vm2 = vmpackc.low %vm11551_vm4, %vm9155_vm14 }
 0x10c   : > { %v1103_v11 = vsel %vm11542_vm0, %v11818_v13, %v1049_v22  ;;  %v11820_v59 = vsel %vm9189_vm15, 4294967295, %v11819_v59  ;;  %v961_v43 = vrot.slane %v8894_v9, 7  ;;  %v1052_v52 = vrot.slane %v8756_v46, 1 }
 0x10d   : > { %11817 = vst [vmem:[#allocation47_spill] sm:$0xff] %v9175_v35  ;;  %11821 = vst [vmem:[#allocation48_spill] sm:$0xff] %v11820_v59  ;;  %v9194_v2 = vpack.c.bf16 %v1102_v4, %v1103_v11  ;;  %v9197_v31 = vpack.c.bf16 %v998_v8, %v999_v30  ;;  %v1101_v22 = vsel %vm11542_vm0, %v1050_v50, %v1051_v26  ;;  %v9202_v42 = vadd.s32 72, %v8335_v3 }
 0x10e   : > { %v1100_v36 = vsel %vm11542_vm0, %v1051_v26, %v1052_v52  ;;  %v1053_v13 = vrot.slane %v8762_v15, 1  ;;  %v1054_v12 = vrot.slane %v8795_v39, 1  ;;  %v9209_v4 = vadd.s32 88, %v8335_v3 }
 0x10f   : > { %v9217_v46 = vpack.c.bf16 %v1100_v36, %v1101_v22  ;;  %v1055_v26 = vrot.slane %v8811_v58, 1  ;;  %v1056_v15 = vrot.slane %v8826_v7, 1  ;;  %v9230_v11 = vadd.s32 104, %v8335_v3  ;;  %5536 = vmatmul.mubr.msk.bf16.gmra.mrb[24].mxu0 %vm9257_vm2, %v9197_v31 }
 0x110   : > { %v1098_v39 = vsel %vm11542_vm0, %v1053_v13, %v1054_v12  ;;  %v1099_v50 = vsel %vm11542_vm0, %v1052_v52, %v1053_v13  ;;  %v9234_v58 = vpack.c.bf16 %v8858_v1, %v8894_v9  ;;  %v11822_v36 = vrot.slane %v8828_v44, 7  ;;  %5664 = vmatmul.mubr.msk.bf16.gmra.mrb[28].mxu1 %vm9257_vm2, %v9197_v31 }
 0x111   : > { %v9236_v7 = vpack.c.bf16 %v1098_v39, %v1099_v50  ;;  %v1096_v22 = vsel %vm11542_vm0, %v1055_v26, %v1056_v15  ;;  %v1097_v52 = vsel %vm11542_vm0, %v1054_v12, %v1055_v26  ;;  %v1058_v39 = vrot.slane %v8894_v9, 1 }
 0x112   : > { %v997_v8 = vsel %vm11541_vm1, %v11822_v36, %v961_v43  ;;  %v9247_v30 = vpack.c.bf16 %v1096_v22, %v1097_v52  ;;  %v9252_v50 = vadd.s32 120, %v8335_v3  ;;  %v11823_v10 = vmov 0  ;;  %1663 = vmatprep.mubr.bf16.mxu0 %v9234_v58  ;;  %2137 = vmatprep.mubr.bf16.mxu1 %v9234_v58 }
 0x113   : > { %v11824_v10 = vsel %vm9257_vm2, 4294967295, %v11823_v10  ;;  %v11826_v12 = vrot.slane %v8858_v1, 7  ;;  %v1059_v22 = vrot.slane %v8858_v1, 1  ;;  %v1060_v44 = vrot.slane %v8885_v56, 1 }
 0x114   : > { %11825 = vst [vmem:[#allocation49_spill] sm:$0xff] %v11824_v10  ;;  %v1094_v9 = vsel %vm11542_vm0, %v1057_v16, %v1058_v39  ;;  %v1095_v23 = vsel %vm11542_vm0, %v1056_v15, %v1057_v16  ;;  %v9273_v52 = vadd.s32 136, %v8335_v3  ;;  %v1061_v56 = vrot.slane %v8896_v51, 1 }
 0x115   : > { %v996_v26 = vsel %vm11541_vm1, %v961_v43, %v11826_v12  ;;  %v9275_v13 = vpack.c.bf16 %v1094_v9, %v1095_v23  ;;  %v1092_v43 = vsel %vm11542_vm0, %v1059_v22, %v1060_v44  ;;  %v1093_v1 = vsel %vm11542_vm0, %v1058_v39, %v1059_v22 }
 0x116   : > { %v11827_v16 = vand.u32 15, %v8462_v57  ;;  %v9294_v12 = vpack.c.bf16 %v1092_v43, %v1093_v1  ;;  %v1062_v51 = vrot.slane %v8927_v40, 1  ;;  %v1091_v22 = vsel %vm11542_vm0, %v1060_v44, %v1061_v56 }
 0x117   : > { %v9303_v9 = vadd.s32 152, %v8335_v3  ;;  %v1063_v57 = vrot.slane %v8939_v38, 1  ;;  %v9306_v23 = vpack.c.bf16 %v996_v26, %v997_v8  ;;  %v1064_v43 = vrot.slane %v8941_v5, 1 }
 0x118   : > { %vm9290_vm3 = vcmp.ne.s32.totalorder %v11827_v16, 0  ;;  %v9310_v1 = vadd.s32 168, %v8335_v3  ;;  %v1090_v16 = vsel %vm11542_vm0, %v1061_v56, %v1062_v51  ;;  %v1065_v39 = vrot.slane %v8943_v61, 1 }
 0x119   : > { %v1089_v44 = vsel %vm11542_vm0, %v1062_v51, %v1063_v57  ;;  %v9318_v36 = vpack.c.bf16 %v1090_v16, %v1091_v22  ;;  %v1088_v38 = vsel %vm11542_vm0, %v1063_v57, %v1064_v43  ;;  %v1066_v8 = vrot.slane %v8979_v6, 1  ;;  %vm9327_vm7 = vmpackc.low %vm11551_vm4, %vm9290_vm3 }
 0x11a   : > { %v11830_v26 = vmov 0  ;;  %v9331_v56 = vpack.c.bf16 %v1088_v38, %v1089_v44  ;;  %v1087_v61 = vsel %vm11542_vm0, %v1064_v43, %v1065_v39  ;;  %v9338_v22 = vadd.s32 184, %v8335_v3  ;;  %5540 = vmatmul.mubr.msk.bf16.gmra.mrb[28].mxu0 %vm9327_vm7, %v9306_v23  ;;  %5668 = vmatmul.mubr.msk.bf16.gmra.mrb[32].mxu1 %vm9327_vm7, %v9306_v23 }
 0x11b   : > { %v11831_v26 = vsel %vm9327_vm7, 4294967295, %v11830_v26  ;;  %v1086_v51 = vsel %vm11542_vm0, %v1065_v39, %v1066_v8  ;;  %v1067_v6 = vrot.slane %v8983_v27, 1  ;;  %v1068_v15 = vrot.slane %v9014_v54, 1  ;;  %1671 = vmatprep.mubr.bf16.mxu0 %v8924_v33  ;;  %2145 = vmatprep.mubr.bf16.mxu1 %v8924_v33 }
 0x11c   : > { %11832 = vst [vmem:[#allocation50_spill] sm:$0xff] %v11831_v26  ;;  %v9340_v57 = vpack.c.bf16 %v1086_v51, %v1087_v61  ;;  %v9345_v16 = vadd.s32 200, %v8335_v3  ;;  %v1069_v43 = vrot.slane %v9018_v19, 1  ;;  %v1070_v44 = vrot.slane %v9056_v55, 1  ;;  %v11841_v61 = vld [vmem:[#allocation14_spill] sm:$0xff] }
 0x11d   : > { %v9357_v27 = vadd.s32 216, %v8335_v3  ;;  %v1084_v54 = vsel %vm11542_vm0, %v1067_v6, %v1068_v15  ;;  %v1085_v38 = vsel %vm11542_vm0, %v1066_v8, %v1067_v6  ;;  %v1071_v51 = vrot.slane %v9066_v60, 1 }
 0x11e   : > { %v11833_v19 = vand.u32 15, %v8490_v32  ;;  %v9369_v55 = vpack.c.bf16 %v1084_v54, %v1085_v38  ;;  %v1082_v39 = vsel %vm11542_vm0, %v1069_v43, %v1070_v44  ;;  %v1083_v5 = vsel %vm11542_vm0, %v1068_v15, %v1069_v43 }
 0x11f   : > { %v9376_v33 = vpack.c.bf16 %v1082_v39, %v1083_v5  ;;  %v1072_v8 = vrot.slane %v9068_v24, 1  ;;  %v1081_v60 = vsel %vm11542_vm0, %v1070_v44, %v1071_v51  ;;  %v9382_v32 = vadd.s32 232, %v8335_v3  ;;  %v11869_v24 = vld [vmem:[#allocation43_spill] sm:$0xff] }
 0x120   : > { %vm7709_vm8 = vcmp.ne.s32.totalorder %v11833_v19, 0  ;;  %v11834_v6 = vmov 0  ;;  %v1073_v54 = vrot.slane %v9070_v47, 1  ;;  %v1074_v15 = vrot.slane %v9105_v20, 1  ;;  %v11837_v19 = vld [vmem:[#allocation35_spill] sm:$0xff] }
 0x121   : > { %vm9385_vm10 = vmpackc.low %vm11551_vm4, %vm7709_vm8  ;;  %v1080_v5 = vsel %vm11542_vm0, %v1071_v51, %v1072_v8  ;;  %v9395_v39 = vadd.s32 248, %v8335_v3  ;;  %v1075_v43 = vrot.slane %v8666_v18, 1  ;;  %v11842_v26 = vand.u32 15, %v11841_v61  ;;  %v11870_v3 = vld [vmem:[#allocation19_spill] sm:$0xff] }
 0x122   : > { %v11835_v6 = vsel %vm9385_vm10, 4294967295, %v11834_v6  ;;  %v9398_v44 = vpack.c.bf16 %v1080_v5, %v1081_v60  ;;  %v1078_v38 = vsel %vm11542_vm0, %v1073_v54, %v1074_v15  ;;  %v1079_v47 = vsel %vm11542_vm0, %v1072_v8, %v1073_v54  ;;  %5544 = vmatmul.mubr.msk.bf16.gmra.mrb[32].mxu0 %vm9385_vm10, %v11837_v19  ;;  %5672 = vmatmul.mubr.msk.bf16.gmra.mrb[36].mxu1 %vm9385_vm10, %v11837_v19  ;;  %v11838_v60 = vld [vmem:[#allocation36_spill] sm:$0xff]  ;;  %v11839_v8 = vld [vmem:[#allocation21_spill] sm:$0xff] }
 0x123   : > { %11836 = vst [vmem:[#allocation51_spill] sm:$0xff] %v11835_v6  ;;  %v9410_v51 = vpack.c.bf16 %v1078_v38, %v1079_v47  ;;  %1679 = vmatprep.mubr.bf16.mxu0 %v11838_v60  ;;  %2153 = vmatprep.mubr.bf16.mxu1 %v11838_v60  ;;  %v1077_v5 = vsel %vm11542_vm0, %v1074_v15, %v1075_v43  ;;  %v11840_v54 = vrot.slane %v11839_v8, 1  ;;  %vm7710_vm12 = vcmp.ne.s32.totalorder %v11842_v26, 0  ;;  %v11846_v15 = vld [vmem:[#allocation37_spill] sm:$0xff]  ;;  %v11847_v26 = vld [vmem:[#allocation15_spill] sm:$0xff] }
 0x124   : > { %vm9426_vm14 = vmpackc.low %vm11551_vm4, %vm7710_vm12  ;;  %v11843_v38 = vmov 0  ;;  %v11849_v61 = vmov 0  ;;  %v11857_v8 = vld [vmem:[#allocation17_spill] sm:$0xff] }
 0x125   : > { %v1108_v40 = vsel %vm11542_vm0, %v1075_v43, %v11840_v54  ;;  %v11844_v38 = vsel %vm9426_vm14, 4294967295, %v11843_v38  ;;  %v11852_v43 = vld [vmem:[#allocation16_spill] sm:$0xff]  ;;  %v11858_v54 = vand.u32 15, %v11857_v8 }
 0x126   : > { %v9423_v6 = vpack.c.bf16 %v1108_v40, %v1077_v5  ;;  %11845 = vst [vmem:[#allocation35_spill] sm:$0xff] %v11844_v38  ;;  %v11848_v40 = vand.u32 15, %v11847_v26  ;;  %v11853_v47 = vand.u32 15, %v11852_v43  ;;  %v11854_v5 = vmov 0  ;;  %v11863_v43 = vld [vmem:[#allocation42_spill] sm:$0xff] }
 0x127   : > { %vm7713_vm1 = vcmp.ne.s32.totalorder %v11858_v54, 0  ;;  %v11859_v26 = vmov 0  ;;  %v11866_v54 = vmov 0 }
 0x128   : > { %vm7711_vm3 = vcmp.ne.s32.totalorder %v11848_v40, 0  ;;  %vm7712_vm12 = vcmp.ne.s32.totalorder %v11853_v47, 0  ;;  %v11862_v40 = vld [vmem:[#allocation41_spill] sm:$0xff]  ;;  %v11864_v47 = vld [vmem:[#allocation18_spill] sm:$0xff] }
 0x129   : > { %vm9441_vm8 = vmpackc.low %vm11551_vm4, %vm7711_vm3  ;;  %v11865_v8 = vand.u32 15, %v11864_v47  ;;  %v11871_v47 = vand.u32 15, %v11870_v3  ;;  %v11876_v3 = vld [vmem:[#allocation20_spill] sm:$0xff] }
 0x12a   : > { %5548 = vmatmul.mubr.msk.bf16.gmra.mrb[36].mxu0 %vm9426_vm14, %v9000_v28  ;;  %5676 = vmatmul.mubr.msk.bf16.gmra.mrb[40].mxu1 %vm9426_vm14, %v9000_v28  ;;  %v11850_v61 = vsel %vm9441_vm8, 4294967295, %v11849_v61  ;;  %vm9456_vm3 = vmpackc.low %vm11551_vm4, %vm7712_vm12 }
 0x12b   : > { %1687 = vmatprep.mubr.bf16.mxu0 %v11846_v15  ;;  %2161 = vmatprep.mubr.bf16.mxu1 %v11846_v15  ;;  %11851 = vst [vmem:[#allocation36_spill] sm:$0xff] %v11850_v61  ;;  %v11855_v5 = vsel %vm9456_vm3, 4294967295, %v11854_v5  ;;  %vm9471_vm12 = vmpackc.low %vm11551_vm4, %vm7713_vm1  ;;  %vm7714_vm0 = vcmp.ne.s32.totalorder %v11865_v8, 0  ;;  %vm7715_vm5 = vcmp.ne.s32.totalorder %v11871_v47, 0  ;;  %v11872_v8 = vmov 0 }
 0x12c   : > { %11856 = vst [vmem:[#allocation21_spill] sm:$0xff] %v11855_v5  ;;  %v11860_v26 = vsel %vm9471_vm12, 4294967295, %v11859_v26  ;;  %vm9486_vm1 = vmpackc.low %vm11551_vm4, %vm7714_vm0  ;;  %v11877_v47 = vand.u32 15, %v11876_v3  ;;  %v7835_v3 = vld [vmem:[#allocation6 + $0x208] sm:$0xff]  }
 0x12d   : > { %11861 = vst [vmem:[#allocation14_spill] sm:$0xff] %v11860_v26  ;;  %v11867_v54 = vsel %vm9486_vm1, 4294967295, %v11866_v54  ;;  %vm9501_vm0 = vmpackc.low %vm11551_vm4, %vm7715_vm5 }
 0x12e   : > { %11868 = vst [vmem:[#allocation37_spill] sm:$0xff] %v11867_v54  ;;  %v11873_v8 = vsel %vm9501_vm0, 4294967295, %v11872_v8  ;;  %vm7716_vm5 = vcmp.ne.s32.totalorder %v11877_v47, 0  ;;  %v11879_v54 = vand.u32 15, %v9081_v53  ;;  %v11888_v53 = vmov 0  ;;  %v7825_v47 = vld [vmem:[#allocation6 + $0x180] sm:$0xff]  }
 0x12f   : > { %11874 = vst [vmem:[#allocation15_spill] sm:$0xff] %v11873_v8  ;;  %v7840_v8 = vld [vmem:[#allocation6 + $0x220] sm:$0xff]  }
 0x130   : > { %vm7717_vm4 = vcmp.ne.s32.totalorder %v11879_v54, 15  ;;  %v7836_v54 = vld [vmem:[#allocation6 + $0x210] sm:$0xff]  }
 0x132   : > { %5552 = vmatmul.mubr.msk.bf16.gmra.mrb[40].mxu0 %vm9441_vm8, %v9007_v21  ;;  %5680 = vmatmul.mubr.msk.bf16.gmra.mrb[44].mxu1 %vm9441_vm8, %v9007_v21 }
 0x133   : > { %1695 = vmatprep.mubr.bf16.mxu0 %v9011_v25  ;;  %2169 = vmatprep.mubr.bf16.mxu1 %v9011_v25 }
 0x13a   : > { %5556 = vmatmul.mubr.msk.bf16.gmra.mrb[44].mxu0 %vm9456_vm3, %v9049_v37  ;;  %5684 = vmatmul.mubr.msk.bf16.gmra.mrb[48].mxu1 %vm9456_vm3, %v9049_v37 }
 0x13b   : > { %1703 = vmatprep.mubr.bf16.mxu0 %v9053_v45  ;;  %2177 = vmatprep.mubr.bf16.mxu1 %v9053_v45  ;;  %v11917_v45 = vmov 0 }
 0x142   : > { %5560 = vmatmul.mubr.msk.bf16.gmra.mrb[48].mxu0 %vm9471_vm12, %v11862_v40  ;;  %5688 = vmatmul.mubr.msk.bf16.gmra.mrb[52].mxu1 %vm9471_vm12, %v11862_v40 }
 0x143   : > { %1711 = vmatprep.mubr.bf16.mxu0 %v11863_v43  ;;  %2185 = vmatprep.mubr.bf16.mxu1 %v11863_v43  ;;  %v9507_v43 = vpack.c.bf16 %v8666_v18, %v9105_v20  ;;  %v11881_v18 = vmov 0  ;;  %v11884_v20 = vmov 0 }
 0x145   : > { %11875 = vst [vmem:[#allocation16_spill] sm:$0xff] %v9507_v43 }
 0x14a   : > { %5564 = vmatmul.mubr.msk.bf16.gmra.mrb[52].mxu0 %vm9486_vm1, %v9121_v48  ;;  %5692 = vmatmul.mubr.msk.bf16.gmra.mrb[56].mxu1 %vm9486_vm1, %v9121_v48  ;;  %vm11880_vm1 = vmmov 1   ;;  %v7847_v48 = vld [vmem:[#allocation6 + $0x238] sm:$0xff]  }
 0x14b   : > { %1719 = vmatprep.mubr.bf16.mxu0 %v11869_v24  ;;  %2193 = vmatprep.mubr.bf16.mxu1 %v11869_v24  ;;  %v11878_v24 = vmov 0   ;;  %vm9522_vm12 = vmpackc.low %vm11880_vm1, %vm7716_vm5 }
 0x14c   : > { %v11882_v18 = vsel %vm9522_vm12, 4294967295, %v11881_v18  ;;  %vm9527_vm3 = vmpackc.low %vm7717_vm4, %vm11880_vm1 }
 0x14d   : > { %11883 = vst [vmem:[#allocation17_spill] sm:$0xff] %v11882_v18  ;;  %v11885_v20 = vsel %vm9527_vm3, 4294967295, %v11884_v20  ;;  %v11893_v18 = vmov 0 }
 0x14e   : > { %11886 = vst [vmem:[#allocation18_spill] sm:$0xff] %v11885_v20  ;;  %v7830_v20 = vld [vmem:[#allocation6 + $0x1d8] sm:$0xff]  }
 0x152   : > { %5568 = vmatmul.mubr.msk.bf16.gmra.mrb[56].mxu0 %vm9501_vm0, %v9139_v14  ;;  %5696 = vmatmul.mubr.msk.bf16.gmra.mrb[60].mxu1 %vm9501_vm0, %v9139_v14  ;;  %v7837_v14 = vld [vmem:[#allocation6 + $0x1e8] sm:$0xff]  }
 0x153   : > { %1727 = vmatprep.mubr.bf16.mxu0 %v9507_v43  ;;  %7125 = vmatprep.mubr.bf16.mxu1 %v11878_v24  ;;  %v11887_v43 = vand.u32 15, %v9115_v49  ;;  %v11891_v49 = vand.u32 15, %v9150_v41  ;;  %v7839_v41 = vld [vmem:[#allocation6 + $0x218] sm:$0xff]  }
 0x155   : > { %vm7718_vm0 = vcmp.ne.s32.totalorder %v11887_v43, 15  ;;  %vm7719_vm4 = vcmp.ne.s32.totalorder %v11891_v49, 15  ;;  %v11892_v43 = vld [vmem:[#allocation39_spill] sm:$0xff]  ;;  %v11900_v49 = vand.u32 15, %v9202_v42  ;;  %v11905_v42 = vmov 0 }
 0x156   : > { %vm9540_vm5 = vmpackc.low %vm7718_vm0, %vm11880_vm1 }
 0x157   : > { %v11889_v53 = vsel %vm9540_vm5, 4294967295, %v11888_v53  ;;  %vm9554_vm0 = vmpackc.low %vm7719_vm4, %vm11880_vm1 }
 0x158   : > { %11890 = vst [vmem:[#allocation19_spill] sm:$0xff] %v11889_v53  ;;  %v11894_v18 = vsel %vm9554_vm0, 4294967295, %v11893_v18 }
 0x159   : > { %11895 = vst [vmem:[#allocation20_spill] sm:$0xff] %v11894_v18 }
 0x15a   : > { %5572 = vmatmul.mubr.msk.bf16.gmra.mrb[60].mxu0 %vm9522_vm12, %v9175_v35  ;;  %7126 = vmatmul.mubr.msk.bf16.vlgmr.msra.gmra.mrb[64].mxu1 %vm9527_vm3, %v9112_v17  ;;  %v7826_v35 = vld [vmem:[#allocation6 + $0x1c8] sm:$0xff]   ;;  %vm7721_vm12 = vcmp.ne.s32.totalorder %v11900_v49, 15  ;;  %v11909_v49 = vmov 0 }
 0x15b   : > { %7077 = vmatprep.mubr.msk.bf16.mxu0 %vm9527_vm3, %v9112_v17  ;;  %7129 = vmatprep.mubr.msk.bf16.mxu1 %vm9540_vm5, %v9147_v34  ;;  %v11896_v17 = vand.u32 15, %v9167_v0  ;;  %v11897_v0 = vmov 0  ;;  %vm9580_vm8 = vmpackc.low %vm7721_vm12, %vm11880_vm1 }
 0x15c   : > { %7158 = vmatpush3.bf16.msra.mxu1 %v11892_v43  ;;  %v7828_v43 = vld [vmem:[#allocation6 + $0x1d0] sm:$0xff]  }
 0x15d   : > { %7159 = vmatprep.subr.bf16.mxu1 %v7835_v3  ;;  %vm7720_vm3 = vcmp.ne.s32.totalorder %v11896_v17, 15  ;;  %v7829_v17 = vld [vmem:[#allocation6 + $0x190] sm:$0xff]  }
 0x15e   : > { %vm9570_vm4 = vmpackc.low %vm7720_vm3, %vm11880_vm1 }
 0x15f   : > { %v11898_v0 = vsel %vm9570_vm4, 4294967295, %v11897_v0 }
 0x160   : > { %7160 = vmatpush3.bf16.msra.mxu1 %v7835_v3  ;;  %11899 = vst [vmem:[#allocation39_spill] sm:$0xff] %v11898_v0  ;;  %v7827_v3 = vld [vmem:[#allocation6 + $0x188] sm:$0xff]  }
 0x161   : > { %7161 = vmatprep.subr.bf16.mxu1 %v7836_v54 }
 0x162   : > { %7078 = vmatmul.mubr.msk.bf16.vlgmr.msra.gmra.mrb[64].mxu0 %vm9540_vm5, %v9147_v34  ;;  %7130 = vmatmul.mubr.msk.bf16.gmra.mrb[68].mxu1 %vm9554_vm0, %v9194_v2 }
 0x163   : > { %6518 = vmatpush3.bf16.msra.mxu0 %v7825_v47  ;;  %7081 = vmatprep.mubr.msk.bf16.mxu0 %vm9554_vm0, %v9194_v2  ;;  %v11901_v47 = vmov 0 }
 0x164   : > { %6519 = vmatprep.subr.bf16.mxu0 %v7826_v35  ;;  %7133 = vmatprep.mubr.msk.bf16.mxu1 %vm9570_vm4, %v9217_v46  ;;  %v11902_v47 = vsel %vm9580_vm8, 4294967295, %v11901_v47  ;;  %v11904_v35 = vand.u32 15, %v9209_v4  ;;  %v7831_v4 = vld [vmem:[#allocation6 + $0x198] sm:$0xff]  }
 0x165   : > { %7162 = vmatpush3.bf16.msra.mxu1 %v7836_v54  ;;  %11903 = vst [vmem:[#allocation52_spill] sm:$0xff] %v11902_v47  ;;  %v7843_v54 = vld [vmem:[#allocation6 + $0x228] sm:$0xff]  }
 0x166   : > { %7163 = vmatprep.subr.bf16.mxu1 %v7839_v41  ;;  %vm7722_vm3 = vcmp.ne.s32.totalorder %v11904_v35, 15  ;;  %v6397_v35 = vpop.f32.mrb[0].mxu1 }
 0x167   : > { %6520 = vmatpush3.bf16.msra.mxu0 %v7827_v3  ;;  %vm9596_vm12 = vmpackc.low %vm7722_vm3, %vm11880_vm1  ;;  %v7833_v3 = vld [vmem:[#allocation6 + $0x1e0] sm:$0xff]  }
 0x168   : > { %6521 = vmatprep.subr.bf16.mxu0 %v7828_v43  ;;  %v11906_v42 = vsel %vm9596_vm12, 4294967295, %v11905_v42  ;;  %v11912_v43 = vand.u32 15, %v9252_v50  ;;  %v6398_v50 = vpop.f32.mrb[1].mxu1 }
 0x169   : > { %7164 = vmatpush3.bf16.msra.mxu1 %v7839_v41  ;;  %11907 = vst [vmem:[#allocation53_spill] sm:$0xff] %v11906_v42  ;;  %v11908_v41 = vand.u32 15, %v9230_v11  ;;  %v7844_v11 = vld [vmem:[#allocation6 + $0x230] sm:$0xff]  }
 0x16a   : > { %7082 = vmatmul.mubr.msk.bf16.gmra.mrb[68].mxu0 %vm9570_vm4, %v9217_v46  ;;  %7134 = vmatmul.mubr.msk.bf16.gmra.mrb[72].mxu1 %vm9580_vm8, %v9236_v7  ;;  %vm7724_vm3 = vcmp.ne.s32.totalorder %v11912_v43, 15  ;;  %v7841_v43 = vld [vmem:[#allocation6 + $0x1f0] sm:$0xff]  }
 0x16b   : > { %7085 = vmatprep.mubr.msk.bf16.mxu0 %vm9580_vm8, %v9236_v7  ;;  %6522 = vmatpush3.bf16.msra.mxu0 %v7829_v17  ;;  %vm7723_vm14 = vcmp.ne.s32.totalorder %v11908_v41, 15  ;;  %v7834_v17 = vld [vmem:[#allocation6 + $0x1a0] sm:$0xff]   ;;  %v11916_v41 = vand.u32 15, %v9273_v52  ;;  %v7842_v52 = vld [vmem:[#allocation6 + $0x1b0] sm:$0xff]  }
 0x16c   : > { %7137 = vmatprep.mubr.msk.bf16.mxu1 %vm9596_vm12, %v9247_v30  ;;  %6523 = vmatprep.subr.bf16.mxu0 %v7830_v20  ;;  %vm9606_vm10 = vmpackc.low %vm7723_vm14, %vm11880_vm1  ;;  %v9629_v20 = vadd.f32 %v6398_v50, %v6397_v35  ;;  %v11920_v35 = vand.u32 15, %v9303_v9  ;;  %v11924_v9 = vand.u32 15, %v9310_v1  ;;  %v11932_v1 = vand.u32 15, %v9345_v16 }
 0x16d   : > { %7165 = vmatprep.subr.bf16.mxu1 %v7840_v8  ;;  %v11910_v49 = vsel %vm9606_vm10, 4294967295, %v11909_v49  ;;  %vm9619_vm14 = vmpackc.low %vm7724_vm3, %vm11880_vm1  ;;  %vm7725_vm7 = vcmp.ne.s32.totalorder %v11916_v41, 15  ;;  %v11936_v50 = vand.u32 15, %v9357_v27  ;;  %v11937_v16 = vmov 0 }
 0x16e   : > { %7166 = vmatpush3.bf16.msra.mxu1 %v7840_v8  ;;  %11911 = vst [vmem:[#allocation54_spill] sm:$0xff] %v11910_v49  ;;  %v11913_v8 = vmov 0  ;;  %vm9636_vm3 = vmpackc.low %vm7725_vm7, %vm11880_vm1  ;;  %vm7726_vm2 = vcmp.ne.s32.totalorder %v11920_v35, 15  ;;  %vm7727_vm15 = vcmp.ne.s32.totalorder %v11924_v9, 15  ;;  %v11940_v27 = vand.u32 15, %v9382_v32 }
 0x16f   : > { %6524 = vmatpush3.bf16.msra.mxu0 %v7831_v4  ;;  %7167 = vmatprep.subr.bf16.mxu1 %v7843_v54  ;;  %v11914_v8 = vsel %vm9619_vm14, 4294967295, %v11913_v8  ;;  %v6400_v4 = vpop.f32.mrb[2].mxu1  ;;  %v11918_v45 = vsel %vm9636_vm3, 4294967295, %v11917_v45  ;;  %vm9649_vm7 = vmpackc.low %vm7726_vm2, %vm11880_vm1  ;;  %v11944_v32 = vand.u32 15, %v9395_v39  ;;  %v11945_v41 = vmov 0 }
 0x170   : > { %6525 = vmatprep.subr.bf16.mxu0 %v7833_v3  ;;  %11915 = vst [vmem:[#allocation55_spill] sm:$0xff] %v11914_v8  ;;  %v7838_v3 = vld [vmem:[#allocation6 + $0x1a8] sm:$0xff]   ;;  %v6401_v26 = vpop.f32.mrb[3].mxu1  ;;  %11919 = vst [vmem:[#allocation56_spill] sm:$0xff] %v11918_v45 }
 0x171   : > { %v9633_v40 = vadd.f32 %v6401_v26, %v6400_v4  ;;  %v7846_v26 = vld [vmem:[#allocation6 + $0x1b8] sm:$0xff]   ;;  %vm9662_vm2 = vmpackc.low %vm7727_vm15, %vm11880_vm1  ;;  %vm7729_vm15 = vcmp.ne.s32.totalorder %v11932_v1, 15  ;;  %v11941_v4 = vmov 0 }
 0x172   : > { %7086 = vmatmul.mubr.msk.bf16.gmra.mrb[72].mxu0 %vm9596_vm12, %v9247_v30  ;;  %7138 = vmatmul.mubr.msk.bf16.gmra.mrb[76].mxu1 %vm9606_vm10, %v9275_v13 }
 0x173   : > { %7089 = vmatprep.mubr.msk.bf16.mxu0 %vm9606_vm10, %v9275_v13  ;;  %7141 = vmatprep.mubr.msk.bf16.mxu1 %vm9619_vm14, %v9294_v12 }
 0x174   : > { %6526 = vmatpush3.bf16.msra.mxu0 %v7834_v17  ;;  %7168 = vmatpush3.bf16.msra.mxu1 %v7843_v54  ;;  %v7845_v54 = vld [vmem:[#allocation6 + $0x1f8] sm:$0xff]   ;;  %v11925_v17 = vmov 0 }
 0x175   : > { %6527 = vmatprep.subr.bf16.mxu0 %v7837_v14  ;;  %7169 = vmatprep.subr.bf16.mxu1 %v7844_v11  ;;  %v11921_v14 = vmov 0  ;;  %v11926_v17 = vsel %vm9662_vm2, 4294967295, %v11925_v17 }
 0x176   : > { %v11922_v14 = vsel %vm9649_vm7, 4294967295, %v11921_v14  ;;  %11927 = vst [vmem:[#allocation58_spill] sm:$0xff] %v11926_v17 }
 0x177   : > { %11923 = vst [vmem:[#allocation57_spill] sm:$0xff] %v11922_v14 }
 0x178   : > { %6528 = vmatpush3.bf16.msra.mxu0 %v7838_v3  ;;  %7170 = vmatpush3.bf16.msra.mxu1 %v7844_v11  ;;  %v11928_v11 = vand.u32 15, %v9338_v22  ;;  %v11933_v22 = vmov 0  ;;  %v11948_v3 = vld [vmem:[#allocation22_spill] sm:$0xff] }
 0x179   : > { %6529 = vmatprep.subr.bf16.mxu0 %v7841_v43  ;;  %7171 = vmatprep.subr.bf16.mxu1 %v7847_v48  ;;  %v11951_v43 = vld [vmem:[#allocation26_spill] sm:$0xff] }
 0x17a   : > { %7090 = vmatmul.mubr.msk.bf16.gmra.mrb[76].mxu0 %vm9619_vm14, %v9294_v12  ;;  %7142 = vmatmul.mubr.msk.bf16.gmra.mrb[80].mxu1 %vm9636_vm3, %v9318_v36  ;;  %vm7728_vm13 = vcmp.ne.s32.totalorder %v11928_v11, 15 }
 0x17b   : > { %7093 = vmatprep.mubr.msk.bf16.mxu0 %vm9636_vm3, %v9318_v36  ;;  %7145 = vmatprep.mubr.msk.bf16.mxu1 %vm9649_vm7, %v9331_v56  ;;  %vm9675_vm3 = vmpackc.low %vm7728_vm13, %vm11880_vm1  ;;  %vm7730_vm13 = vcmp.ne.s32.totalorder %v11936_v50, 15 }
 0x17c   : > { %6530 = vmatpush3.bf16.msra.mxu0 %v7842_v52  ;;  %7172 = vmatpush3.bf16.msra.mxu1 %v7847_v48  ;;  %v11929_v48 = vmov 0 }
 0x17d   : > { %6531 = vmatprep.subr.bf16.mxu0 %v7845_v54  ;;  %v11930_v48 = vsel %vm9675_vm3, 4294967295, %v11929_v48 }
 0x17e   : > { %11931 = vst [vmem:[#allocation59_spill] sm:$0xff] %v11930_v48 }
 0x180   : > { %6532 = vmatpush3.bf16.msra.mxu0 %v7846_v26 }
 0x182   : > { %7094 = vmatmul.mubr.msk.bf16.gmra.mrb[80].mxu0 %vm9649_vm7, %v9331_v56  ;;  %7146 = vmatmul.mubr.msk.bf16.gmra.mrb[84].mxu1 %vm9662_vm2, %v9340_v57  ;;  %vm9688_vm7 = vmpackc.low %vm7729_vm15, %vm11880_vm1  ;;  %vm7731_vm15 = vcmp.ne.s32.totalorder %v11940_v27, 15 }
 0x183   : > { %7097 = vmatprep.mubr.msk.bf16.mxu0 %vm9662_vm2, %v9340_v57  ;;  %7149 = vmatprep.mubr.msk.bf16.mxu1 %vm9675_vm3, %v9369_v55  ;;  %v11934_v22 = vsel %vm9688_vm7, 4294967295, %v11933_v22  ;;  %vm9701_vm2 = vmpackc.low %vm7730_vm13, %vm11880_vm1  ;;  %vm7732_vm13 = vcmp.ne.s32.totalorder %v11944_v32, 15 }
 0x184   : > { %11935 = vst [vmem:[#allocation60_spill] sm:$0xff] %v11934_v22  ;;  %v11938_v16 = vsel %vm9701_vm2, 4294967295, %v11937_v16 }
 0x185   : > { %11939 = vst [vmem:[#allocation61_spill] sm:$0xff] %v11938_v16 }
 0x18a   : > { %7098 = vmatmul.mubr.msk.bf16.gmra.mrb[84].mxu0 %vm9675_vm3, %v9369_v55  ;;  %7150 = vmatmul.mubr.msk.bf16.gmra.mrb[88].mxu1 %vm9688_vm7, %v9376_v33  ;;  %vm9714_vm3 = vmpackc.low %vm7731_vm15, %vm11880_vm1 }
 0x18b   : > { %7101 = vmatprep.mubr.msk.bf16.mxu0 %vm9688_vm7, %v9376_v33  ;;  %7153 = vmatprep.mubr.msk.bf16.mxu1 %vm9701_vm2, %v9398_v44  ;;  %v11942_v4 = vsel %vm9714_vm3, 4294967295, %v11941_v4  ;;  %vm9733_vm15 = vmpackc.low %vm7732_vm13, %vm11880_vm1  ;;  %vm11957_vm1 = vnez %v11918_v45  ;;  %vm11959_vm13 = vnez %v11922_v14 }
 0x18c   : > { %11943 = vst [vmem:[#allocation62_spill] sm:$0xff] %v11942_v4  ;;  %v11946_v41 = vsel %vm9733_vm15, 4294967295, %v11945_v41 }
 0x18d   : > { %11947 = vst [vmem:[#allocation63_spill] sm:$0xff] %v11946_v41 }
 0x192   : > { %7102 = vmatmul.mubr.msk.bf16.gmra.mrb[88].mxu0 %vm9701_vm2, %v9398_v44  ;;  %7154 = vmatmul.mubr.msk.bf16.gmra.mrb[92].mxu1 %vm9714_vm3, %v9410_v51 }
 0x193   : > { %7105 = vmatprep.mubr.msk.bf16.mxu0 %vm9714_vm3, %v9410_v51  ;;  %7173 = vmatprep.mubr.msk.bf16.mxu1 %vm9540_vm5, %v9147_v34  ;;  %v11949_v34 = vld [vmem:[#allocation24_spill] sm:$0xff] }
 0x19a   : > { %7106 = vmatmul.mubr.msk.bf16.gmra.mrb[92].mxu0 %vm9733_vm15, %v9423_v6  ;;  %7174 = vmatmul.mubr.msk.bf16.vlgmr.msra.gmra.mrb[64].mxu1 %vm9554_vm0, %v9194_v2  ;;  %v11952_v2 = vld [vmem:[#allocation27_spill] sm:$0xff] }
 0x19b   : > { %2637 = vmatprep.mubr.bf16.mxu0 %v11948_v3  ;;  %7177 = vmatprep.mubr.msk.bf16.mxu1 %vm9570_vm4, %v9217_v46  ;;  %v11954_v46 = vld [vmem:[#allocation28_spill] sm:$0xff] }
 0x1a2   : > { %5760 = vmatmul.mubr.msk.bf16.vlgmr.msra.gmra.mrb[96].mxu0 %vm8786_vm6, %v11949_v34  ;;  %7178 = vmatmul.mubr.msk.bf16.gmra.mrb[68].mxu1 %vm9580_vm8, %v9236_v7  ;;  %v11955_v7 = vld [vmem:[#allocation29_spill] sm:$0xff] }
 0x1a3   : > { %2645 = vmatprep.mubr.bf16.mxu0 %v11951_v43  ;;  %7181 = vmatprep.mubr.msk.bf16.mxu1 %vm9596_vm12, %v9247_v30  ;;  %v11958_v30 = vld [vmem:[#allocation30_spill] sm:$0xff] }
 0x1aa   : > { %5764 = vmatmul.mubr.msk.bf16.gmra.mrb[100].mxu0 %vm8890_vm9, %v11952_v2  ;;  %7182 = vmatmul.mubr.msk.bf16.gmra.mrb[72].mxu1 %vm9606_vm10, %v9275_v13 }
 0x1ab   : > { %2653 = vmatprep.mubr.bf16.mxu0 %v11954_v46  ;;  %7185 = vmatprep.mubr.msk.bf16.mxu1 %vm9619_vm14, %v9294_v12  ;;  %vm11963_vm14 = vnez %v11930_v48 }
 0x1b2   : > { %5768 = vmatmul.mubr.msk.bf16.gmra.mrb[104].mxu0 %vm8996_vm11, %v11955_v7  ;;  %7186 = vmatmul.mubr.msk.bf16.gmra.mrb[76].mxu1 %vm11957_vm1, %v9318_v36  ;;  %v6261_v13 = vpop.f32.mrb[0].mxu0  ;;  %v6403_v54 = vpop.f32.mrb[4].mxu1  ;;  %vm11960_vm1 = vnez %v11805_v29 }
 0x1b3   : > { %2661 = vmatprep.mubr.bf16.mxu0 %v11958_v30  ;;  %7189 = vmatprep.mubr.msk.bf16.mxu1 %vm11959_vm13, %v9331_v56  ;;  %v6262_v9 = vpop.f32.mrb[1].mxu0  ;;  %v6404_v26 = vpop.f32.mrb[5].mxu1  ;;  %vm11961_vm13 = vnez %v11926_v17  ;;  %v11962_v56 = vld [vmem:[#allocation31_spill] sm:$0xff] }
 0x1b4   : > { %v6264_v11 = vpop.f32.mrb[2].mxu0  ;;  %v9777_v12 = vadd.f32 %v6404_v26, %v6403_v54  ;;  %v6406_v1 = vpop.f32.mrb[6].mxu1  ;;  %v9779_v50 = vadd.f32 %v6262_v9, %v6261_v13 }
 0x1b5   : > { %v6265_v27 = vpop.f32.mrb[3].mxu0  ;;  %v6407_v32 = vpop.f32.mrb[7].mxu1 }
 0x1b6   : > { %v9781_v3 = vadd.f32 %v6407_v32, %v6406_v1  ;;  %v9783_v36 = vadd.f32 %v6265_v27, %v6264_v11 }
 0x1ba   : > { %5772 = vmatmul.mubr.msk.bf16.gmra.mrb[108].mxu0 %vm11960_vm1, %v8868_v63  ;;  %7190 = vmatmul.mubr.msk.bf16.gmra.mrb[80].mxu1 %vm11961_vm13, %v9340_v57  ;;  %v6267_v34 = vpop.f32.mrb[4].mxu0  ;;  %v6409_v43 = vpop.f32.mrb[8].mxu1  ;;  %vm11964_vm13 = vnez %v11820_v59 }
 0x1bb   : > { %2669 = vmatprep.mubr.bf16.mxu0 %v11962_v56  ;;  %7193 = vmatprep.mubr.msk.bf16.mxu1 %vm11963_vm14, %v9369_v55  ;;  %v6268_v2 = vpop.f32.mrb[5].mxu0  ;;  %v6410_v46 = vpop.f32.mrb[9].mxu1  ;;  %v11965_v55 = vld [vmem:[#allocation32_spill] sm:$0xff] }
 0x1bc   : > { %v6270_v7 = vpop.f32.mrb[6].mxu0  ;;  %v9795_v30 = vadd.f32 %v6410_v46, %v6409_v43  ;;  %v6412_v13 = vpop.f32.mrb[10].mxu1  ;;  %v9797_v54 = vadd.f32 %v6268_v2, %v6267_v34 }
 0x1bd   : > { %v6271_v63 = vpop.f32.mrb[7].mxu0  ;;  %v6413_v9 = vpop.f32.mrb[11].mxu1 }
 0x1be   : > { %v9799_v26 = vadd.f32 %v6413_v9, %v6412_v13  ;;  %v9801_v57 = vadd.f32 %v6271_v63, %v6270_v7 }
 0x1c2   : > { %5776 = vmatmul.mubr.msk.bf16.gmra.mrb[112].mxu0 %vm11964_vm13, %v9119_v62  ;;  %7194 = vmatmul.mubr.msk.bf16.gmra.mrb[84].mxu1 %vm9688_vm7, %v9376_v33  ;;  %v6273_v11 = vpop.f32.mrb[8].mxu0  ;;  %v6415_v1 = vpop.f32.mrb[12].mxu1  ;;  %vm11966_vm7 = vnez %v11824_v10 }
 0x1c3   : > { %2677 = vmatprep.mubr.bf16.mxu0 %v11965_v55  ;;  %7197 = vmatprep.mubr.msk.bf16.mxu1 %vm9701_vm2, %v9398_v44  ;;  %v6274_v27 = vpop.f32.mrb[9].mxu0  ;;  %v6416_v32 = vpop.f32.mrb[13].mxu1 }
 0x1c4   : > { %v6276_v56 = vpop.f32.mrb[10].mxu0  ;;  %v9813_v34 = vadd.f32 %v6416_v32, %v6415_v1  ;;  %v6418_v43 = vpop.f32.mrb[14].mxu1  ;;  %v9815_v2 = vadd.f32 %v6274_v27, %v6273_v11 }
 0x1c5   : > { %v6277_v62 = vpop.f32.mrb[11].mxu0  ;;  %v6419_v46 = vpop.f32.mrb[15].mxu1 }
 0x1c6   : > { %v9817_v7 = vadd.f32 %v6419_v46, %v6418_v43  ;;  %v9819_v33 = vadd.f32 %v6277_v62, %v6276_v56 }
 0x1ca   : > { %5780 = vmatmul.mubr.msk.bf16.gmra.mrb[116].mxu0 %vm11966_vm7, %v9197_v31  ;;  %7198 = vmatmul.mubr.msk.bf16.gmra.mrb[88].mxu1 %vm9714_vm3, %v9410_v51  ;;  %v6279_v44 = vpop.f32.mrb[12].mxu0 }
 0x1cb   : > { %2685 = vmatprep.mubr.bf16.mxu0 %v9234_v58  ;;  %7201 = vmatprep.mubr.msk.bf16.mxu1 %vm9733_vm15, %v9423_v6  ;;  %v6421_v13 = vpop.f32.mrb[16].mxu1  ;;  %v6280_v63 = vpop.f32.mrb[13].mxu0  ;;  %v11967_v58 = vld [vmem:[#allocation50_spill] sm:$0xff] }
 0x1cc   : > { %v6422_v9 = vpop.f32.mrb[17].mxu1  ;;  %v6282_v55 = vpop.f32.mrb[14].mxu0  ;;  %v9833_v27 = vadd.f32 %v6280_v63, %v6279_v44  ;;  %vm11968_vm3 = vnez %v11967_v58  ;;  %v11969_v6 = vld [vmem:[#allocation34_spill] sm:$0xff] }
 0x1cd   : > { %v9831_v11 = vadd.f32 %v6422_v9, %v6421_v13  ;;  %v6424_v1 = vpop.f32.mrb[18].mxu1  ;;  %v6283_v31 = vpop.f32.mrb[15].mxu0 }
 0x1ce   : > { %v6425_v32 = vpop.f32.mrb[19].mxu1  ;;  %v9837_v51 = vadd.f32 %v6283_v31, %v6282_v55 }
 0x1cf   : > { %v9835_v56 = vadd.f32 %v6425_v32, %v6424_v1 }
 0x1d2   : > { %5784 = vmatmul.mubr.msk.bf16.gmra.mrb[120].mxu0 %vm11968_vm3, %v9306_v23  ;;  %7202 = vmatmul.mubr.bf16.gmra.mrb[92].mxu1 %v11878_v24  ;;  %v6285_v43 = vpop.f32.mrb[16].mxu0  ;;  %v11970_v23 = vld [vmem:[#allocation51_spill] sm:$0xff] }
 0x1d3   : > { %2693 = vmatprep.mubr.bf16.mxu0 %v11969_v6  ;;  %v6427_v62 = vpop.f32.mrb[20].mxu1  ;;  %v6286_v46 = vpop.f32.mrb[17].mxu0  ;;  %vm11971_vm15 = vnez %v11970_v23 }
 0x1d4   : > { %v6428_v13 = vpop.f32.mrb[21].mxu1  ;;  %v6288_v44 = vpop.f32.mrb[18].mxu0  ;;  %v9846_v1 = vadd.f32 %v6286_v46, %v6285_v43 }
 0x1d5   : > { %v9844_v63 = vadd.f32 %v6428_v13, %v6427_v62  ;;  %v6430_v9 = vpop.f32.mrb[22].mxu1  ;;  %v6289_v55 = vpop.f32.mrb[19].mxu0 }
 0x1d6   : > { %v6431_v31 = vpop.f32.mrb[23].mxu1  ;;  %v9850_v41 = vadd.f32 %v6289_v55, %v6288_v44 }
 0x1d7   : > { %v9848_v32 = vadd.f32 %v6431_v31, %v6430_v9 }
 0x1da   : > { %5788 = vmatmul.mubr.msk.bf16.gmra.mrb[124].mxu0 %vm11971_vm15, %v11837_v19  ;;  %v6291_v6 = vpop.f32.mrb[20].mxu0  ;;  %vm11972_vm15 = vnez %v11844_v38 }
 0x1db   : > { %2701 = vmatprep.mubr.bf16.mxu0 %v11838_v60  ;;  %v6433_v58 = vpop.f32.mrb[24].mxu1  ;;  %v6292_v4 = vpop.f32.mrb[21].mxu0 }
 0x1dc   : > { %v6434_v62 = vpop.f32.mrb[25].mxu1  ;;  %v6294_v13 = vpop.f32.mrb[22].mxu0  ;;  %v9858_v46 = vadd.f32 %v6292_v4, %v6291_v6 }
 0x1dd   : > { %v9856_v16 = vadd.f32 %v6434_v62, %v6433_v58  ;;  %v6436_v43 = vpop.f32.mrb[26].mxu1  ;;  %v6295_v9 = vpop.f32.mrb[23].mxu0 }
 0x1de   : > { %v6437_v31 = vpop.f32.mrb[27].mxu1  ;;  %v9862_v55 = vadd.f32 %v6295_v9, %v6294_v13 }
 0x1df   : > { %v9860_v44 = vadd.f32 %v6437_v31, %v6436_v43 }
 0x1e2   : > { %5792 = vmatmul.mubr.msk.bf16.gmra.mrb[128].mxu0 %vm11972_vm15, %v9000_v28  ;;  %v6297_v19 = vpop.f32.mrb[24].mxu0  ;;  %vm11973_vm15 = vnez %v11850_v61 }
 0x1e3   : > { %2709 = vmatprep.mubr.bf16.mxu0 %v11846_v15  ;;  %v6439_v60 = vpop.f32.mrb[28].mxu1  ;;  %v6298_v23 = vpop.f32.mrb[25].mxu0 }
 0x1e4   : > { %v6440_v58 = vpop.f32.mrb[29].mxu1  ;;  %v6300_v62 = vpop.f32.mrb[26].mxu0  ;;  %v9870_v6 = vadd.f32 %v6298_v23, %v6297_v19 }
 0x1e5   : > { %v9868_v10 = vadd.f32 %v6440_v58, %v6439_v60  ;;  %v6442_v4 = vpop.f32.mrb[30].mxu1  ;;  %v6301_v43 = vpop.f32.mrb[27].mxu0 }
 0x1e6   : > { %v6443_v31 = vpop.f32.mrb[31].mxu1  ;;  %v9874_v9 = vadd.f32 %v6301_v43, %v6300_v62 }
 0x1e7   : > { %v9872_v13 = vadd.f32 %v6443_v31, %v6442_v4 }
 0x1ea   : > { %5796 = vmatmul.mubr.msk.bf16.gmra.mrb[132].mxu0 %vm11973_vm15, %v9007_v21  ;;  %vm11974_vm15 = vnez %v11855_v5  ;;  %v11975_v21 = vld [vmem:[#allocation40_spill] sm:$0xff]  ;;  %v11976_v5 = vld [vmem:[#allocation41_spill] sm:$0xff] }
 0x1eb   : > { %2717 = vmatprep.mubr.bf16.mxu0 %v9011_v25 }
 0x1ed   : > { %v6303_v28 = vpop.f32.mrb[28].mxu0  ;;  %v6445_v15 = vpop.f32.mrb[32].mxu1 }
 0x1ee   : > { %v6304_v38 = vpop.f32.mrb[29].mxu0  ;;  %v6446_v60 = vpop.f32.mrb[33].mxu1 }
 0x1ef   : > { %v6306_v58 = vpop.f32.mrb[30].mxu0  ;;  %v9880_v22 = vadd.f32 %v6446_v60, %v6445_v15  ;;  %v6448_v23 = vpop.f32.mrb[34].mxu1  ;;  %v9882_v19 = vadd.f32 %v6304_v38, %v6303_v28 }
 0x1f0   : > { %v6307_v4 = vpop.f32.mrb[31].mxu0  ;;  %v6449_v31 = vpop.f32.mrb[35].mxu1 }
 0x1f1   : > { %v9884_v62 = vadd.f32 %v6449_v31, %v6448_v23  ;;  %v9886_v43 = vadd.f32 %v6307_v4, %v6306_v58 }
 0x1f2   : > { %5800 = vmatmul.mubr.msk.bf16.gmra.mrb[136].mxu0 %vm11974_vm15, %v9049_v37  ;;  %v11977_v37 = vld [vmem:[#allocation14_spill] sm:$0xff] }
 0x1f3   : > { %2725 = vmatprep.mubr.bf16.mxu0 %v11975_v21  ;;  %vm11978_vm15 = vnez %v11977_v37  ;;  %v11979_v21 = vld [vmem:[#allocation42_spill] sm:$0xff]  ;;  %v11981_v37 = vld [vmem:[#allocation45_spill] sm:$0xff] }
 0x1f5   : > { %v6309_v25 = vpop.f32.mrb[32].mxu0  ;;  %v6451_v61 = vpop.f32.mrb[36].mxu1 }
 0x1f6   : > { %v6310_v48 = vpop.f32.mrb[33].mxu0  ;;  %v6452_v15 = vpop.f32.mrb[37].mxu1 }
 0x1f7   : > { %v9892_v60 = vadd.f32 %v6310_v48, %v6309_v25  ;;  %v6312_v38 = vpop.f32.mrb[34].mxu0  ;;  %v9894_v28 = vadd.f32 %v6452_v15, %v6451_v61  ;;  %v6454_v59 = vpop.f32.mrb[38].mxu1 }
 0x1f8   : > { %v6313_v23 = vpop.f32.mrb[35].mxu0  ;;  %v6455_v31 = vpop.f32.mrb[39].mxu1 }
 0x1f9   : > { %v9896_v58 = vadd.f32 %v6313_v23, %v6312_v38  ;;  %v9898_v4 = vadd.f32 %v6455_v31, %v6454_v59 }
 0x1fa   : > { %5804 = vmatmul.mubr.msk.bf16.gmra.mrb[140].mxu0 %vm11978_vm15, %v11976_v5  ;;  %v11982_v5 = vld [vmem:[#allocation37_spill] sm:$0xff] }
 0x1fb   : > { %2733 = vmatprep.mubr.bf16.mxu0 %v11979_v21  ;;  %vm11983_vm15 = vnez %v11982_v5  ;;  %v11984_v21 = vld [vmem:[#allocation43_spill] sm:$0xff]  ;;  %v11987_v5 = vld [vmem:[#allocation46_spill] sm:$0xff] }
 0x1fd   : > { %v6315_v17 = vpop.f32.mrb[36].mxu0  ;;  %v6457_v14 = vpop.f32.mrb[40].mxu1 }
 0x1fe   : > { %v6316_v48 = vpop.f32.mrb[37].mxu0  ;;  %v6458_v25 = vpop.f32.mrb[41].mxu1 }
 0x1ff   : > { %v9904_v29 = vadd.f32 %v6316_v48, %v6315_v17  ;;  %v6318_v61 = vpop.f32.mrb[38].mxu0  ;;  %v9906_v15 = vadd.f32 %v6458_v25, %v6457_v14  ;;  %v6460_v45 = vpop.f32.mrb[42].mxu1 }
 0x200   : > { %v6319_v38 = vpop.f32.mrb[39].mxu0  ;;  %v6461_v23 = vpop.f32.mrb[43].mxu1 }
 0x201   : > { %v9908_v59 = vadd.f32 %v6319_v38, %v6318_v61  ;;  %v9910_v31 = vadd.f32 %v6461_v23, %v6460_v45 }
 0x202   : > { %5808 = vmatmul.mubr.msk.bf16.gmra.mrb[144].mxu0 %vm11983_vm15, %v11981_v37  ;;  %v11988_v37 = vld [vmem:[#allocation15_spill] sm:$0xff] }
 0x203   : > { %11980 = vst [vmem:[#allocation22_spill] sm:$0xff] %v9910_v31  ;;  %2741 = vmatprep.mubr.bf16.mxu0 %v11984_v21  ;;  %vm11989_vm15 = vnez %v11988_v37  ;;  %v11990_v21 = vld [vmem:[#allocation16_spill] sm:$0xff]  ;;  %v11993_v37 = vld [vmem:[#allocation47_spill] sm:$0xff] }
 0x205   : > { %v6321_v8 = vpop.f32.mrb[40].mxu0  ;;  %v6463_v52 = vpop.f32.mrb[44].mxu1 }
 0x206   : > { %v6322_v17 = vpop.f32.mrb[41].mxu0  ;;  %v6464_v48 = vpop.f32.mrb[45].mxu1 }
 0x207   : > { %v9916_v49 = vadd.f32 %v6322_v17, %v6321_v8  ;;  %v6324_v14 = vpop.f32.mrb[42].mxu0  ;;  %v9918_v25 = vadd.f32 %v6464_v48, %v6463_v52  ;;  %v6466_v42 = vpop.f32.mrb[46].mxu1 }
 0x208   : > { %v6325_v61 = vpop.f32.mrb[43].mxu0  ;;  %v6467_v38 = vpop.f32.mrb[47].mxu1 }
 0x209   : > { %v9920_v45 = vadd.f32 %v6325_v61, %v6324_v14  ;;  %v9922_v23 = vadd.f32 %v6467_v38, %v6466_v42 }
 0x20a   : > { %5812 = vmatmul.mubr.msk.bf16.gmra.mrb[148].mxu0 %vm11989_vm15, %v11987_v5  ;;  %v11994_v5 = vld [vmem:[#allocation17_spill] sm:$0xff] }
 0x20b   : > { %11985 = vst [vmem:[#allocation24_spill] sm:$0xff] %v9920_v45  ;;  %11986 = vst [vmem:[#allocation26_spill] sm:$0xff] %v9922_v23  ;;  %2749 = vmatprep.mubr.bf16.mxu0 %v11990_v21  ;;  %vm11995_vm15 = vnez %v11994_v5 }
 0x20d   : > { %v6327_v35 = vpop.f32.mrb[44].mxu0  ;;  %v6469_v47 = vpop.f32.mrb[48].mxu1 }
 0x20e   : > { %v6328_v8 = vpop.f32.mrb[45].mxu0  ;;  %v6470_v17 = vpop.f32.mrb[49].mxu1 }
 0x20f   : > { %v9928_v0 = vadd.f32 %v6328_v8, %v6327_v35  ;;  %v6330_v52 = vpop.f32.mrb[46].mxu0  ;;  %v9930_v48 = vadd.f32 %v6470_v17, %v6469_v47  ;;  %v6472_v39 = vpop.f32.mrb[50].mxu1 }
 0x210   : > { %v6331_v14 = vpop.f32.mrb[47].mxu0  ;;  %v6473_v61 = vpop.f32.mrb[51].mxu1 }
 0x211   : > { %11991 = vst [vmem:[#allocation27_spill] sm:$0xff] %v9930_v48  ;;  %v9932_v42 = vadd.f32 %v6331_v14, %v6330_v52  ;;  %v9934_v38 = vadd.f32 %v6473_v61, %v6472_v39 }
 0x212   : > { %5816 = vmatmul.mubr.msk.bf16.gmra.mrb[152].mxu0 %vm11995_vm15, %v11993_v37 }
 0x213   : > { %11992 = vst [vmem:[#allocation28_spill] sm:$0xff] %v9934_v38  ;;  %2757 = vmatprep.mubr.bf16.mxu0 %v11878_v24 }
 0x215   : > { %v6333_v21 = vpop.f32.mrb[48].mxu0  ;;  %v6475_v18 = vpop.f32.mrb[52].mxu1 }
 0x216   : > { %v6334_v35 = vpop.f32.mrb[49].mxu0  ;;  %v6476_v8 = vpop.f32.mrb[53].mxu1 }
 0x217   : > { %v9940_v53 = vadd.f32 %v6334_v35, %v6333_v21  ;;  %v6336_v47 = vpop.f32.mrb[50].mxu0  ;;  %v9942_v17 = vadd.f32 %v6476_v8, %v6475_v18  ;;  %v6478_v48 = vpop.f32.mrb[54].mxu1 }
 0x218   : > { %v6337_v52 = vpop.f32.mrb[51].mxu0  ;;  %v6479_v14 = vpop.f32.mrb[55].mxu1 }
 0x219   : > { %11996 = vst [vmem:[#allocation29_spill] sm:$0xff] %v9940_v53  ;;  %11997 = vst [vmem:[#allocation30_spill] sm:$0xff] %v9942_v17  ;;  %v9944_v39 = vadd.f32 %v6337_v52, %v6336_v47  ;;  %v9946_v61 = vadd.f32 %v6479_v14, %v6478_v48 }
 0x21a   : > { %2758 = vmatmul.mubr.bf16.gmra.mrb[156].mxu0 %v11878_v24 }
 0x21b   : > { %11998 = vst [vmem:[#allocation31_spill] sm:$0xff] %v9944_v39  ;;  %11999 = vst [vmem:[#allocation32_spill] sm:$0xff] %v9946_v61 }
 0x21d   : > { %v6339_v37 = vpop.f32.mrb[52].mxu0  ;;  %v6481_v5 = vpop.f32.mrb[56].mxu1 }
 0x21e   : > { %v6340_v38 = vpop.f32.mrb[53].mxu0  ;;  %v6482_v31 = vpop.f32.mrb[57].mxu1 }
 0x21f   : > { %v9949_v23 = vadd.f32 %v6340_v38, %v6339_v37  ;;  %v6342_v21 = vpop.f32.mrb[54].mxu0  ;;  %v9951_v35 = vadd.f32 %v6482_v31, %v6481_v5  ;;  %v6484_v18 = vpop.f32.mrb[58].mxu1 }
 0x220   : > { %v6343_v8 = vpop.f32.mrb[55].mxu0  ;;  %v6485_v17 = vpop.f32.mrb[59].mxu1 }
 0x221   : > { %12000 = vst [vmem:[#allocation34_spill] sm:$0xff] %v9951_v35  ;;  %v9953_v53 = vadd.f32 %v6343_v8, %v6342_v21  ;;  %v9955_v47 = vadd.f32 %v6485_v17, %v6484_v18 }
 0x223   : > { %12001 = vst [vmem:[#allocation40_spill] sm:$0xff] %v9953_v53  ;;  %12002 = vst [vmem:[#allocation41_spill] sm:$0xff] %v9955_v47 }
 0x225   : > { %v6345_v48 = vpop.f32.mrb[56].mxu0  ;;  %v6487_v52 = vpop.f32.mrb[60].mxu1 }
 0x226   : > { %v6346_v14 = vpop.f32.mrb[57].mxu0  ;;  %v6488_v24 = vpop.f32.mrb[61].mxu1 }
 0x227   : > { %v9957_v61 = vadd.f32 %v6346_v14, %v6345_v48  ;;  %v6348_v39 = vpop.f32.mrb[58].mxu0  ;;  %v9959_v45 = vadd.f32 %v6488_v24, %v6487_v52  ;;  %v6490_v38 = vpop.f32.mrb[62].mxu1 }
 0x228   : > { %v6349_v37 = vpop.f32.mrb[59].mxu0  ;;  %v6491_v31 = vpop.f32.mrb[63].mxu1 }
 0x229   : > { %12003 = vst [vmem:[#allocation42_spill] sm:$0xff] %v9959_v45  ;;  %v9961_v5 = vadd.f32 %v6349_v37, %v6348_v39  ;;  %v9963_v35 = vadd.f32 %v6491_v31, %v6490_v38 }
 0x22d   : > { %v6351_v21 = vpop.f32.mrb[60].mxu0 }
 0x22e   : > { %v6352_v8 = vpop.f32.mrb[61].mxu0 }
 0x22f   : > { %v9965_v17 = vadd.f32 %v6352_v8, %v6351_v21  ;;  %v6354_v18 = vpop.f32.mrb[62].mxu0 }
 0x230   : > { %v6355_v47 = vpop.f32.mrb[63].mxu0 }
 0x231   : > { %v9967_v53 = vadd.f32 %v6355_v47, %v6354_v18 }
 0x235   : > { %v7079_v48 = vpop.f32.mrb[64].mxu0 }
 0x236   : > { %v1779_v14 = vadd.f32 %v7079_v48, %v9797_v54  ;;  %v1770_v24 = vpop.f32.mrb[65].mxu0 }
 0x237   : > { %v1771_v52 = vadd.f32 %v9779_v50, %v1770_v24  ;;  %v7080_v45 = vpop.f32.mrb[66].mxu0 }
 0x238   : > { %v9972_v39 = vadd.f32 %v9777_v12, %v1779_v14  ;;  %v1782_v38 = vadd.f32 %v7080_v45, %v9801_v57  ;;  %v1773_v37 = vpop.f32.mrb[67].mxu0 }
 0x239   : > { %v9976_v31 = vadd.f32 %v9629_v20, %v1771_v52  ;;  %v1774_v21 = vadd.f32 %v9783_v36, %v1773_v37 }
 0x23a   : > { %v9980_v47 = vadd.f32 %v9781_v3, %v1782_v38 }
 0x23b   : > { %v9983_v54 = vadd.f32 %v9633_v40, %v1774_v21 }
 0x23d   : > { %v7083_v8 = vpop.f32.mrb[68].mxu0 }
 0x23e   : > { %v1795_v50 = vadd.f32 %v7083_v8, %v9833_v27  ;;  %v1786_v18 = vpop.f32.mrb[69].mxu0 }
 0x23f   : > { %v1787_v12 = vadd.f32 %v9815_v2, %v1786_v18  ;;  %v7084_v48 = vpop.f32.mrb[70].mxu0 }
 0x240   : > { %v9988_v57 = vadd.f32 %v9813_v34, %v1795_v50  ;;  %v1798_v20 = vadd.f32 %v7084_v48, %v9837_v51  ;;  %v1789_v45 = vpop.f32.mrb[71].mxu0 }
 0x241   : > { %v9992_v36 = vadd.f32 %v9795_v30, %v1787_v12  ;;  %v1790_v3 = vadd.f32 %v9819_v33, %v1789_v45 }
 0x242   : > { %v9996_v40 = vadd.f32 %v9817_v7, %v1798_v20 }
 0x243   : > { %v9999_v27 = vadd.f32 %v9799_v26, %v1790_v3 }
 0x245   : > { %v7087_v14 = vpop.f32.mrb[72].mxu0 }
 0x246   : > { %v1811_v2 = vadd.f32 %v7087_v14, %v9858_v46  ;;  %v1802_v24 = vpop.f32.mrb[73].mxu0 }
 0x247   : > { %v1803_v34 = vadd.f32 %v9846_v1, %v1802_v24  ;;  %v7088_v52 = vpop.f32.mrb[74].mxu0 }
 0x248   : > { %v10004_v51 = vadd.f32 %v9844_v63, %v1811_v2  ;;  %v1814_v30 = vadd.f32 %v7088_v52, %v9862_v55  ;;  %v1805_v38 = vpop.f32.mrb[75].mxu0  ;;  %v12005_v52 = vld [vmem:[#allocation26_spill] sm:$0xff] }
 0x249   : > { %v10008_v33 = vadd.f32 %v9831_v11, %v1803_v34  ;;  %v1806_v7 = vadd.f32 %v9850_v41, %v1805_v38  ;;  %v7849_v34 = vld [vmem:[#allocation8 + $0xc0] sm:$0xff]  }
 0x24a   : > { %v10012_v26 = vadd.f32 %v9848_v32, %v1814_v30 }
 0x24b   : > { %v10015_v46 = vadd.f32 %v9835_v56, %v1806_v7  ;;  %v12007_v7 = vld [vmem:[#allocation29_spill] sm:$0xff] }
 0x24d   : > { %v7091_v37 = vpop.f32.mrb[76].mxu0 }
 0x24e   : > { %v1827_v1 = vadd.f32 %v7091_v37, %v9882_v19  ;;  %v1818_v21 = vpop.f32.mrb[77].mxu0 }
 0x24f   : > { %v1819_v63 = vadd.f32 %v9870_v6, %v1818_v21  ;;  %v7092_v8 = vpop.f32.mrb[78].mxu0 }
 0x250   : > { %v10020_v55 = vadd.f32 %v9868_v10, %v1827_v1  ;;  %v1830_v11 = vadd.f32 %v7092_v8, %v9886_v43  ;;  %v1821_v50 = vpop.f32.mrb[79].mxu0  ;;  %v12008_v1 = vld [vmem:[#allocation30_spill] sm:$0xff] }
 0x251   : > { %v10024_v41 = vadd.f32 %v9856_v16, %v1819_v63  ;;  %v1822_v32 = vadd.f32 %v9874_v9, %v1821_v50  ;;  %v12009_v63 = vld [vmem:[#allocation40_spill] sm:$0xff]  ;;  %v12010_v50 = vld [vmem:[#allocation27_spill] sm:$0xff] }
 0x252   : > { %v10028_v56 = vadd.f32 %v9872_v13, %v1830_v11 }
 0x253   : > { %v10031_v19 = vadd.f32 %v9860_v44, %v1822_v32 }
 0x255   : > { %v7095_v18 = vpop.f32.mrb[80].mxu0 }
 0x256   : > { %v1843_v6 = vadd.f32 %v7095_v18, %v9904_v29  ;;  %v1834_v12 = vpop.f32.mrb[81].mxu0  ;;  %v12011_v18 = vld [vmem:[#allocation31_spill] sm:$0xff] }
 0x257   : > { %v1835_v10 = vadd.f32 %v9892_v60, %v1834_v12  ;;  %v7096_v48 = vpop.f32.mrb[82].mxu0  ;;  %v7850_v12 = vld [vmem:[#allocation8 + $0x140] sm:$0xff]  }
 0x258   : > { %v10036_v43 = vadd.f32 %v9894_v28, %v1843_v6  ;;  %v1846_v16 = vadd.f32 %v7096_v48, %v9908_v59  ;;  %v1837_v20 = vpop.f32.mrb[83].mxu0  ;;  %7205 = vmatprep.subr.bf16.mxu1 %v7850_v12 }
 0x259   : > { %v10040_v9 = vadd.f32 %v9880_v22, %v1835_v10  ;;  %v1838_v13 = vadd.f32 %v9896_v58, %v1837_v20  ;;  %v12012_v10 = vld [vmem:[#allocation32_spill] sm:$0xff]  ;;  %7206 = vmatpush3.bf16.msra.mxu1 %v7850_v12 }
 0x25a   : > { %v10044_v44 = vadd.f32 %v9898_v4, %v1846_v16  ;;  %v12004_v4 = vld [vmem:[#allocation24_spill] sm:$0xff] }
 0x25b   : > { %v10047_v29 = vadd.f32 %v9884_v62, %v1838_v13  ;;  %v7848_v62 = vld [vmem:[#allocation8 + $0x100] sm:$0xff]  }
 0x25c   : > { %6653 = vmatprep.subr.bf16.mxu0 %v7848_v62 }
 0x25d   : > { %v7099_v45 = vpop.f32.mrb[84].mxu0  ;;  %6654 = vmatpush3.bf16.msra.mxu0 %v7849_v34 }
 0x25e   : > { %v1859_v60 = vadd.f32 %v7099_v45, %v9928_v0  ;;  %v1850_v3 = vpop.f32.mrb[85].mxu0  ;;  %v12006_v0 = vld [vmem:[#allocation22_spill] sm:$0xff] }
 0x25f   : > { %v1851_v28 = vadd.f32 %v9916_v49, %v1850_v3  ;;  %v7100_v14 = vpop.f32.mrb[86].mxu0 }
 0x260   : > { %v10052_v59 = vadd.f32 %v9918_v25, %v1859_v60  ;;  %v1862_v22 = vadd.f32 %v7100_v14, %v9932_v42  ;;  %v1853_v2 = vpop.f32.mrb[87].mxu0 }
 0x261   : > { %v10056_v58 = vadd.f32 %v9906_v15, %v1851_v28  ;;  %v1854_v24 = vadd.f32 %v12004_v4, %v1853_v2  ;;  %v12014_v2 = vld [vmem:[#allocation42_spill] sm:$0xff] }
 0x262   : > { %v10060_v30 = vadd.f32 %v12005_v52, %v1862_v22  ;;  %v12015_v52 = vld [vmem:[#allocation34_spill] sm:$0xff] }
 0x263   : > { %v10063_v38 = vadd.f32 %v12006_v0, %v1854_v24 }
 0x265   : > { %v7103_v49 = vpop.f32.mrb[88].mxu0 }
 0x266   : > { %v1875_v25 = vadd.f32 %v7103_v49, %v9949_v23  ;;  %v1866_v42 = vpop.f32.mrb[89].mxu0  ;;  %v12013_v23 = vld [vmem:[#allocation28_spill] sm:$0xff] }
 0x267   : > { %v1867_v37 = vadd.f32 %v12007_v7, %v1866_v42  ;;  %v7104_v15 = vpop.f32.mrb[90].mxu0  ;;  %v7853_v42 = vld [vmem:[#allocation8 + $0xc8] sm:$0xff]  }
 0x268   : > { %v10068_v21 = vadd.f32 %v12008_v1, %v1875_v25  ;;  %v1878_v8 = vadd.f32 %v7104_v15, %v12009_v63  ;;  %v1869_v11 = vpop.f32.mrb[91].mxu0  ;;  %v7851_v25 = vld [vmem:[#allocation8 + $0x148] sm:$0xff]  }
 0x269   : > { %v10072_v32 = vadd.f32 %v12010_v50, %v1867_v37  ;;  %v1870_v6 = vadd.f32 %v12011_v18, %v1869_v11  ;;  %7207 = vmatprep.subr.bf16.mxu1 %v7851_v25 }
 0x26a   : > { %v10076_v48 = vadd.f32 %v12012_v10, %v1878_v8  ;;  %7208 = vmatpush3.bf16.msra.mxu1 %v7851_v25 }
 0x26b   : > { %v10079_v16 = vadd.f32 %v12013_v23, %v1870_v6 }
 0x26d   : > { %v7107_v20 = vpop.f32.mrb[92].mxu0  ;;  %v7175_v13 = vpop.f32.mrb[64].mxu1 }
 0x26e   : > { %v1891_v45 = vadd.f32 %v7107_v20, %v9965_v17  ;;  %v1882_v60 = vpop.f32.mrb[93].mxu0  ;;  %v2800_v3 = vpop.f32.mrb[65].mxu1  ;;  %v7852_v17 = vld [vmem:[#allocation8 + $0x108] sm:$0xff]  }
 0x26f   : > { %v1883_v28 = vadd.f32 %v9957_v61, %v1882_v60  ;;  %v7108_v14 = vpop.f32.mrb[94].mxu0  ;;  %v7176_v22 = vpop.f32.mrb[66].mxu1  ;;  %v12016_v61 = vld [vmem:[#allocation41_spill] sm:$0xff]  ;;  %6655 = vmatprep.subr.bf16.mxu0 %v7852_v17 }
 0x270   : > { %v10084_v4 = vadd.f32 %v12014_v2, %v1891_v45  ;;  %v1894_v24 = vadd.f32 %v7108_v14, %v9967_v53  ;;  %v1885_v62 = vpop.f32.mrb[95].mxu0  ;;  %v2803_v34 = vpop.f32.mrb[67].mxu1  ;;  %6656 = vmatpush3.bf16.msra.mxu0 %v7853_v42 }
 0x271   : > { %v10088_v0 = vadd.f32 %v12015_v52, %v1883_v28  ;;  %v1886_v49 = vadd.f32 %v9961_v5, %v1885_v62 }
 0x272   : > { %v10092_v7 = vadd.f32 %v9963_v35, %v1894_v24 }
 0x273   : > { %v10095_v37 = vadd.f32 %v12016_v61, %v1886_v49 }
 0x275   : > { %v6533_v53 = vpop.f32.mrb[96].mxu0  ;;  %v7179_v15 = vpop.f32.mrb[68].mxu1 }
 0x276   : > { %v6534_v1 = vpop.f32.mrb[97].mxu0  ;;  %v2816_v63 = vpop.f32.mrb[69].mxu1 }
 0x277   : > { %v6535_v8 = vadd.f32 %v6534_v1, %v6533_v53  ;;  %v6536_v11 = vpop.f32.mrb[98].mxu0  ;;  %v7180_v5 = vpop.f32.mrb[70].mxu1 }
 0x278   : > { %v6537_v50 = vpop.f32.mrb[99].mxu0  ;;  %v2819_v18 = vpop.f32.mrb[71].mxu1 }
 0x279   : > { %v7355_v6 = vadd.f32 %v6535_v8, %v9976_v31  ;;  %v6538_v35 = vadd.f32 %v6537_v50, %v6536_v11 }
 0x27b   : > { %v10098_v12 = vadd.f32 %v7355_v6, %v2800_v3  ;;  %v7363_v10 = vadd.f32 %v6538_v35, %v9983_v54 }
 0x27d   : > { %12017 = vst [vmem:[#allocation45_spill] sm:$0xff] %v10098_v12  ;;  %v10101_v23 = vadd.f32 %v7363_v10, %v2803_v34  ;;  %v6539_v20 = vpop.f32.mrb[100].mxu0  ;;  %v10103_v45 = vpop.f32.mrb[72].mxu1 }
 0x27e   : > { %v6540_v60 = vpop.f32.mrb[101].mxu0  ;;  %v10105_v28 = vpop.f32.mrb[73].mxu1 }
 0x27f   : > { %12018 = vst [vmem:[#allocation43_spill] sm:$0xff] %v10101_v23  ;;  %v6541_v14 = vadd.f32 %v6540_v60, %v6539_v20  ;;  %v6542_v2 = vpop.f32.mrb[102].mxu0  ;;  %v10107_v24 = vpop.f32.mrb[74].mxu1 }
 0x280   : > { %v6543_v62 = vpop.f32.mrb[103].mxu0  ;;  %v10109_v52 = vpop.f32.mrb[75].mxu1 }
 0x281   : > { %v7351_v31 = vadd.f32 %v6541_v14, %v9972_v39  ;;  %v6544_v3 = vadd.f32 %v6543_v62, %v6542_v2 }
 0x283   : > { %v10112_v49 = vadd.f32 %v7351_v31, %v7175_v13  ;;  %v7359_v54 = vadd.f32 %v6544_v3, %v9980_v47 }
 0x285   : > { %12019 = vst [vmem:[#allocation46_spill] sm:$0xff] %v10112_v49  ;;  %v10115_v34 = vadd.f32 %v7359_v54, %v7176_v22  ;;  %v6545_v25 = vpop.f32.mrb[104].mxu0  ;;  %v10117_v17 = vpop.f32.mrb[76].mxu1  ;;  %v7854_v54 = vld [vmem:[#allocation8 + $0x150] sm:$0xff]  }
 0x286   : > { %v6546_v42 = vpop.f32.mrb[105].mxu0  ;;  %v10119_v61 = vpop.f32.mrb[77].mxu1  ;;  %7209 = vmatprep.subr.bf16.mxu1 %v7854_v54 }
 0x287   : > { %12020 = vst [vmem:[#allocation16_spill] sm:$0xff] %v10115_v34  ;;  %v6547_v53 = vadd.f32 %v6546_v42, %v6545_v25  ;;  %v6548_v1 = vpop.f32.mrb[106].mxu0  ;;  %v10121_v8 = vpop.f32.mrb[78].mxu1  ;;  %v7856_v42 = vld [vmem:[#allocation8 + $0x110] sm:$0xff]   ;;  %7210 = vmatpush3.bf16.msra.mxu1 %v7854_v54 }
 0x288   : > { %v6549_v11 = vpop.f32.mrb[107].mxu0  ;;  %v10123_v50 = vpop.f32.mrb[79].mxu1  ;;  %6657 = vmatprep.subr.bf16.mxu0 %v7856_v42  ;;  %v2999_v42 = vmul.f32 %v10115_v34, %v10115_v34 }
 0x289   : > { %v7371_v39 = vadd.f32 %v6547_v53, %v9992_v36  ;;  %v6550_v13 = vadd.f32 %v6549_v11, %v6548_v1  ;;  %v7857_v53 = vld [vmem:[#allocation8 + $0xd0] sm:$0xff]   ;;  %v2996_v1 = vmul.f32 %v10098_v12, %v10098_v12  ;;  %v2959_v11 = vadd.f32 %v10101_v23, %v10098_v12 }
 0x28a   : > { %6658 = vmatpush3.bf16.msra.mxu0 %v7857_v53 }
 0x28b   : > { %v10126_v6 = vadd.f32 %v7371_v39, %v2816_v63  ;;  %v7379_v47 = vadd.f32 %v6550_v13, %v9999_v27  ;;  %v2997_v27 = vmul.f32 %v10101_v23, %v10101_v23 }
 0x28d   : > { %12021 = vst [vmem:[#allocation47_spill] sm:$0xff] %v10126_v6  ;;  %v10129_v22 = vadd.f32 %v7379_v47, %v2819_v18  ;;  %v6551_v35 = vpop.f32.mrb[108].mxu0  ;;  %v10131_v10 = vpop.f32.mrb[80].mxu1 }
 0x28e   : > { %v6552_v20 = vpop.f32.mrb[109].mxu0  ;;  %v10133_v60 = vpop.f32.mrb[81].mxu1 }
 0x28f   : > { %12022 = vst [vmem:[#allocation24_spill] sm:$0xff] %v10129_v22  ;;  %v6553_v14 = vadd.f32 %v6552_v20, %v6551_v35  ;;  %v6554_v2 = vpop.f32.mrb[110].mxu0  ;;  %v10135_v62 = vpop.f32.mrb[82].mxu1  ;;  %v3028_v35 = vadd.f32 %v2997_v27, %v2996_v1  ;;  %v2960_v20 = vadd.f32 %v10112_v49, %v2959_v11  ;;  %v3000_v1 = vmul.f32 %v10126_v6, %v10126_v6 }
 0x290   : > { %v6555_v31 = vpop.f32.mrb[111].mxu0  ;;  %v10137_v3 = vpop.f32.mrb[83].mxu1 }
 0x291   : > { %v7367_v36 = vadd.f32 %v6553_v14, %v9988_v57  ;;  %v6556_v63 = vadd.f32 %v6555_v31, %v6554_v2  ;;  %v2998_v57 = vmul.f32 %v10112_v49, %v10112_v49  ;;  %v2961_v27 = vadd.f32 %v10115_v34, %v2960_v20 }
 0x293   : > { %v10142_v18 = vadd.f32 %v7367_v36, %v7179_v15  ;;  %v7375_v25 = vadd.f32 %v6556_v63, %v9996_v40  ;;  %v7860_v36 = vld [vmem:[#allocation8 + $0x118] sm:$0xff]   ;;  %v3029_v23 = vadd.f32 %v3028_v35, %v2998_v57  ;;  %v7862_v57 = vld [vmem:[#allocation8 + $0x120] sm:$0xff]  }
 0x294   : > { %6659 = vmatprep.subr.bf16.mxu0 %v7860_v36  ;;  %v7864_v35 = vld [vmem:[#allocation8 + $0xe0] sm:$0xff]  }
 0x295   : > { %v10151_v39 = vadd.f32 %v7375_v25, %v7180_v5  ;;  %v6557_v13 = vpop.f32.mrb[112].mxu0  ;;  %v10153_v15 = vpop.f32.mrb[84].mxu1  ;;  %v7855_v5 = vld [vmem:[#allocation8 + $0x158] sm:$0xff]   ;;  %v3030_v49 = vadd.f32 %v3029_v23, %v2999_v42 }
 0x296   : > { %v6558_v40 = vpop.f32.mrb[113].mxu0  ;;  %v10155_v47 = vpop.f32.mrb[85].mxu1  ;;  %v7861_v25 = vld [vmem:[#allocation8 + $0xd8] sm:$0xff]   ;;  %7211 = vmatprep.subr.bf16.mxu1 %v7855_v5 }
 0x297   : > { %12023 = vst [vmem:[#allocation26_spill] sm:$0xff] %v10151_v39  ;;  %v6559_v14 = vadd.f32 %v6558_v40, %v6557_v13  ;;  %v6560_v2 = vpop.f32.mrb[114].mxu0  ;;  %v10158_v31 = vpop.f32.mrb[86].mxu1  ;;  %6660 = vmatpush3.bf16.msra.mxu0 %v7861_v25  ;;  %7212 = vmatpush3.bf16.msra.mxu1 %v7855_v5  ;;  %v7858_v40 = vld [vmem:[#allocation8 + $0x160] sm:$0xff]  }
 0x298   : > { %v6561_v63 = vpop.f32.mrb[115].mxu0  ;;  %v10160_v54 = vpop.f32.mrb[87].mxu1  ;;  %6661 = vmatprep.subr.bf16.mxu0 %v7862_v57  ;;  %7213 = vmatprep.subr.bf16.mxu1 %v7858_v40  ;;  %v3002_v57 = vmul.f32 %v10142_v18, %v10142_v18 }
 0x299   : > { %v7387_v12 = vadd.f32 %v6559_v14, %v10008_v33  ;;  %v6562_v53 = vadd.f32 %v6561_v63, %v6560_v2  ;;  %v2962_v33 = vadd.f32 %v10126_v6, %v2961_v27  ;;  %v7866_v27 = vld [vmem:[#allocation8 + $0xe8] sm:$0xff]   ;;  %v7867_v6 = vld [vmem:[#allocation8 + $0x130] sm:$0xff]  }
 0x29b   : > { %v10169_v11 = vadd.f32 %v7387_v12, %v10105_v28  ;;  %v7395_v13 = vadd.f32 %v6562_v53, %v10015_v46  ;;  %6662 = vmatpush3.bf16.msra.mxu0 %v7864_v35  ;;  %v3031_v46 = vadd.f32 %v3030_v49, %v3000_v1  ;;  %v3001_v12 = vmul.f32 %v10129_v22, %v10129_v22  ;;  %v7859_v53 = vld [vmem:[#allocation8 + $0x168] sm:$0xff]  }
 0x29c   : > { %7214 = vmatpush3.bf16.msra.mxu1 %v7858_v40 }
 0x29d   : > { %v10174_v14 = vadd.f32 %v7395_v13, %v10109_v52  ;;  %v6563_v2 = vpop.f32.mrb[116].mxu0  ;;  %v10176_v20 = vpop.f32.mrb[88].mxu1  ;;  %v7865_v52 = vld [vmem:[#allocation8 + $0x128] sm:$0xff]   ;;  %v2963_v13 = vadd.f32 %v10129_v22, %v2962_v33  ;;  %7215 = vmatprep.subr.bf16.mxu1 %v7859_v53  ;;  %v3032_v35 = vadd.f32 %v3031_v46, %v3001_v12  ;;  %v7863_v33 = vld [vmem:[#allocation8 + $0x170] sm:$0xff]  }
 0x29e   : > { %v6564_v36 = vpop.f32.mrb[117].mxu0  ;;  %v10178_v63 = vpop.f32.mrb[89].mxu1  ;;  %6663 = vmatprep.subr.bf16.mxu0 %v7865_v52  ;;  %v7869_v22 = vld [vmem:[#allocation8 + $0xf0] sm:$0xff]   ;;  %v7870_v52 = vld [vmem:[#allocation8 + $0x138] sm:$0xff]  }
 0x29f   : > { %v6565_v28 = vadd.f32 %v6564_v36, %v6563_v2  ;;  %v6566_v23 = vpop.f32.mrb[118].mxu0  ;;  %v10182_v5 = vpop.f32.mrb[90].mxu1  ;;  %6664 = vmatpush3.bf16.msra.mxu0 %v7866_v27  ;;  %v2964_v40 = vadd.f32 %v10142_v18, %v2963_v13  ;;  %v3033_v34 = vadd.f32 %v3032_v35, %v3002_v57  ;;  %v3004_v27 = vmul.f32 %v10169_v11, %v10169_v11 }
 0x2a0   : > { %v6567_v25 = vpop.f32.mrb[119].mxu0  ;;  %v10184_v42 = vpop.f32.mrb[91].mxu1  ;;  %7216 = vmatpush3.bf16.msra.mxu1 %v7859_v53  ;;  %6665 = vmatprep.subr.bf16.mxu0 %v7867_v6 }
 0x2a1   : > { %v7383_v49 = vadd.f32 %v6565_v28, %v10004_v51  ;;  %v6568_v1 = vadd.f32 %v6567_v25, %v6566_v23  ;;  %v3003_v51 = vmul.f32 %v10151_v39, %v10151_v39  ;;  %7217 = vmatprep.subr.bf16.mxu1 %v7863_v33  ;;  %v7871_v25 = vld [vmem:[#allocation8 + $0xf8] sm:$0xff]   ;;  %v2965_v53 = vadd.f32 %v10151_v39, %v2964_v40 }
 0x2a3   : > { %v10192_v2 = vadd.f32 %v7383_v49, %v10103_v45  ;;  %v7391_v36 = vadd.f32 %v6568_v1, %v10012_v26  ;;  %v7868_v26 = vld [vmem:[#allocation8 + $0x178] sm:$0xff]   ;;  %6666 = vmatpush3.bf16.msra.mxu0 %v7869_v22  ;;  %v3034_v1 = vadd.f32 %v3033_v34, %v3003_v51  ;;  %v2966_v22 = vadd.f32 %v10169_v11, %v2965_v53 }
 0x2a4   : > { %7218 = vmatpush3.bf16.msra.mxu1 %v7863_v33  ;;  %6667 = vmatprep.subr.bf16.mxu0 %v7870_v52 }
 0x2a5   : > { %v10198_v28 = vadd.f32 %v7391_v36, %v10107_v24  ;;  %v6569_v23 = vpop.f32.mrb[120].mxu0  ;;  %v10200_v46 = vpop.f32.mrb[92].mxu1  ;;  %7219 = vmatprep.subr.bf16.mxu1 %v7868_v26  ;;  %v3035_v40 = vadd.f32 %v3034_v1, %v3004_v27  ;;  %v2967_v39 = vadd.f32 %v10174_v14, %v2966_v22  ;;  %v3006_v34 = vmul.f32 %v10192_v2, %v10192_v2  ;;  %v10229_v1 = vld [vmem:[#allocation8 + $0x80] sm:$0xff]  }
 0x2a6   : > { %v6570_v12 = vpop.f32.mrb[121].mxu0  ;;  %v10202_v45 = vpop.f32.mrb[93].mxu1 }
 0x2a7   : > { %v6571_v13 = vadd.f32 %v6570_v12, %v6569_v23  ;;  %v6572_v24 = vpop.f32.mrb[122].mxu0  ;;  %v10207_v57 = vpop.f32.mrb[94].mxu1  ;;  %6668 = vmatpush3.bf16.msra.mxu0 %v7871_v25  ;;  %v3005_v23 = vmul.f32 %v10174_v14, %v10174_v14  ;;  %v2968_v53 = vadd.f32 %v10192_v2, %v2967_v39 }
 0x2a8   : > { %v6573_v49 = vpop.f32.mrb[123].mxu0  ;;  %v10209_v6 = vpop.f32.mrb[95].mxu1  ;;  %7220 = vmatpush3.bf16.msra.mxu1 %v7868_v26 }
 0x2a9   : > { %v7403_v35 = vadd.f32 %v6571_v13, %v10024_v41  ;;  %v6574_v36 = vadd.f32 %v6573_v49, %v6572_v24  ;;  %v3036_v25 = vadd.f32 %v3035_v40, %v3005_v23  ;;  %7253 = vmatprep.subr.bf16.mxu1 %v10229_v1 }
 0x2ab   : > { %v10216_v12 = vadd.f32 %v7403_v35, %v10119_v61  ;;  %v7411_v33 = vadd.f32 %v6574_v36, %v10031_v19  ;;  %v3037_v24 = vadd.f32 %v3036_v25, %v3006_v34  ;;  %v3007_v19 = vmul.f32 %v10198_v28, %v10198_v28 }
 0x2ad   : > { %v10223_v51 = vadd.f32 %v7411_v33, %v10123_v50  ;;  %v6575_v41 = vpop.f32.mrb[124].mxu0  ;;  %v2969_v50 = vadd.f32 %v10198_v28, %v2968_v53  ;;  %v3008_v22 = vmul.f32 %v10216_v12, %v10216_v12  ;;  %v3038_v36 = vadd.f32 %v3037_v24, %v3007_v19 }
 0x2ae   : > { %v6576_v52 = vpop.f32.mrb[125].mxu0 }
 0x2af   : > { %v6577_v27 = vadd.f32 %v6576_v52, %v6575_v41  ;;  %v6578_v13 = vpop.f32.mrb[126].mxu0  ;;  %v2970_v40 = vadd.f32 %v10216_v12, %v2969_v50  ;;  %v3039_v34 = vadd.f32 %v3038_v36, %v3008_v22  ;;  %v3009_v41 = vmul.f32 %v10223_v51, %v10223_v51 }
 0x2b0   : > { %v6579_v61 = vpop.f32.mrb[127].mxu0 }
 0x2b1   : > { %v7399_v26 = vadd.f32 %v6577_v27, %v10020_v55  ;;  %v6580_v49 = vadd.f32 %v6579_v61, %v6578_v13  ;;  %v2971_v53 = vadd.f32 %v10223_v51, %v2970_v40  ;;  %v3040_v61 = vadd.f32 %v3039_v34, %v3009_v41 }
 0x2b3   : > { %v10235_v35 = vadd.f32 %v7399_v26, %v10117_v17  ;;  %v7407_v39 = vadd.f32 %v6580_v49, %v10028_v56 }
 0x2b5   : > { %v10241_v55 = vadd.f32 %v7407_v39, %v10121_v8  ;;  %v6581_v23 = vpop.f32.mrb[128].mxu0  ;;  %v3010_v56 = vmul.f32 %v10235_v35, %v10235_v35  ;;  %v2972_v8 = vadd.f32 %v10235_v35, %v2971_v53 }
 0x2b6   : > { %v6582_v33 = vpop.f32.mrb[129].mxu0 }
 0x2b7   : > { %v6583_v52 = vadd.f32 %v6582_v33, %v6581_v23  ;;  %v6584_v25 = vpop.f32.mrb[130].mxu0  ;;  %v3041_v26 = vadd.f32 %v3040_v61, %v3010_v56  ;;  %v3011_v49 = vmul.f32 %v10241_v55, %v10241_v55 }
 0x2b8   : > { %v6585_v17 = vpop.f32.mrb[131].mxu0 }
 0x2b9   : > { %v7419_v27 = vadd.f32 %v6583_v52, %v10040_v9  ;;  %v6586_v13 = vadd.f32 %v6585_v17, %v6584_v25  ;;  %v2973_v9 = vadd.f32 %v10241_v55, %v2972_v8  ;;  %v3042_v33 = vadd.f32 %v3041_v26, %v3011_v49 }
 0x2bb   : > { %v10251_v24 = vadd.f32 %v7419_v27, %v10133_v60  ;;  %v7427_v19 = vadd.f32 %v6586_v13, %v10047_v29 }
 0x2bd   : > { %v10257_v50 = vadd.f32 %v7427_v19, %v10137_v3  ;;  %v6587_v22 = vpop.f32.mrb[132].mxu0  ;;  %v3012_v36 = vmul.f32 %v10251_v24, %v10251_v24  ;;  %v2974_v29 = vadd.f32 %v10251_v24, %v2973_v9 }
 0x2be   : > { %v6588_v39 = vpop.f32.mrb[133].mxu0 }
 0x2bf   : > { %v6589_v40 = vadd.f32 %v6588_v39, %v6587_v22  ;;  %v6590_v23 = vpop.f32.mrb[134].mxu0  ;;  %v3043_v52 = vadd.f32 %v3042_v33, %v3012_v36  ;;  %v3013_v3 = vmul.f32 %v10257_v50, %v10257_v50  ;;  %v2975_v53 = vadd.f32 %v10257_v50, %v2974_v29 }
 0x2c0   : > { %v6591_v60 = vpop.f32.mrb[135].mxu0 }
 0x2c1   : > { %v7415_v34 = vadd.f32 %v6589_v40, %v10036_v43  ;;  %v6592_v41 = vadd.f32 %v6591_v60, %v6590_v23  ;;  %v3044_v61 = vadd.f32 %v3043_v52, %v3013_v3 }
 0x2c3   : > { %v10267_v25 = vadd.f32 %v7415_v34, %v10131_v10  ;;  %v7423_v17 = vadd.f32 %v6592_v41, %v10044_v44 }
 0x2c5   : > { %v3014_v56 = vmul.f32 %v10267_v25, %v10267_v25  ;;  %v10274_v27 = vadd.f32 %v7423_v17, %v10135_v62  ;;  %v6593_v13 = vpop.f32.mrb[136].mxu0  ;;  %v2976_v8 = vadd.f32 %v10267_v25, %v2975_v53 }
 0x2c6   : > { %v6594_v43 = vpop.f32.mrb[137].mxu0 }
 0x2c7   : > { %v6595_v19 = vadd.f32 %v6594_v43, %v6593_v13  ;;  %v6596_v26 = vpop.f32.mrb[138].mxu0  ;;  %v3045_v10 = vadd.f32 %v3044_v61, %v3014_v56  ;;  %v3015_v44 = vmul.f32 %v10274_v27, %v10274_v27  ;;  %v2977_v9 = vadd.f32 %v10274_v27, %v2976_v8 }
 0x2c8   : > { %v6597_v49 = vpop.f32.mrb[139].mxu0 }
 0x2c9   : > { %v7435_v22 = vadd.f32 %v6595_v19, %v10056_v58  ;;  %v6598_v39 = vadd.f32 %v6597_v49, %v6596_v26  ;;  %v3046_v40 = vadd.f32 %v3045_v10, %v3015_v44 }
 0x2cb   : > { %v10282_v62 = vadd.f32 %v7435_v22, %v10155_v47  ;;  %v7443_v36 = vadd.f32 %v6598_v39, %v10063_v38 }
 0x2cd   : > { %v2978_v23 = vadd.f32 %v10282_v62, %v2977_v9  ;;  %v3016_v60 = vmul.f32 %v10282_v62, %v10282_v62  ;;  %v10289_v33 = vadd.f32 %v7443_v36, %v10160_v54  ;;  %v6599_v29 = vpop.f32.mrb[140].mxu0 }
 0x2ce   : > { %v6600_v34 = vpop.f32.mrb[141].mxu0 }
 0x2cf   : > { %v3047_v58 = vadd.f32 %v3046_v40, %v3016_v60  ;;  %v2979_v41 = vadd.f32 %v10289_v33, %v2978_v23  ;;  %v3017_v47 = vmul.f32 %v10289_v33, %v10289_v33  ;;  %v6601_v52 = vadd.f32 %v6600_v34, %v6599_v29  ;;  %v6602_v3 = vpop.f32.mrb[142].mxu0 }
 0x2d0   : > { %v6603_v38 = vpop.f32.mrb[143].mxu0 }
 0x2d1   : > { %v3048_v17 = vadd.f32 %v3047_v58, %v3017_v47  ;;  %v7431_v53 = vadd.f32 %v6601_v52, %v10052_v59  ;;  %v6604_v56 = vadd.f32 %v6603_v38, %v6602_v3 }
 0x2d3   : > { %v10296_v13 = vadd.f32 %v7431_v53, %v10153_v15  ;;  %v7439_v54 = vadd.f32 %v6604_v56, %v10060_v30 }
 0x2d5   : > { %v2980_v43 = vadd.f32 %v10296_v13, %v2979_v41  ;;  %v3018_v61 = vmul.f32 %v10296_v13, %v10296_v13  ;;  %v10303_v8 = vadd.f32 %v7439_v54, %v10158_v31  ;;  %v6605_v19 = vpop.f32.mrb[144].mxu0 }
 0x2d6   : > { %v6606_v26 = vpop.f32.mrb[145].mxu0 }
 0x2d7   : > { %v3049_v49 = vadd.f32 %v3048_v17, %v3018_v61  ;;  %v2981_v10 = vadd.f32 %v10303_v8, %v2980_v43  ;;  %v3019_v59 = vmul.f32 %v10303_v8, %v10303_v8  ;;  %v6607_v15 = vadd.f32 %v6606_v26, %v6605_v19  ;;  %v6608_v44 = vpop.f32.mrb[146].mxu0 }
 0x2d8   : > { %v6609_v22 = vpop.f32.mrb[147].mxu0 }
 0x2d9   : > { %v3050_v30 = vadd.f32 %v3049_v49, %v3019_v59  ;;  %v7451_v39 = vadd.f32 %v6607_v15, %v10072_v32  ;;  %v6610_v9 = vadd.f32 %v6609_v22, %v6608_v44  ;;  %v7880_v44 = vld [vmem:[#allocation8 + $0x40] sm:$0xff]  }
 0x2da   : > { %6789 = vmatprep.subr.bf16.mxu0 %v7880_v44 }
 0x2db   : > { %v10310_v36 = vadd.f32 %v7451_v39, %v10178_v63  ;;  %v7459_v31 = vadd.f32 %v6610_v9, %v10079_v16 }
 0x2dd   : > { %v2982_v40 = vadd.f32 %v10310_v36, %v2981_v10  ;;  %v3020_v23 = vmul.f32 %v10310_v36, %v10310_v36  ;;  %v10317_v60 = vadd.f32 %v7459_v31, %v10184_v42  ;;  %v6611_v29 = vpop.f32.mrb[148].mxu0 }
 0x2de   : > { %v6612_v34 = vpop.f32.mrb[149].mxu0 }
 0x2df   : > { %v3051_v58 = vadd.f32 %v3050_v30, %v3020_v23  ;;  %v2983_v41 = vadd.f32 %v10317_v60, %v2982_v40  ;;  %v3021_v32 = vmul.f32 %v10317_v60, %v10317_v60  ;;  %v6613_v63 = vadd.f32 %v6612_v34, %v6611_v29  ;;  %v6614_v47 = vpop.f32.mrb[150].mxu0 }
 0x2e0   : > { %v6615_v52 = vpop.f32.mrb[151].mxu0 }
 0x2e1   : > { %v3052_v16 = vadd.f32 %v3051_v58, %v3021_v32  ;;  %v7447_v3 = vadd.f32 %v6613_v63, %v10068_v21  ;;  %v6616_v38 = vadd.f32 %v6615_v52, %v6614_v47 }
 0x2e3   : > { %v10324_v17 = vadd.f32 %v7447_v3, %v10176_v20  ;;  %v7455_v42 = vadd.f32 %v6616_v38, %v10076_v48 }
 0x2e5   : > { %v2984_v53 = vadd.f32 %v10324_v17, %v2983_v41  ;;  %v3022_v56 = vmul.f32 %v10324_v17, %v10324_v17  ;;  %v10331_v54 = vadd.f32 %v7455_v42, %v10182_v5  ;;  %v6617_v43 = vpop.f32.mrb[152].mxu0 }
 0x2e6   : > { %v6618_v61 = vpop.f32.mrb[153].mxu0 }
 0x2e7   : > { %v3053_v19 = vadd.f32 %v3052_v16, %v3022_v56  ;;  %v2985_v26 = vadd.f32 %v10331_v54, %v2984_v53  ;;  %v3023_v21 = vmul.f32 %v10331_v54, %v10331_v54  ;;  %v6619_v20 = vadd.f32 %v6618_v61, %v6617_v43  ;;  %v6620_v49 = vpop.f32.mrb[154].mxu0 }
 0x2e8   : > { %v6621_v10 = vpop.f32.mrb[155].mxu0 }
 0x2e9   : > { %v3054_v48 = vadd.f32 %v3053_v19, %v3023_v21  ;;  %v7467_v59 = vadd.f32 %v6619_v20, %v10088_v0  ;;  %v6622_v15 = vadd.f32 %v6621_v10, %v6620_v49 }
 0x2eb   : > { %v10338_v22 = vadd.f32 %v7467_v59, %v10202_v45  ;;  %v7475_v5 = vadd.f32 %v6622_v15, %v10095_v37 }
 0x2ed   : > { %v2986_v30 = vadd.f32 %v10338_v22, %v2985_v26  ;;  %v3024_v39 = vmul.f32 %v10338_v22, %v10338_v22  ;;  %v10345_v9 = vadd.f32 %v7475_v5, %v10209_v6  ;;  %v6623_v31 = vpop.f32.mrb[156].mxu0 }
 0x2ee   : > { %v6624_v40 = vpop.f32.mrb[157].mxu0 }
 0x2ef   : > { %v3055_v23 = vadd.f32 %v3054_v48, %v3024_v39  ;;  %v2987_v0 = vadd.f32 %v10345_v9, %v2986_v30  ;;  %v3025_v45 = vmul.f32 %v10345_v9, %v10345_v9  ;;  %v6625_v29 = vadd.f32 %v6624_v40, %v6623_v31  ;;  %v6626_v34 = vpop.f32.mrb[158].mxu0 }
 0x2f0   : > { %v6627_v37 = vpop.f32.mrb[159].mxu0 }
 0x2f1   : > { %v3056_v58 = vadd.f32 %v3055_v23, %v3025_v45  ;;  %v7463_v41 = vadd.f32 %v6625_v29, %v10084_v4  ;;  %v6628_v32 = vadd.f32 %v6627_v37, %v6626_v34 }
 0x2f3   : > { %v10352_v63 = vadd.f32 %v7463_v41, %v10200_v46  ;;  %v7471_v6 = vadd.f32 %v6628_v32, %v10092_v7 }
 0x2f5   : > { %v2988_v47 = vadd.f32 %v10352_v63, %v2987_v0  ;;  %v3026_v52 = vmul.f32 %v10352_v63, %v10352_v63  ;;  %v7472_v16 = vadd.f32 %v7471_v6, %v10207_v57  ;;  %v12030_v6 = vld [vmem:[#allocation26_spill] sm:$0xff] }
 0x2f7   : > { %v3057_v3 = vadd.f32 %v3056_v58, %v3026_v52  ;;  %v2989_v38 = vadd.f32 %v7472_v16, %v2988_v47  ;;  %v3027_v42 = vmul.f32 %v7472_v16, %v7472_v16 }
 0x2f9   : > { %v2990_v53 = vrot.slane %v2989_v38, 4  ;;  %v3058_v56 = vadd.f32 %v3057_v3, %v3027_v42 }
 0x2fb   : > { %v2991_v43 = vadd.f32 %v2990_v53, %v2989_v38  ;;  %v3059_v4 = vrot.slane %v3058_v56, 4 }
 0x2fd   : > { %v2992_v61 = vrot.slane %v2991_v43, 2  ;;  %v3060_v19 = vadd.f32 %v3059_v4, %v3058_v56 }
 0x2ff   : > { %v2993_v46 = vadd.f32 %v2992_v61, %v2991_v43  ;;  %v3061_v26 = vrot.slane %v3060_v19, 2 }
 0x301   : > { %v2994_v21 = vrot.slane %v2993_v46, 1  ;;  %v3062_v7 = vadd.f32 %v3061_v26, %v3060_v19 }
 0x303   : > { %v2995_v20 = vadd.f32 %v2994_v21, %v2993_v46  ;;  %v3063_v49 = vrot.slane %v3062_v7, 1 }
 0x305   : > { %v3064_v10 = vadd.f32 %v3063_v49, %v3062_v7  ;;  %v10359_v48 = vmul.f32 0.00390625, %v2995_v20 }
 0x307   : > { %v3066_v59 = vmul.f32 0.00390625, %v3064_v10  ;;  %v3067_v57 = vmul.f32 %v10359_v48, %v10359_v48  ;;  %v3100_v15 = vsub.f32 %v7472_v16, %v10359_v48  ;;  %v3089_v30 = vsub.f32 %v10282_v62, %v10359_v48 }
 0x308   : > { %v3090_v39 = vsub.f32 %v10289_v33, %v10359_v48  ;;  %v3091_v31 = vsub.f32 %v10296_v13, %v10359_v48  ;;  %v3092_v40 = vsub.f32 %v10303_v8, %v10359_v48  ;;  %v3093_v23 = vsub.f32 %v10310_v36, %v10359_v48  ;;  %v12024_v36 = vld [vmem:[#allocation45_spill] sm:$0xff] }
 0x309   : > { %v3068_v44 = vsub.f32 %v3066_v59, %v3067_v57  ;;  %v3094_v0 = vsub.f32 %v10317_v60, %v10359_v48  ;;  %v3095_v45 = vsub.f32 %v10324_v17, %v10359_v48  ;;  %v3096_v62 = vsub.f32 %v10331_v54, %v10359_v48  ;;  %v12025_v60 = vld [vmem:[#allocation43_spill] sm:$0xff]  ;;  %v12026_v17 = vld [vmem:[#allocation46_spill] sm:$0xff]  ;;  %v12027_v54 = vld [vmem:[#allocation16_spill] sm:$0xff] }
 0x30a   : > { %v3097_v33 = vsub.f32 %v10338_v22, %v10359_v48  ;;  %v3098_v13 = vsub.f32 %v10345_v9, %v10359_v48  ;;  %v3099_v8 = vsub.f32 %v10352_v63, %v10359_v48  ;;  %v3069_v29 = vsub.f32 %v12024_v36, %v10359_v48  ;;  %v12028_v22 = vld [vmem:[#allocation47_spill] sm:$0xff]  ;;  %v12029_v9 = vld [vmem:[#allocation24_spill] sm:$0xff] }
 0x30b   : > { %v3101_v5 = vadd.f32 1e-05, %v3068_v44  ;;  %v3070_v34 = vsub.f32 %v12025_v60, %v10359_v48  ;;  %v3071_v37 = vsub.f32 %v12026_v17, %v10359_v48  ;;  %v3072_v58 = vsub.f32 %v12027_v54, %v10359_v48 }
 0x30c   : > { %v3073_v41 = vsub.f32 %v12028_v22, %v10359_v48  ;;  %v3074_v32 = vsub.f32 %v12029_v9, %v10359_v48  ;;  %v3075_v63 = vsub.f32 %v10142_v18, %v10359_v48  ;;  %v3076_v47 = vsub.f32 %v12030_v6, %v10359_v48 }
 0x30d   : > { %7922 = vrsqrt.f32 %v3101_v5  ;;  %v3077_v52 = vsub.f32 %v10169_v11, %v10359_v48  ;;  %v3078_v16 = vsub.f32 %v10174_v14, %v10359_v48  ;;  %v3079_v3 = vsub.f32 %v10192_v2, %v10359_v48 }
 0x30e   : > { %v3080_v38 = vsub.f32 %v10198_v28, %v10359_v48  ;;  %v3081_v42 = vsub.f32 %v10216_v12, %v10359_v48  ;;  %v3082_v18 = vsub.f32 %v10223_v51, %v10359_v48  ;;  %v3083_v53 = vsub.f32 %v10235_v35, %v10359_v48 }
 0x30f   : > { %v3084_v11 = vsub.f32 %v10241_v55, %v10359_v48  ;;  %v3085_v14 = vsub.f32 %v10251_v24, %v10359_v48  ;;  %v3086_v2 = vsub.f32 %v10257_v50, %v10359_v48  ;;  %v3087_v28 = vsub.f32 %v10267_v25, %v10359_v48 }
 0x310   : > { %v3088_v12 = vsub.f32 %v10274_v27, %v10359_v48 }
 0x317   : > { %v10418_v56 = vpop.eup %7922 }
 0x318   : > { %v3134_v51 = vmul.f32 %v10418_v56, %v3100_v15  ;;  %v3105_v35 = vmul.f32 %v10418_v56, %v3071_v37  ;;  %v3107_v55 = vmul.f32 %v10418_v56, %v3073_v41  ;;  %v3108_v43 = vmul.f32 %v10418_v56, %v3074_v32 }
 0x319   : > { %v3109_v4 = vmul.f32 %v10418_v56, %v3075_v63  ;;  %v3110_v24 = vmul.f32 %v10418_v56, %v3076_v47  ;;  %v3111_v50 = vmul.f32 %v10418_v56, %v3077_v52  ;;  %v3112_v61 = vmul.f32 %v10418_v56, %v3078_v16 }
 0x31a   : > { %v10436_v25 = vmax.f32 %v3134_v51, 0.0  ;;  %v3113_v27 = vmul.f32 %v10418_v56, %v3079_v3  ;;  %v3114_v19 = vmul.f32 %v10418_v56, %v3080_v38  ;;  %v3115_v46 = vmul.f32 %v10418_v56, %v3081_v42 }
 0x31b   : > { %v3116_v26 = vmul.f32 %v10418_v56, %v3082_v18  ;;  %v3117_v21 = vmul.f32 %v10418_v56, %v3083_v53  ;;  %v3118_v7 = vmul.f32 %v10418_v56, %v3084_v11  ;;  %v3119_v20 = vmul.f32 %v10418_v56, %v3085_v14 }
 0x31c   : > { %v11664_v49 = vrot.slane %v10436_v25, 7  ;;  %v3120_v10 = vmul.f32 %v10418_v56, %v3086_v2  ;;  %v3121_v59 = vmul.f32 %v10418_v56, %v3087_v28  ;;  %v3122_v57 = vmul.f32 %v10418_v56, %v3088_v12 }
 0x31d   : > { %v3123_v15 = vmul.f32 %v10418_v56, %v3089_v30  ;;  %v3124_v44 = vmul.f32 %v10418_v56, %v3090_v39  ;;  %v3125_v5 = vmul.f32 %v10418_v56, %v3091_v31  ;;  %v3126_v17 = vmul.f32 %v10418_v56, %v3092_v40 }
 0x31e   : > { %v3127_v37 = vmul.f32 %v10418_v56, %v3093_v23  ;;  %v3128_v22 = vmul.f32 %v10418_v56, %v3094_v0  ;;  %v3129_v41 = vmul.f32 %v10418_v56, %v3095_v45  ;;  %v3130_v9 = vmul.f32 %v10418_v56, %v3096_v62 }
 0x31f   : > { %v3131_v32 = vmul.f32 %v10418_v56, %v3097_v33  ;;  %v3132_v63 = vmul.f32 %v10418_v56, %v3098_v13  ;;  %v3133_v30 = vmul.f32 %v10418_v56, %v3099_v8  ;;  %v10460_v6 = vmax.f32 %v3105_v35, 0.0 }
 0x320   : > { %v10462_v39 = vmax.f32 %v3107_v55, 0.0  ;;  %v10464_v31 = vmax.f32 %v3108_v43, 0.0  ;;  %v10466_v40 = vmax.f32 %v3109_v4, 0.0  ;;  %v10468_v23 = vmax.f32 %v3110_v24, 0.0 }
 0x321   : > { %v10470_v0 = vmax.f32 %v3111_v50, 0.0  ;;  %v10472_v45 = vmax.f32 %v3112_v61, 0.0  ;;  %v10474_v62 = vmax.f32 %v3113_v27, 0.0  ;;  %v10476_v33 = vmax.f32 %v3114_v19, 0.0 }
 0x322   : > { %v10478_v13 = vmax.f32 %v3115_v46, 0.0  ;;  %v10480_v8 = vmax.f32 %v3116_v26, 0.0  ;;  %v10482_v47 = vmax.f32 %v3117_v21, 0.0  ;;  %v10484_v52 = vmax.f32 %v3118_v7, 0.0  ;;  %v12032_v7 = vld [vmem:[#allocation13_spill] sm:$0xff] }
 0x323   : > { %v10486_v16 = vmax.f32 %v3119_v20, 0.0  ;;  %v10488_v3 = vmax.f32 %v3120_v10, 0.0  ;;  %v10490_v38 = vmax.f32 %v3121_v59, 0.0  ;;  %v10492_v42 = vmax.f32 %v3122_v57, 0.0 }
 0x324   : > { %v10494_v18 = vmax.f32 %v3123_v15, 0.0  ;;  %v10496_v53 = vmax.f32 %v3124_v44, 0.0  ;;  %v10498_v11 = vmax.f32 %v3125_v5, 0.0  ;;  %v10500_v14 = vmax.f32 %v3126_v17, 0.0 }
 0x325   : > { %v10502_v2 = vmax.f32 %v3127_v37, 0.0  ;;  %v10504_v28 = vmax.f32 %v3128_v22, 0.0  ;;  %v10506_v12 = vmax.f32 %v3129_v41, 0.0  ;;  %v10508_v51 = vmax.f32 %v3130_v9, 0.0 }
 0x326   : > { %v10510_v35 = vmax.f32 %v3131_v32, 0.0  ;;  %v10512_v55 = vmax.f32 %v3132_v63, 0.0  ;;  %v10514_v43 = vmax.f32 %v3133_v30, 0.0  ;;  %v3267_v4 = vrot.slane %v10462_v39, 1 }
 0x327   : > { %v3103_v24 = vmul.f32 %v10418_v56, %v3069_v29  ;;  %v3104_v50 = vmul.f32 %v10418_v56, %v3070_v34  ;;  %v3265_v61 = vrot.slane %v10460_v6, 1  ;;  %v3106_v27 = vmul.f32 %v10418_v56, %v3072_v58 }
 0x328   : > { %v3268_v19 = vrot.slane %v10464_v31, 1  ;;  %v3269_v46 = vrot.slane %v10466_v40, 1  ;;  %v3169_v36 = vrot.slane %v10460_v6, 7  ;;  %v10535_v29 = vpack.c.bf16 %v10464_v31, %v10462_v39 }
 0x329   : > { %v10537_v60 = vmax.f32 %v3103_v24, 0.0  ;;  %v3136_v34 = vmax.f32 %v3104_v50, 0.0  ;;  %v3138_v26 = vmax.f32 %v3106_v27, 0.0  ;;  %v3270_v21 = vrot.slane %v10468_v23, 1  ;;  %v7881_v24 = vld [vmem:[#allocation8] sm:$0xff]  }
 0x32a   : > { %12031 = vst [vmem:[#allocation22_spill] sm:$0xff] %v10535_v29  ;;  %vm12033_vm15 = vcmp.lt.s32.totalorder %v12032_v7, 7  ;;  %v3271_v58 = vrot.slane %v10470_v0, 1  ;;  %v3272_v56 = vrot.slane %v10472_v45, 1  ;;  %vm12041_vm7 = vcmp.lt.s32.totalorder %v12032_v7, 7 }
 0x32b   : > { %v3320_v48 = vsel %vm12033_vm15, %v3268_v19, %v3269_v46  ;;  %vm12034_vm3 = vmmov %vm12033_vm15  ;;  %v3167_v20 = vrot.slane %v10537_v60, 7  ;;  %v3168_v10 = vrot.slane %v3136_v34, 7  ;;  %v10548_v59 = vpack.c.bf16 %v3136_v34, %v10537_v60 }
 0x32c   : > { %v3321_v54 = vsel %vm12034_vm3, %v3267_v4, %v3268_v19  ;;  %v11665_v57 = vrot.slane %v10537_v60, 1  ;;  %v3264_v15 = vrot.slane %v3136_v34, 1  ;;  %v3266_v44 = vrot.slane %v3138_v26, 1 }
 0x32d   : > { %12035 = vst [vmem:[#allocation29_spill] sm:$0xff] %v10548_v59  ;;  %v10552_v5 = vpack.c.bf16 %v3138_v26, %v10460_v6  ;;  %v10554_v17 = vpack.c.bf16 %v3320_v48, %v3321_v54  ;;  %vm12037_vm3 = vcmp.lt.s32.totalorder %v12032_v7, 1  ;;  %3824 = vmatprep.mubr.bf16.mxu0 %v10548_v59  ;;  %v3170_v41 = vrot.slane %v3138_v26, 7  ;;  %v12046_v26 = vld [vmem:[#allocation23_spill] sm:$0xff] }
 0x32e   : > { %v3229_v37 = vsel %vm12037_vm3, %v3167_v20, %v3168_v10  ;;  %vm12038_vm15 = vmmov %vm12037_vm3  ;;  %v3324_v63 = vsel %vm12041_vm7, %v3264_v15, %v3265_v61  ;;  %v10708_v59 = vpack.c.bf16 %v10480_v8, %v10478_v13 }
 0x32f   : > { %12036 = vst [vmem:[#allocation30_spill] sm:$0xff] %v10552_v5  ;;  %v3230_v22 = vsel %vm12038_vm15, %v11664_v49, %v3167_v20  ;;  %vm12039_vm2 = vmmov %vm12037_vm3  ;;  %v10642_v49 = vpack.c.bf16 %v10472_v45, %v10470_v0 }
 0x330   : > { %v3228_v9 = vsel %vm12039_vm2, %v3168_v10, %v3169_v36  ;;  %v10565_v32 = vpack.c.bf16 %v3229_v37, %v3230_v22  ;;  %vm12042_vm3 = vmmov %vm12041_vm7  ;;  %v3227_v19 = vsel %vm12039_vm2, %v3169_v36, %v3170_v41  ;;  %vm12047_vm7 = vnez %v12046_v26  ;;  %v7886_v10 = vld [vmem:[#allocation8 + $0x48] sm:$0xff]  }
 0x331   : > { %v3325_v30 = vsel %vm12042_vm3, %v11665_v57, %v3264_v15  ;;  %vm12043_vm14 = vmmov %vm12042_vm3  ;;  %v10588_v54 = vpack.c.bf16 %v3227_v19, %v3228_v9  ;;  %v12050_v36 = vld [vmem:[#allocation18_spill] sm:$0xff]  ;;  %v3171_v37 = vrot.slane %v10462_v39, 7  ;;  %v3172_v22 = vrot.slane %v10464_v31, 7  ;;  %v7892_v19 = vld [vmem:[#allocation8 + $0x50] sm:$0xff]   ;;  %12062 = vst [vmem:[#allocation42_spill] sm:$0xff] %v10642_v49 }
 0x332   : > { %12040 = vst [vmem:[#allocation40_spill] sm:$0xff] %v10565_v32  ;;  %v3322_v6 = vsel %vm12043_vm14, %v3266_v44, %v3267_v4  ;;  %v10575_v50 = vpack.c.bf16 %v3324_v63, %v3325_v30  ;;  %vm12044_vm15 = vmmov %vm12042_vm3  ;;  %5880 = vmatmul.mubr.msk.bf16.vlgmr.msra.gmra.mrb[160].mxu0 %vm12047_vm7, %v10565_v32  ;;  %v7873_v4 = vld [vmem:[#allocation8 + $0x88] sm:$0xff]   ;;  %v10610_v9 = vpack.c.bf16 %v10468_v23, %v10466_v40  ;;  %v3274_v63 = vrot.slane %v10476_v33, 1  ;;  %v12147_v57 = vld [vmem:[#allocation21_spill] sm:$0xff] }
 0x333   : > { %v3323_v27 = vsel %vm12044_vm15, %v3265_v61, %v3266_v44  ;;  %vm12045_vm13 = vmmov %vm12042_vm3  ;;  %12048 = vst [vmem:[#allocation27_spill] sm:$0xff] %v10588_v54  ;;  %v3273_v61 = vrot.slane %v10474_v62, 1  ;;  %3832 = vmatprep.mubr.bf16.mxu0 %v10552_v5  ;;  %v3275_v30 = vrot.slane %v10478_v13, 1  ;;  %6790 = vmatpush3.bf16.msra.mxu0 %v7881_v24  ;;  %v3284_v32 = vrot.slane %v10496_v53, 1  ;;  %v7906_v5 = vld [vmem:[#allocation8 + $0x70] sm:$0xff]  }
 0x334   : > { %v3318_v34 = vsel %vm12045_vm13, %v3270_v21, %v3271_v58  ;;  %v10586_v48 = vpack.c.bf16 %v3322_v6, %v3323_v27  ;;  %vm12049_vm14 = vmmov %vm12042_vm3  ;;  %vm12051_vm3 = vnez %v12050_v36  ;;  %v3317_v44 = vsel %vm12045_vm13, %v3271_v58, %v3272_v56  ;;  %12054 = vst [vmem:[#allocation31_spill] sm:$0xff] %v10610_v9  ;;  %v7887_v58 = vld [vmem:[#allocation8 + $0x8] sm:$0xff]   ;;  %6791 = vmatprep.subr.bf16.mxu0 %v7886_v10  ;;  %v7894_v36 = vld [vmem:[#allocation8 + $0x1e0] sm:$0xff]  }
 0x335   : > { %v3319_v20 = vsel %vm12049_vm14, %v3269_v46, %v3270_v21  ;;  %7221 = vmatprep.mubr.msk.bf16.mxu1 %vm12051_vm3, %v10575_v50  ;;  %vm12053_vm15 = vmmov %vm12045_vm13  ;;  %v3276_v27 = vrot.slane %v10480_v8, 1  ;;  %v3279_v10 = vrot.slane %v10486_v16, 1 }
 0x336   : > { %v10597_v15 = vpack.c.bf16 %v3318_v34, %v3319_v20  ;;  %7222 = vmatmul.mubr.msk.bf16.vlgmr.msra.gmra.mrb[96].mxu1 %vm9540_vm5, %v10586_v48  ;;  %v3316_v21 = vsel %vm12053_vm15, %v3272_v56, %v3273_v61  ;;  %v3225_v56 = vsel %vm12039_vm2, %v3171_v37, %v3172_v22  ;;  %vm12057_vm14 = vmmov %vm12039_vm2  ;;  %v7874_v34 = vld [vmem:[#allocation8 + $0x90] sm:$0xff]  }
 0x337   : > { %7254 = vmatpush3.bf16.msra.mxu1 %v10229_v1  ;;  %7225 = vmatprep.mubr.msk.bf16.mxu1 %vm9554_vm0, %v10554_v17  ;;  %v10618_v31 = vpack.c.bf16 %v3316_v21, %v3317_v44  ;;  %v3226_v6 = vsel %vm12057_vm14, %v3170_v41, %v3171_v37  ;;  %v3314_v1 = vsel %vm12045_vm13, %v3274_v63, %v3275_v30  ;;  %vm12059_vm15 = vmmov %vm12045_vm13  ;;  %v3277_v44 = vrot.slane %v10482_v47, 1 }
 0x338   : > { %7255 = vmatprep.subr.bf16.mxu1 %v7873_v4  ;;  %v10625_v24 = vpack.c.bf16 %v3225_v56, %v3226_v6  ;;  %v3315_v20 = vsel %vm12059_vm15, %v3273_v61, %v3274_v63  ;;  %vm12060_vm2 = vmmov %vm12045_vm13  ;;  %v3173_v37 = vrot.slane %v10466_v40, 7  ;;  %v3174_v56 = vrot.slane %v10468_v23, 7  ;;  %6792 = vmatpush3.bf16.msra.mxu0 %v7887_v58  ;;  %v7893_v63 = vld [vmem:[#allocation8 + $0x10] sm:$0xff]   ;;  %v7875_v58 = vld [vmem:[#allocation8 + $0x98] sm:$0xff]  }
 0x339   : > { %12056 = vst [vmem:[#allocation32_spill] sm:$0xff] %v10618_v31  ;;  %v10632_v21 = vpack.c.bf16 %v3314_v1, %v3315_v20  ;;  %v3313_v41 = vsel %vm12060_vm2, %v3275_v30, %v3276_v27  ;;  %vm12061_vm14 = vmmov %vm12060_vm2  ;;  %v3278_v61 = vrot.slane %v10484_v52, 1  ;;  %vm12064_vm13 = vcmp.lt.s32.totalorder %v12032_v7, 1  ;;  %6793 = vmatprep.subr.bf16.mxu0 %v7892_v19 }
 0x33a   : > { %12058 = vst [vmem:[#allocation28_spill] sm:$0xff] %v10625_v24  ;;  %v3312_v6 = vsel %vm12061_vm14, %v3276_v27, %v3277_v44  ;;  %v3223_v40 = vsel %vm12064_vm13, %v3173_v37, %v3174_v56  ;;  %vm12065_vm15 = vmmov %vm12064_vm13  ;;  %v3280_v30 = vrot.slane %v10488_v3, 1  ;;  %5884 = vmatmul.mubr.msk.bf16.gmra.mrb[164].mxu0 %vm8786_vm6, %v10588_v54 }
 0x33b   : > { %7256 = vmatpush3.bf16.msra.mxu1 %v7873_v4  ;;  %v10646_v1 = vpack.c.bf16 %v3312_v6, %v3313_v41  ;;  %v3224_v23 = vsel %vm12065_vm15, %v3172_v22, %v3173_v37  ;;  %v3310_v4 = vsel %vm12060_vm2, %v3278_v61, %v3279_v10  ;;  %vm12067_vm14 = vmmov %vm12060_vm2  ;;  %v3281_v6 = vrot.slane %v10490_v38, 1  ;;  %v7898_v22 = vld [vmem:[#allocation8 + $0x58] sm:$0xff]   ;;  %3840 = vmatprep.mubr.bf16.mxu0 %v10535_v29  ;;  %v7900_v29 = vld [vmem:[#allocation8 + $0x60] sm:$0xff]  }
 0x33c   : > { %7257 = vmatprep.subr.bf16.mxu1 %v7874_v34  ;;  %v10656_v20 = vpack.c.bf16 %v3223_v40, %v3224_v23  ;;  %v3311_v41 = vsel %vm12067_vm14, %v3277_v44, %v3278_v61  ;;  %vm12068_vm13 = vmmov %vm12060_vm2  ;;  %v3175_v40 = vrot.slane %v10470_v0, 7  ;;  %v3176_v23 = vrot.slane %v10472_v45, 7  ;;  %6794 = vmatpush3.bf16.msra.mxu0 %v7893_v63  ;;  %v7876_v63 = vld [vmem:[#allocation8 + $0xa0] sm:$0xff]  }
 0x33d   : > { %12063 = vst [vmem:[#allocation34_spill] sm:$0xff] %v10646_v1  ;;  %v10664_v19 = vpack.c.bf16 %v3310_v4, %v3311_v41  ;;  %v3309_v37 = vsel %vm12068_vm13, %v3279_v10, %v3280_v30  ;;  %vm12070_vm15 = vmmov %vm12060_vm2  ;;  %v10677_v61 = vpack.c.bf16 %v10476_v33, %v10474_v62  ;;  %v3282_v4 = vrot.slane %v10492_v42, 1  ;;  %v7899_v10 = vld [vmem:[#allocation8 + $0x18] sm:$0xff]   ;;  %6795 = vmatprep.subr.bf16.mxu0 %v7898_v22 }
 0x33e   : > { %7226 = vmatmul.mubr.msk.bf16.gmra.mrb[100].mxu1 %vm9570_vm4, %v10597_v15  ;;  %v3308_v44 = vsel %vm12070_vm15, %v3280_v30, %v3281_v6  ;;  %v3283_v41 = vrot.slane %v10494_v18, 1  ;;  %vm12072_vm2 = vcmp.lt.s32.totalorder %v12032_v7, 1  ;;  %vm12074_vm15 = vmmov %vm12068_vm13  ;;  %v3287_v22 = vrot.slane %v10502_v2, 1 }
 0x33f   : > { %7229 = vmatprep.mubr.msk.bf16.mxu1 %vm9580_vm8, %v10618_v31  ;;  %7258 = vmatpush3.bf16.msra.mxu1 %v7874_v34  ;;  %v10684_v45 = vpack.c.bf16 %v3308_v44, %v3309_v37  ;;  %v3221_v30 = vsel %vm12072_vm2, %v3175_v40, %v3176_v23  ;;  %vm12073_vm14 = vmmov %vm12072_vm2  ;;  %v3307_v34 = vsel %vm12074_vm15, %v3281_v6, %v3282_v4  ;;  %v3285_v37 = vrot.slane %v10498_v11, 1 }
 0x340   : > { %v3222_v26 = vsel %vm12073_vm14, %v3174_v56, %v3175_v40  ;;  %7259 = vmatprep.subr.bf16.mxu1 %v7875_v58  ;;  %v3306_v54 = vsel %vm12068_vm13, %v3282_v4, %v3283_v41  ;;  %vm12075_vm2 = vmmov %vm12068_vm13  ;;  %v3177_v40 = vrot.slane %v10474_v62, 7  ;;  %v3286_v6 = vrot.slane %v10500_v14, 1  ;;  %6796 = vmatpush3.bf16.msra.mxu0 %v7899_v10  ;;  %v7877_v10 = vld [vmem:[#allocation8 + $0xa8] sm:$0xff]  }
 0x341   : > { %v10691_v27 = vpack.c.bf16 %v3221_v30, %v3222_v26  ;;  %v10698_v44 = vpack.c.bf16 %v3306_v54, %v3307_v34  ;;  %v3305_v56 = vsel %vm12075_vm2, %v3283_v41, %v3284_v32  ;;  %v3178_v26 = vrot.slane %v10476_v33, 7  ;;  %vm12076_vm14 = vmmov %vm12075_vm2  ;;  %v7902_v54 = vld [vmem:[#allocation8 + $0x20] sm:$0xff]   ;;  %6797 = vmatprep.subr.bf16.mxu0 %v7900_v29 }
 0x342   : > { %v3304_v30 = vsel %vm12076_vm14, %v3284_v32, %v3285_v37  ;;  %vm12078_vm13 = vcmp.lt.s32.totalorder %v12032_v7, 1  ;;  %v3288_v32 = vrot.slane %v10504_v28, 1  ;;  %5888 = vmatmul.mubr.msk.bf16.gmra.mrb[168].mxu0 %vm8890_vm9, %v10625_v24  ;;  %vm12081_vm14 = vmmov %vm12075_vm2  ;;  %v3292_v24 = vrot.slane %v10512_v55, 1 }
 0x343   : > { %7260 = vmatpush3.bf16.msra.mxu1 %v7875_v58  ;;  %v10712_v4 = vpack.c.bf16 %v3304_v30, %v3305_v56  ;;  %v3219_v62 = vsel %vm12078_vm13, %v3177_v40, %v3178_v26  ;;  %vm12079_vm15 = vmmov %vm12078_vm13  ;;  %v3302_v58 = vsel %vm12075_vm2, %v3286_v6, %v3287_v22  ;;  %v3303_v56 = vsel %vm12081_vm14, %v3285_v37, %v3286_v6 }
 0x344   : > { %v3220_v33 = vsel %vm12079_vm15, %v3176_v23, %v3177_v40  ;;  %7261 = vmatprep.subr.bf16.mxu1 %v7876_v63  ;;  %v3289_v30 = vrot.slane %v10506_v12, 1  ;;  %v7904_v23 = vld [vmem:[#allocation8 + $0x68] sm:$0xff]   ;;  %3848 = vmatprep.mubr.bf16.mxu0 %v10610_v9  ;;  %v10730_v29 = vpack.c.bf16 %v3302_v58, %v3303_v56  ;;  %vm12083_vm13 = vmmov %vm12075_vm2  ;;  %v10743_v6 = vpack.c.bf16 %v10484_v52, %v10482_v47 }
 0x345   : > { %12077 = vst [vmem:[#allocation41_spill] sm:$0xff] %v10712_v4  ;;  %v10722_v34 = vpack.c.bf16 %v3219_v62, %v3220_v33  ;;  %v3301_v40 = vsel %vm12083_vm13, %v3287_v22, %v3288_v32  ;;  %v3179_v62 = vrot.slane %v10478_v13, 7  ;;  %v3180_v33 = vrot.slane %v10480_v8, 7  ;;  %vm12085_vm15 = vmmov %vm12075_vm2  ;;  %6798 = vmatpush3.bf16.msra.mxu0 %v7902_v54  ;;  %v7905_v22 = vld [vmem:[#allocation8 + $0x28] sm:$0xff]   ;;  %v7878_v54 = vld [vmem:[#allocation8 + $0xb0] sm:$0xff]  }
 0x346   : > { %12082 = vst [vmem:[#allocation45_spill] sm:$0xff] %v10730_v29  ;;  %7230 = vmatmul.mubr.msk.bf16.gmra.mrb[104].mxu1 %vm9596_vm12, %v10632_v21  ;;  %v3300_v37 = vsel %vm12085_vm15, %v3288_v32, %v3289_v30  ;;  %v3290_v58 = vrot.slane %v10508_v51, 1  ;;  %v3291_v56 = vrot.slane %v10510_v35, 1  ;;  %vm12088_vm2 = vcmp.lt.s32.totalorder %v12032_v7, 1  ;;  %vm12090_vm15 = vmmov %vm12083_vm13  ;;  %6799 = vmatprep.subr.bf16.mxu0 %v7904_v23  ;;  %v12149_v0 = vld [vmem:[#allocation34_spill] sm:$0xff] }
 0x347   : > { %7233 = vmatprep.mubr.msk.bf16.mxu1 %vm9606_vm10, %v10646_v1  ;;  %7262 = vmatpush3.bf16.msra.mxu1 %v7876_v63  ;;  %v10750_v8 = vpack.c.bf16 %v3300_v37, %v3301_v40  ;;  %v3217_v32 = vsel %vm12088_vm2, %v3179_v62, %v3180_v33  ;;  %vm12089_vm14 = vmmov %vm12088_vm2  ;;  %v3293_v40 = vrot.slane %v10514_v43, 1  ;;  %v10774_v1 = vpack.c.bf16 %v10488_v3, %v10486_v16 }
 0x348   : > { %v3218_v9 = vsel %vm12089_vm14, %v3178_v26, %v3179_v62  ;;  %7263 = vmatprep.subr.bf16.mxu1 %v7877_v10  ;;  %v3298_v13 = vsel %vm12083_vm13, %v3290_v58, %v3291_v56  ;;  %v3299_v63 = vsel %vm12090_vm15, %v3289_v30, %v3290_v58  ;;  %vm12092_vm2 = vmmov %vm12083_vm13  ;;  %v3181_v62 = vrot.slane %v10482_v47, 7  ;;  %v7908_v58 = vld [vmem:[#allocation8 + $0x30] sm:$0xff]  }
 0x349   : > { %12087 = vst [vmem:[#allocation43_spill] sm:$0xff] %v10750_v8  ;;  %v10757_v41 = vpack.c.bf16 %v3217_v32, %v3218_v9  ;;  %v10764_v37 = vpack.c.bf16 %v3298_v13, %v3299_v63  ;;  %v3297_v26 = vsel %vm12092_vm2, %v3291_v56, %v3292_v24  ;;  %v3182_v9 = vrot.slane %v10484_v52, 7  ;;  %vm12093_vm14 = vmmov %vm12092_vm2  ;;  %6800 = vmatpush3.bf16.msra.mxu0 %v7905_v22  ;;  %v7879_v22 = vld [vmem:[#allocation8 + $0xb8] sm:$0xff]  }
 0x34a   : > { %v3296_v32 = vsel %vm12093_vm14, %v3292_v24, %v3293_v40  ;;  %v3294_v30 = vrot.slane %v10436_v25, 1  ;;  %v3183_v23 = vrot.slane %v10486_v16, 7  ;;  %vm12095_vm13 = vcmp.lt.s32.totalorder %v12032_v7, 1  ;;  %6801 = vmatprep.subr.bf16.mxu0 %v7906_v5  ;;  %5892 = vmatmul.mubr.msk.bf16.gmra.mrb[172].mxu0 %vm8996_vm11, %v10656_v20  ;;  %vm12099_vm14 = vmmov %vm12092_vm2  ;;  %v12131_v7 = vld [vmem:[#allocation61_spill] sm:$0xff] }
 0x34b   : > { %12091 = vst [vmem:[#allocation46_spill] sm:$0xff] %v10764_v37  ;;  %7264 = vmatpush3.bf16.msra.mxu1 %v7877_v10  ;;  %v10778_v13 = vpack.c.bf16 %v3296_v32, %v3297_v26  ;;  %v3215_v47 = vsel %vm12095_vm13, %v3181_v62, %v3182_v9  ;;  %vm12096_vm15 = vmmov %vm12095_vm13  ;;  %v3184_v24 = vrot.slane %v10488_v3, 7  ;;  %v12098_v63 = vrot.slane %v10537_v60, 1  ;;  %v7910_v3 = vld [vmem:[#allocation8 + $0x78] sm:$0xff]   ;;  %3856 = vmatprep.mubr.bf16.mxu0 %v10642_v49  ;;  %v12102_v60 = vld [vmem:[#allocation55_spill] sm:$0xff] }
 0x34c   : > { %v3216_v52 = vsel %vm12096_vm15, %v3180_v33, %v3181_v62  ;;  %7265 = vmatprep.subr.bf16.mxu1 %v7878_v54  ;;  %v3295_v10 = vsel %vm12092_vm2, %v3293_v40, %v3294_v30  ;;  %v3185_v33 = vrot.slane %v10490_v38, 7  ;;  %vm12101_vm15 = vmmov %vm12095_vm13  ;;  %v10806_v40 = vpack.c.bf16 %v10492_v42, %v10490_v38  ;;  %v12105_v38 = vld [vmem:[#allocation56_spill] sm:$0xff] }
 0x34d   : > { %12094 = vst [vmem:[#allocation16_spill] sm:$0xff] %v10778_v13  ;;  %v10788_v16 = vpack.c.bf16 %v3215_v47, %v3216_v52  ;;  %v3326_v26 = vsel %vm12099_vm14, %v3294_v30, %v12098_v63  ;;  %v3213_v62 = vsel %vm12095_vm13, %v3183_v23, %v3184_v24  ;;  %v3214_v32 = vsel %vm12101_vm15, %v3182_v9, %v3183_v23  ;;  %vm12104_vm14 = vmmov %vm12095_vm13  ;;  %v7911_v9 = vld [vmem:[#allocation8 + $0x38] sm:$0xff]  }
 0x34e   : > { %v10798_v5 = vpack.c.bf16 %v3326_v26, %v3295_v10  ;;  %vm12103_vm2 = vnez %v12102_v60  ;;  %v10811_v30 = vpack.c.bf16 %v3213_v62, %v3214_v32  ;;  %v3186_v47 = vrot.slane %v10492_v42, 7  ;;  %6802 = vmatpush3.bf16.msra.mxu0 %v7908_v58  ;;  %v7882_v26 = vld [vmem:[#allocation8 + $0x1c0] sm:$0xff]   ;;  %vm12107_vm15 = vmmov %vm12104_vm14 }
 0x34f   : > { %7234 = vmatmul.mubr.msk.bf16.gmra.mrb[108].mxu1 %vm12103_vm2, %v10664_v19  ;;  %v3212_v52 = vsel %vm12104_vm14, %v3184_v24, %v3185_v33  ;;  %v10818_v10 = vpack.c.bf16 %v10496_v53, %v10494_v18  ;;  %vm12106_vm13 = vnez %v12105_v38  ;;  %v3187_v23 = vrot.slane %v10494_v18, 7  ;;  %6803 = vmatprep.subr.bf16.mxu0 %v7910_v3  ;;  %vm12108_vm11 = vmmov %vm12104_vm14 }
 0x350   : > { %12100 = vst [vmem:[#allocation47_spill] sm:$0xff] %v10798_v5  ;;  %7237 = vmatprep.mubr.msk.bf16.mxu1 %vm12106_vm13, %v10684_v45  ;;  %7266 = vmatpush3.bf16.msra.mxu1 %v7878_v54  ;;  %v3188_v63 = vrot.slane %v10496_v53, 7  ;;  %v10827_v42 = vpack.c.bf16 %v10500_v14, %v10498_v11  ;;  %v3189_v24 = vrot.slane %v10498_v11, 7  ;;  %v3211_v58 = vsel %vm12107_vm15, %v3185_v33, %v3186_v47  ;;  %vm12109_vm9 = vmmov %vm12108_vm11 }
 0x351   : > { %7267 = vmatprep.subr.bf16.mxu1 %v7879_v22  ;;  %v3190_v62 = vrot.slane %v10500_v14, 7  ;;  %v10835_v54 = vpack.c.bf16 %v10504_v28, %v10502_v2  ;;  %v3191_v18 = vrot.slane %v10502_v2, 7  ;;  %v10838_v53 = vpack.c.bf16 %v3211_v58, %v3212_v52  ;;  %vm12110_vm15 = vmmov %vm12109_vm9 }
 0x352   : > { %v3209_v32 = vsel %vm12104_vm14, %v3187_v23, %v3188_v63  ;;  %v3210_v11 = vsel %vm12108_vm11, %v3186_v47, %v3187_v23  ;;  %v3208_v33 = vsel %vm12109_vm9, %v3188_v63, %v3189_v24  ;;  %v3192_v56 = vrot.slane %v10504_v28, 7  ;;  %vm12111_vm7 = vmmov %vm12109_vm9  ;;  %6804 = vmatpush3.bf16.msra.mxu0 %v7911_v9  ;;  %v12112_v63 = vld [vmem:[#allocation44_spill] sm:$0xff] }
 0x353   : > { %v10846_v49 = vpack.c.bf16 %v3209_v32, %v3210_v11  ;;  %v3207_v14 = vsel %vm12110_vm15, %v3189_v24, %v3190_v62  ;;  %v3206_v2 = vsel %vm12111_vm7, %v3190_v62, %v3191_v18  ;;  %v10857_v47 = vpack.c.bf16 %v10508_v51, %v10506_v12  ;;  %5896 = vmatmul.mubr.msk.bf16.gmra.mrb[176].mxu0 %vm11960_vm1, %v10691_v27  ;;  %vm12113_vm9 = vmmov %vm12111_vm7  ;;  %v12115_v62 = vld [vmem:[#allocation57_spill] sm:$0xff] }
 0x354   : > { %7268 = vmatpush3.bf16.msra.mxu1 %v7879_v22  ;;  %v10853_v3 = vpack.c.bf16 %v3207_v14, %v3208_v33  ;;  %v3193_v52 = vrot.slane %v10506_v12, 7  ;;  %v3194_v23 = vrot.slane %v10508_v51, 7  ;;  %v3205_v28 = vsel %vm12113_vm9, %v3191_v18, %v3192_v56  ;;  %3864 = vmatprep.mubr.bf16.mxu0 %v10677_v61  ;;  %vm12114_vm11 = vmmov %vm12111_vm7 }
 0x355   : > { %6925 = vmatprep.subr.bf16.mxu1 %v7882_v26  ;;  %v10868_v22 = vpack.c.bf16 %v10512_v55, %v10510_v35  ;;  %v3195_v9 = vrot.slane %v10510_v35, 7  ;;  %v3196_v24 = vrot.slane %v10512_v55, 7  ;;  %v10873_v12 = vpack.c.bf16 %v3205_v28, %v3206_v2  ;;  %vm12117_vm15 = vmmov %vm12111_vm7  ;;  %v12129_v28 = vld [vmem:[#allocation49_spill] sm:$0xff] }
 0x356   : > { %v3203_v51 = vsel %vm12114_vm11, %v3193_v52, %v3194_v23  ;;  %v3204_v26 = vsel %vm12111_vm7, %v3192_v56, %v3193_v52  ;;  %v10881_v58 = vpack.c.bf16 %v10436_v25, %v10514_v43  ;;  %vm12116_vm14 = vnez %v12115_v62  ;;  %vm12118_vm9 = vmmov %vm12111_vm7  ;;  %v12119_v56 = vld [vmem:[#allocation58_spill] sm:$0xff]  ;;  %v12173_v62 = vld [vmem:[#allocation31_spill] sm:$0xff] }
 0x357   : > { %7238 = vmatmul.mubr.msk.bf16.gmra.mrb[112].mxu1 %vm12116_vm14, %v10698_v44  ;;  %v10886_v35 = vpack.c.bf16 %v3203_v51, %v3204_v26  ;;  %v3201_v55 = vsel %vm12117_vm15, %v3195_v9, %v3196_v24  ;;  %v3202_v18 = vsel %vm12118_vm9, %v3194_v23, %v3195_v9  ;;  %v3197_v32 = vrot.slane %v10514_v43, 7  ;;  %vm12122_vm1 = vmmov %vm12111_vm7  ;;  %v12123_v23 = vld [vmem:[#allocation48_spill] sm:$0xff]  ;;  %v12125_v43 = vld [vmem:[#allocation59_spill] sm:$0xff] }
 0x358   : > { %vm12120_vm11 = vnez %v12119_v56  ;;  %v10896_v11 = vpack.c.bf16 %v3201_v55, %v3202_v18  ;;  %v12121_v33 = vrot.slane %v10436_v25, 7  ;;  %vm12124_vm15 = vnez %v12123_v23  ;;  %v12127_v25 = vld [vmem:[#allocation60_spill] sm:$0xff]  ;;  %v12133_v9 = vld [vmem:[#allocation62_spill] sm:$0xff]  ;;  %v12137_v51 = vld [vmem:[#allocation63_spill] sm:$0xff] }
 0x359   : > { %7241 = vmatprep.mubr.msk.bf16.mxu1 %vm12120_vm11, %v10712_v4  ;;  %v3200_v2 = vsel %vm12122_vm1, %v3196_v24, %v3197_v32  ;;  %vm12126_vm9 = vnez %v12125_v43  ;;  %vm12128_vm6 = vnez %v12127_v25  ;;  %vm12132_vm1 = vnez %v12131_v7  ;;  %v12135_v24 = vld [vmem:[#allocation50_spill] sm:$0xff]  ;;  %v7883_v55 = vld [vmem:[#allocation8 + $0x180] sm:$0xff]   ;;  %v12140_v18 = vld [vmem:[#allocation51_spill] sm:$0xff] }
 0x35a   : > { %v3199_v14 = vsel %vm12111_vm7, %v3197_v32, %v12121_v33  ;;  %vm12130_vm7 = vnez %v12129_v28  ;;  %v12139_v26 = vmov 0   ;;  %v7884_v32 = vld [vmem:[#allocation8 + $0x1c8] sm:$0xff]   ;;  %v12164_v7 = vld [vmem:[#allocation25_spill] sm:$0xff]  ;;  %v12167_v56 = vld [vmem:[#allocation40_spill] sm:$0xff] }
 0x35b   : > { %v10904_v52 = vpack.c.bf16 %v3199_v14, %v3200_v2  ;;  %5900 = vmatmul.mubr.msk.bf16.gmra.mrb[180].mxu0 %vm12124_vm15, %v10722_v34  ;;  %vm12134_vm15 = vnez %v12133_v9  ;;  %v7885_v33 = vld [vmem:[#allocation8 + $0x188] sm:$0xff]   ;;  %v7888_v14 = vld [vmem:[#allocation8 + $0x1d0] sm:$0xff]  }
 0x35c   : > { %3872 = vmatprep.mubr.bf16.mxu0 %v10708_v59  ;;  %v7889_v2 = vld [vmem:[#allocation8 + $0x190] sm:$0xff]  }
 0x35d   : > { %v12168_v9 = vld [vmem:[#allocation23_spill] sm:$0xff] }
 0x35f   : > { %7242 = vmatmul.mubr.msk.bf16.gmra.mrb[116].mxu1 %vm12126_vm9, %v10730_v29  ;;  %vm12136_vm9 = vnez %v12135_v24 }
 0x360   : > { %7245 = vmatprep.mubr.msk.bf16.mxu1 %vm12128_vm6, %v10750_v8  ;;  %vm12138_vm6 = vnez %v12137_v51  ;;  %v12142_v51 = vld [vmem:[#allocation35_spill] sm:$0xff] }
 0x363   : > { %5904 = vmatmul.mubr.msk.bf16.gmra.mrb[184].mxu0 %vm12130_vm7, %v10757_v41  ;;  %vm12141_vm7 = vnez %v12140_v18 }
 0x364   : > { %3880 = vmatprep.mubr.bf16.mxu0 %v10743_v6 }
 0x367   : > { %7246 = vmatmul.mubr.msk.bf16.gmra.mrb[120].mxu1 %vm12132_vm1, %v10764_v37 }
 0x368   : > { %7249 = vmatprep.mubr.msk.bf16.mxu1 %vm12134_vm15, %v10778_v13 }
 0x36b   : > { %5908 = vmatmul.mubr.msk.bf16.gmra.mrb[188].mxu0 %vm12136_vm9, %v10788_v16 }
 0x36c   : > { %3888 = vmatprep.mubr.bf16.mxu0 %v10774_v1 }
 0x36f   : > { %7250 = vmatmul.mubr.msk.bf16.gmra.mrb[124].mxu1 %vm12138_vm6, %v10798_v5  ;;  %vm12143_vm6 = vnez %v12142_v51  ;;  %v7890_v5 = vld [vmem:[#allocation8 + $0x1d8] sm:$0xff]  }
 0x370   : > { %7269 = vmatprep.mubr.bf16.mxu1 %v12139_v26 }
 0x373   : > { %5912 = vmatmul.mubr.msk.bf16.gmra.mrb[192].mxu0 %vm12141_vm7, %v10811_v30 }
 0x374   : > { %3896 = vmatprep.mubr.bf16.mxu0 %v10806_v40 }
 0x377   : > { %7270 = vmatmul.mubr.msk.bf16.vlgmr.msra.gmra.mrb[96].mxu1 %vm12051_vm3, %v10575_v50  ;;  %v7891_v50 = vld [vmem:[#allocation8 + $0x198] sm:$0xff]  }
 0x378   : > { %6926 = vmatpush3.bf16.msra.mxu1 %v7883_v55  ;;  %7273 = vmatprep.mubr.msk.bf16.mxu1 %vm9540_vm5, %v10586_v48  ;;  %v7895_v55 = vld [vmem:[#allocation8 + $0x1a0] sm:$0xff]  }
 0x379   : > { %6927 = vmatprep.subr.bf16.mxu1 %v7884_v32  ;;  %v12144_v32 = vld [vmem:[#allocation36_spill] sm:$0xff] }
 0x37a   : > { %vm12145_vm3 = vnez %v12144_v32 }
 0x37b   : > { %5916 = vmatmul.mubr.msk.bf16.gmra.mrb[196].mxu0 %vm12143_vm6, %v10838_v53 }
 0x37c   : > { %6928 = vmatpush3.bf16.msra.mxu1 %v7885_v33  ;;  %3904 = vmatprep.mubr.bf16.mxu0 %v10818_v10  ;;  %v7896_v33 = vld [vmem:[#allocation8 + $0x1e8] sm:$0xff]  }
 0x37d   : > { %6929 = vmatprep.subr.bf16.mxu1 %v7888_v14  ;;  %v12146_v14 = vld [vmem:[#allocation53_spill] sm:$0xff] }
 0x37f   : > { %7274 = vmatmul.mubr.msk.bf16.gmra.mrb[100].mxu1 %vm9554_vm0, %v10554_v17 }
 0x380   : > { %7277 = vmatprep.mubr.msk.bf16.mxu1 %vm9570_vm4, %v10597_v15  ;;  %6930 = vmatpush3.bf16.msra.mxu1 %v7889_v2  ;;  %v7901_v2 = vld [vmem:[#allocation8 + $0x1f0] sm:$0xff]   ;;  %vm12148_vm4 = vnez %v12147_v57 }
 0x381   : > { %6931 = vmatprep.subr.bf16.mxu1 %v7890_v5  ;;  %v7897_v5 = vld [vmem:[#allocation8 + $0x1a8] sm:$0xff]  }
 0x383   : > { %5920 = vmatmul.mubr.msk.bf16.gmra.mrb[200].mxu0 %vm12145_vm3, %v10846_v49 }
 0x384   : > { %6932 = vmatpush3.bf16.msra.mxu1 %v7891_v50  ;;  %3912 = vmatprep.mubr.bf16.mxu0 %v10827_v42  ;;  %v7903_v50 = vld [vmem:[#allocation8 + $0x1b0] sm:$0xff]  }
 0x385   : > { %6933 = vmatprep.subr.bf16.mxu1 %v7894_v36  ;;  %v7907_v36 = vld [vmem:[#allocation8 + $0x1f8] sm:$0xff]  }
 0x387   : > { %7278 = vmatmul.mubr.msk.bf16.gmra.mrb[104].mxu1 %vm9580_vm8, %v10618_v31  ;;  %v12150_v31 = vld [vmem:[#allocation54_spill] sm:$0xff] }
 0x388   : > { %7281 = vmatprep.mubr.msk.bf16.mxu1 %vm9596_vm12, %v10632_v21  ;;  %6934 = vmatpush3.bf16.msra.mxu1 %v7895_v55  ;;  %v7909_v55 = vld [vmem:[#allocation8 + $0x1b8] sm:$0xff]  }
 0x389   : > { %6935 = vmatprep.subr.bf16.mxu1 %v7896_v33  ;;  %v7912_v33 = vld [vmem:[#allocation8 + $0x200] sm:$0xff]  }
 0x38b   : > { %5924 = vmatmul.mubr.msk.bf16.gmra.mrb[204].mxu0 %vm12148_vm4, %v10853_v3 }
 0x38c   : > { %6936 = vmatpush3.bf16.msra.mxu1 %v7897_v5  ;;  %3920 = vmatprep.mubr.bf16.mxu0 %v10835_v54  ;;  %v12151_v5 = vld [vmem:[#allocation14_spill] sm:$0xff] }
 0x38d   : > { %6937 = vmatprep.subr.bf16.mxu1 %v7901_v2  ;;  %vm12152_vm12 = vnez %v12151_v5  ;;  %v12153_v2 = vld [vmem:[#allocation37_spill] sm:$0xff] }
 0x38f   : > { %7282 = vmatmul.mubr.msk.bf16.gmra.mrb[108].mxu1 %vm9606_vm10, %v12149_v0  ;;  %vm12155_vm10 = vnez %v12125_v43  ;;  %v12163_v43 = vld [vmem:[#allocation27_spill] sm:$0xff] }
 0x390   : > { %7285 = vmatprep.mubr.msk.bf16.mxu1 %vm12103_vm2, %v10664_v19  ;;  %6938 = vmatpush3.bf16.msra.mxu1 %v7903_v50  ;;  %vm12154_vm2 = vnez %v12153_v2  ;;  %v12156_v50 = vld [vmem:[#allocation15_spill] sm:$0xff] }
 0x391   : > { %6939 = vmatprep.subr.bf16.mxu1 %v7907_v36  ;;  %v12159_v36 = vld [vmem:[#allocation17_spill] sm:$0xff] }
 0x393   : > { %5928 = vmatmul.mubr.msk.bf16.gmra.mrb[208].mxu0 %vm12152_vm12, %v10873_v12 }
 0x394   : > { %6940 = vmatpush3.bf16.msra.mxu1 %v7909_v55  ;;  %3928 = vmatprep.mubr.bf16.mxu0 %v10857_v47  ;;  %v12161_v55 = vld [vmem:[#allocation30_spill] sm:$0xff] }
 0x395   : > { %7301 = vmatprep.subr.bf16.mxu1 %v7912_v33 }
 0x397   : > { %7286 = vmatmul.mubr.msk.bf16.gmra.mrb[112].mxu1 %vm12106_vm13, %v10684_v45  ;;  %vm12157_vm13 = vnez %v12156_v50 }
 0x398   : > { %7289 = vmatprep.mubr.msk.bf16.mxu1 %vm12116_vm14, %v10698_v44  ;;  %vm12158_vm14 = vnez %v12127_v25  ;;  %v7913_v25 = vld [vmem:[#allocation8 + $0x208] sm:$0xff]  }
 0x39b   : > { %5932 = vmatmul.mubr.msk.bf16.gmra.mrb[212].mxu0 %vm12154_vm2, %v10886_v35 }
 0x39c   : > { %3936 = vmatprep.mubr.bf16.mxu0 %v10868_v22 }
 0x39f   : > { %7290 = vmatmul.mubr.msk.bf16.gmra.mrb[116].mxu1 %vm12120_vm11, %v10712_v4  ;;  %vm12160_vm11 = vnez %v12159_v36  ;;  %v12170_v4 = vld [vmem:[#allocation28_spill] sm:$0xff] }
 0x3a0   : > { %7293 = vmatprep.mubr.msk.bf16.mxu1 %vm12155_vm10, %v10730_v29  ;;  %v7914_v29 = vld [vmem:[#allocation8 + $0x210] sm:$0xff]   ;;  %vm12179_vm10 = vnez %v12129_v28 }
 0x3a3   : > { %5936 = vmatmul.mubr.msk.bf16.gmra.mrb[216].mxu0 %vm12157_vm13, %v10896_v11 }
 0x3a4   : > { %3944 = vmatprep.mubr.bf16.mxu0 %v10881_v58 }
 0x3a7   : > { %7294 = vmatmul.mubr.msk.bf16.gmra.mrb[120].mxu1 %vm12158_vm14, %v10750_v8  ;;  %v12162_v8 = vld [vmem:[#allocation29_spill] sm:$0xff] }
 0x3a8   : > { %7297 = vmatprep.mubr.msk.bf16.mxu1 %vm12132_vm1, %v10764_v37  ;;  %vm12165_vm1 = vnez %v12164_v7  ;;  %v12166_v37 = vld [vmem:[#allocation22_spill] sm:$0xff] }
 0x3ab   : > { %5940 = vmatmul.mubr.msk.bf16.gmra.mrb[220].mxu0 %vm12160_vm11, %v10904_v52 }
 0x3ac   : > { %4290 = vmatprep.mubr.bf16.mxu0 %v12139_v26 }
 0x3af   : > { %7298 = vmatmul.mubr.msk.bf16.gmra.mrb[124].mxu1 %vm12134_vm15, %v10778_v13  ;;  %vm12169_vm15 = vnez %v12168_v9  ;;  %v7915_v13 = vld [vmem:[#allocation8 + $0x218] sm:$0xff]   ;;  %v12176_v9 = vld [vmem:[#allocation42_spill] sm:$0xff] }
 0x3b0   : > { %4853 = vmatprep.mubr.bf16.mxu1 %v12161_v55 }
 0x3b3   : > { %4291 = vmatmul.mubr.bf16.vlgmr.msra.gmra.mrb[224].mxu0 %v12139_v26 }
 0x3b4   : > { %4298 = vmatprep.mubr.bf16.mxu0 %v12162_v8  ;;  %v12171_v8 = vld [vmem:[#allocation33_spill] sm:$0xff] }
 0x3b5   : > { %vm12172_vm14 = vnez %v12171_v8 }
 0x3b7   : > { %6128 = vmatmul.mubr.msk.bf16.vlgmr.msra.gmra.mrb[128].mxu1 %vm12165_vm1, %v12163_v43 }
 0x3b8   : > { %7302 = vmatpush3.bf16.msra.mxu1 %v7912_v33  ;;  %4861 = vmatprep.mubr.bf16.mxu1 %v12166_v37  ;;  %v7916_v33 = vld [vmem:[#allocation8 + $0x220] sm:$0xff]  }
 0x3b9   : > { %7303 = vmatprep.subr.bf16.mxu1 %v7913_v25 }
 0x3bb   : > { %6008 = vmatmul.mubr.msk.bf16.gmra.mrb[228].mxu0 %vm12169_vm15, %v12167_v56  ;;  %v7917_v56 = vld [vmem:[#allocation8 + $0x228] sm:$0xff]  }
 0x3bc   : > { %7304 = vmatpush3.bf16.msra.mxu1 %v7913_v25  ;;  %4306 = vmatprep.mubr.bf16.mxu0 %v12161_v55  ;;  %v12174_v25 = vld [vmem:[#allocation38_spill] sm:$0xff]  ;;  %v12182_v55 = vld [vmem:[#allocation32_spill] sm:$0xff] }
 0x3bd   : > { %7305 = vmatprep.subr.bf16.mxu1 %v7914_v29  ;;  %vm12175_vm15 = vnez %v12174_v25 }
 0x3bf   : > { %6132 = vmatmul.mubr.msk.bf16.gmra.mrb[132].mxu1 %vm12172_vm14, %v12170_v4 }
 0x3c0   : > { %4869 = vmatprep.mubr.bf16.mxu1 %v12173_v62  ;;  %7306 = vmatpush3.bf16.msra.mxu1 %v7914_v29  ;;  %v7918_v29 = vld [vmem:[#allocation8 + $0x230] sm:$0xff]  }
 0x3c1   : > { %7307 = vmatprep.subr.bf16.mxu1 %v7915_v13 }
 0x3c3   : > { %6012 = vmatmul.mubr.msk.bf16.gmra.mrb[232].mxu0 %vm12165_vm1, %v12163_v43  ;;  %vm12177_vm1 = vnez %v12112_v63 }
 0x3c4   : > { %7308 = vmatpush3.bf16.msra.mxu1 %v7915_v13  ;;  %4314 = vmatprep.mubr.bf16.mxu0 %v12166_v37  ;;  %v7919_v13 = vld [vmem:[#allocation8 + $0x238] sm:$0xff]  }
 0x3c5   : > { %7309 = vmatprep.subr.bf16.mxu1 %v7916_v33 }
 0x3c7   : > { %6136 = vmatmul.mubr.msk.bf16.gmra.mrb[136].mxu1 %vm12175_vm15, %v10656_v20 }
 0x3c8   : > { %4877 = vmatprep.mubr.bf16.mxu1 %v12176_v9  ;;  %7310 = vmatpush3.bf16.msra.mxu1 %v7916_v33 }
 0x3c9   : > { %7311 = vmatprep.subr.bf16.mxu1 %v7917_v56 }
 0x3cb   : > { %6016 = vmatmul.mubr.msk.bf16.gmra.mrb[236].mxu0 %vm12172_vm14, %v12170_v4  ;;  %vm12178_vm14 = vnez %v12123_v23 }
 0x3cc   : > { %7312 = vmatpush3.bf16.msra.mxu1 %v7917_v56  ;;  %4322 = vmatprep.mubr.bf16.mxu0 %v12173_v62 }
 0x3cd   : > { %7313 = vmatprep.subr.bf16.mxu1 %v7918_v29 }
 0x3cf   : > { %6140 = vmatmul.mubr.msk.bf16.gmra.mrb[140].mxu1 %vm12177_vm1, %v10691_v27 }
 0x3d0   : > { %4885 = vmatprep.mubr.bf16.mxu1 %v10677_v61  ;;  %7314 = vmatpush3.bf16.msra.mxu1 %v7918_v29 }
 0x3d1   : > { %7315 = vmatprep.subr.bf16.mxu1 %v7919_v13 }
 0x3d3   : > { %6020 = vmatmul.mubr.msk.bf16.gmra.mrb[240].mxu0 %vm12175_vm15, %v10656_v20 }
 0x3d4   : > { %7316 = vmatpush3.bf16.msra.mxu1 %v7919_v13  ;;  %4330 = vmatprep.mubr.bf16.mxu0 %v12176_v9 }
 0x3d7   : > { %6144 = vmatmul.mubr.msk.bf16.gmra.mrb[144].mxu1 %vm12178_vm14, %v10722_v34 }
 0x3d8   : > { %4893 = vmatprep.mubr.bf16.mxu1 %v10708_v59 }
 0x3db   : > { %6024 = vmatmul.mubr.msk.bf16.gmra.mrb[244].mxu0 %vm12177_vm1, %v10691_v27 }
 0x3dc   : > { %4338 = vmatprep.mubr.bf16.mxu0 %v10677_v61 }
 0x3df   : > { %6148 = vmatmul.mubr.msk.bf16.gmra.mrb[148].mxu1 %vm12179_vm10, %v10757_v41 }
 0x3e0   : > { %4901 = vmatprep.mubr.bf16.mxu1 %v10743_v6 }
 0x3e3   : > { %6028 = vmatmul.mubr.msk.bf16.gmra.mrb[248].mxu0 %vm12178_vm14, %v10722_v34 }
 0x3e4   : > { %4346 = vmatprep.mubr.bf16.mxu0 %v10708_v59 }
 0x3e7   : > { %6152 = vmatmul.mubr.msk.bf16.gmra.mrb[152].mxu1 %vm12136_vm9, %v10788_v16 }
 0x3e8   : > { %4909 = vmatprep.mubr.bf16.mxu1 %v10774_v1 }
 0x3eb   : > { %6032 = vmatmul.mubr.msk.bf16.gmra.mrb[252].mxu0 %vm12179_vm10, %v10757_v41  ;;  %vm12184_vm10 = vnez %v12146_v14 }
 0x3ec   : > { %4354 = vmatprep.mubr.bf16.mxu0 %v10743_v6 }
 0x3ef   : > { %6156 = vmatmul.mubr.msk.bf16.gmra.mrb[156].mxu1 %vm12141_vm7, %v10811_v30 }
 0x3f0   : > { %4917 = vmatprep.mubr.bf16.mxu1 %v10806_v40 }
 0x3f3   : > { %6036 = vmatmul.mubr.msk.bf16.gmra.mrb[0].mxu0 %vm12136_vm9, %v10788_v16 }
 0x3f4   : > { %4362 = vmatprep.mubr.bf16.mxu0 %v10774_v1 }
 0x3f7   : > { %6160 = vmatmul.mubr.msk.bf16.gmra.mrb[160].mxu1 %vm12143_vm6, %v10838_v53 }
 0x3f8   : > { %4925 = vmatprep.mubr.bf16.mxu1 %v10818_v10 }
 0x3fb   : > { %6040 = vmatmul.mubr.msk.bf16.gmra.mrb[4].mxu0 %vm12141_vm7, %v10811_v30 }
 0x3fc   : > { %4370 = vmatprep.mubr.bf16.mxu0 %v10806_v40 }
 0x3ff   : > { %6164 = vmatmul.mubr.msk.bf16.gmra.mrb[164].mxu1 %vm12145_vm3, %v10846_v49 }
 0x400   : > { %4933 = vmatprep.mubr.bf16.mxu1 %v10827_v42 }
 0x403   : > { %6044 = vmatmul.mubr.msk.bf16.gmra.mrb[8].mxu0 %vm12143_vm6, %v10838_v53 }
 0x404   : > { %4378 = vmatprep.mubr.bf16.mxu0 %v10818_v10 }
 0x405   : > { %v6669_v59 = vpop.f32.mrb[160].mxu0 }
 0x406   : > { %v6670_v1 = vpop.f32.mrb[161].mxu0 }
 0x407   : > { %6168 = vmatmul.mubr.msk.bf16.gmra.mrb[168].mxu1 %vm12148_vm4, %v10853_v3  ;;  %v11098_v27 = vadd.f32 %v6670_v1, %v6669_v59  ;;  %v6672_v20 = vpop.f32.mrb[162].mxu0  ;;  %v12188_v1 = vld [vmem:[#allocation57_spill] sm:$0xff] }
 0x408   : > { %4941 = vmatprep.mubr.bf16.mxu1 %v10835_v54  ;;  %v6673_v61 = vpop.f32.mrb[163].mxu0 }
 0x409   : > { %v11100_v4 = vadd.f32 %v6673_v61, %v6672_v20 }
 0x40b   : > { %6048 = vmatmul.mubr.msk.bf16.gmra.mrb[12].mxu0 %vm12145_vm3, %v10846_v49 }
 0x40c   : > { %4386 = vmatprep.mubr.bf16.mxu0 %v10827_v42 }
 0x40d   : > { %v6675_v41 = vpop.f32.mrb[164].mxu0 }
 0x40e   : > { %v6676_v34 = vpop.f32.mrb[165].mxu0 }
 0x40f   : > { %6172 = vmatmul.mubr.msk.bf16.gmra.mrb[172].mxu1 %vm12152_vm12, %v10873_v12  ;;  %v11110_v6 = vadd.f32 %v6676_v34, %v6675_v41  ;;  %v6678_v37 = vpop.f32.mrb[166].mxu0  ;;  %v12190_v41 = vld [vmem:[#allocation41_spill] sm:$0xff]  ;;  %v12191_v34 = vld [vmem:[#allocation58_spill] sm:$0xff] }
 0x410   : > { %4949 = vmatprep.mubr.bf16.mxu1 %v10857_v47  ;;  %v6679_v16 = vpop.f32.mrb[167].mxu0 }
 0x411   : > { %v11112_v40 = vadd.f32 %v6679_v16, %v6678_v37  ;;  %v12193_v37 = vld [vmem:[#allocation45_spill] sm:$0xff]  ;;  %v12194_v16 = vld [vmem:[#allocation59_spill] sm:$0xff] }
 0x413   : > { %6052 = vmatmul.mubr.msk.bf16.gmra.mrb[16].mxu0 %vm12148_vm4, %v10853_v3  ;;  %vm12189_vm4 = vnez %v12188_v1 }
 0x414   : > { %4394 = vmatprep.mubr.bf16.mxu0 %v10835_v54 }
 0x415   : > { %v6681_v49 = vpop.f32.mrb[168].mxu0 }
 0x416   : > { %v6682_v30 = vpop.f32.mrb[169].mxu0 }
 0x417   : > { %6176 = vmatmul.mubr.msk.bf16.gmra.mrb[176].mxu1 %vm12154_vm2, %v10886_v35  ;;  %v11122_v10 = vadd.f32 %v6682_v30, %v6681_v49  ;;  %v6684_v42 = vpop.f32.mrb[170].mxu0 }
 0x418   : > { %4957 = vmatprep.mubr.bf16.mxu1 %v10868_v22  ;;  %v6685_v53 = vpop.f32.mrb[171].mxu0 }
 0x419   : > { %v11124_v63 = vadd.f32 %v6685_v53, %v6684_v42  ;;  %v12196_v53 = vld [vmem:[#allocation43_spill] sm:$0xff] }
 0x41b   : > { %6056 = vmatmul.mubr.msk.bf16.gmra.mrb[20].mxu0 %vm12152_vm12, %v10873_v12  ;;  %vm12192_vm12 = vnez %v12191_v34 }
 0x41c   : > { %4402 = vmatprep.mubr.bf16.mxu0 %v10857_v47 }
 0x41d   : > { %v6687_v57 = vpop.f32.mrb[172].mxu0 }
 0x41e   : > { %v6688_v54 = vpop.f32.mrb[173].mxu0 }
 0x41f   : > { %6180 = vmatmul.mubr.msk.bf16.gmra.mrb[180].mxu1 %vm12157_vm13, %v10896_v11  ;;  %v11134_v3 = vadd.f32 %v6688_v54, %v6687_v57  ;;  %v6690_v62 = vpop.f32.mrb[174].mxu0  ;;  %v12197_v57 = vld [vmem:[#allocation60_spill] sm:$0xff]  ;;  %v12199_v54 = vld [vmem:[#allocation46_spill] sm:$0xff] }
 0x420   : > { %4965 = vmatprep.mubr.bf16.mxu1 %v10881_v58  ;;  %v6691_v23 = vpop.f32.mrb[175].mxu0 }
 0x421   : > { %v11136_v43 = vadd.f32 %v6691_v23, %v6690_v62  ;;  %v12200_v62 = vld [vmem:[#allocation61_spill] sm:$0xff] }
 0x423   : > { %6060 = vmatmul.mubr.msk.bf16.gmra.mrb[24].mxu0 %vm12154_vm2, %v10886_v35  ;;  %vm12195_vm2 = vnez %v12194_v16 }
 0x424   : > { %4410 = vmatprep.mubr.bf16.mxu0 %v10868_v22 }
 0x426   : > { %v6693_v47 = vpop.f32.mrb[176].mxu0 }
 0x427   : > { %6184 = vmatmul.mubr.msk.bf16.gmra.mrb[184].mxu1 %vm12160_vm11, %v10904_v52  ;;  %v6694_v12 = vpop.f32.mrb[177].mxu0  ;;  %vm12201_vm11 = vnez %v12200_v62 }
 0x428   : > { %4973 = vmatprep.mubr.bf16.mxu1 %v12139_v26  ;;  %v11146_v58 = vadd.f32 %v6694_v12, %v6693_v47  ;;  %v6696_v28 = vpop.f32.mrb[178].mxu0 }
 0x429   : > { %v6697_v7 = vpop.f32.mrb[179].mxu0 }
 0x42a   : > { %v11148_v24 = vadd.f32 %v6697_v7, %v6696_v28 }
 0x42b   : > { %6064 = vmatmul.mubr.msk.bf16.gmra.mrb[28].mxu0 %vm12157_vm13, %v10896_v11  ;;  %v12180_v11 = vld [vmem:[#allocation39_spill] sm:$0xff]  ;;  %vm12198_vm13 = vnez %v12197_v57 }
 0x42c   : > { %vm12181_vm6 = vnez %v12180_v11  ;;  %v12206_v11 = vld [vmem:[#allocation63_spill] sm:$0xff] }
 0x42d   : > { %vm12207_vm7 = vnez %v12206_v11 }
 0x42e   : > { %v6699_v22 = vpop.f32.mrb[180].mxu0 }
 0x42f   : > { %4974 = vmatmul.mubr.bf16.gmra.mrb[188].mxu1 %v12139_v26  ;;  %v6700_v35 = vpop.f32.mrb[181].mxu0 }
 0x430   : > { %7317 = vmatprep.mubr.msk.bf16.mxu1 %vm9540_vm5, %v10586_v48  ;;  %v11157_v52 = vadd.f32 %v6700_v35, %v6699_v22  ;;  %v6702_v51 = vpop.f32.mrb[182].mxu0  ;;  %vm12185_vm5 = vnez %v12150_v31  ;;  %v12202_v35 = vld [vmem:[#allocation16_spill] sm:$0xff] }
 0x431   : > { %v6703_v18 = vpop.f32.mrb[183].mxu0 }
 0x432   : > { %v11159_v32 = vadd.f32 %v6703_v18, %v6702_v51  ;;  %v12203_v51 = vld [vmem:[#allocation62_spill] sm:$0xff]  ;;  %v12205_v18 = vld [vmem:[#allocation47_spill] sm:$0xff] }
 0x433   : > { %vm12204_vm9 = vnez %v12203_v51 }
 0x436   : > { %v6705_v5 = vpop.f32.mrb[184].mxu0 }
 0x437   : > { %7318 = vmatmul.mubr.msk.bf16.vlgmr.msra.gmra.mrb[96].mxu1 %vm9554_vm0, %v10554_v17  ;;  %v6706_v2 = vpop.f32.mrb[185].mxu0  ;;  %vm12186_vm0 = vnez %v12102_v60 }
 0x438   : > { %7321 = vmatprep.mubr.msk.bf16.mxu1 %vm12181_vm6, %v10597_v15  ;;  %v11167_v46 = vadd.f32 %v6706_v2, %v6705_v5  ;;  %v6708_v48 = vpop.f32.mrb[186].mxu0 }
 0x439   : > { %v6709_v50 = vpop.f32.mrb[187].mxu0 }
 0x43a   : > { %v11169_v36 = vadd.f32 %v6709_v50, %v6708_v48 }
 0x43e   : > { %v6711_v17 = vpop.f32.mrb[188].mxu0 }
 0x43f   : > { %7322 = vmatmul.mubr.msk.bf16.gmra.mrb[100].mxu1 %vm9580_vm8, %v12182_v55  ;;  %v6712_v39 = vpop.f32.mrb[189].mxu0  ;;  %vm12187_vm8 = vnez %v12105_v38 }
 0x440   : > { %7325 = vmatprep.mubr.msk.bf16.mxu1 %vm12184_vm10, %v10632_v21  ;;  %v11177_v33 = vadd.f32 %v6712_v39, %v6711_v17  ;;  %v6714_v15 = vpop.f32.mrb[190].mxu0 }
 0x441   : > { %v6715_v56 = vpop.f32.mrb[191].mxu0 }
 0x442   : > { %v11179_v25 = vadd.f32 %v6715_v56, %v6714_v15 }
 0x446   : > { %v6717_v9 = vpop.f32.mrb[192].mxu0 }
 0x447   : > { %7326 = vmatmul.mubr.msk.bf16.gmra.mrb[104].mxu1 %vm12185_vm5, %v12149_v0  ;;  %v6718_v29 = vpop.f32.mrb[193].mxu0 }
 0x448   : > { %7329 = vmatprep.mubr.msk.bf16.mxu1 %vm12186_vm0, %v10664_v19  ;;  %v11187_v14 = vadd.f32 %v6718_v29, %v6717_v9  ;;  %v6720_v21 = vpop.f32.mrb[194].mxu0 }
 0x449   : > { %v6721_v13 = vpop.f32.mrb[195].mxu0 }
 0x44a   : > { %v11189_v59 = vadd.f32 %v6721_v13, %v6720_v21 }
 0x44e   : > { %v6723_v31 = vpop.f32.mrb[196].mxu0 }
 0x44f   : > { %7330 = vmatmul.mubr.msk.bf16.gmra.mrb[108].mxu1 %vm12187_vm8, %v10684_v45  ;;  %v6724_v0 = vpop.f32.mrb[197].mxu0 }
 0x450   : > { %7333 = vmatprep.mubr.msk.bf16.mxu1 %vm12189_vm4, %v10698_v44  ;;  %v11197_v60 = vadd.f32 %v6724_v0, %v6723_v31  ;;  %v6726_v19 = vpop.f32.mrb[198].mxu0 }
 0x451   : > { %v6727_v20 = vpop.f32.mrb[199].mxu0 }
 0x452   : > { %v11199_v61 = vadd.f32 %v6727_v20, %v6726_v19 }
 0x456   : > { %v6729_v45 = vpop.f32.mrb[200].mxu0 }
 0x457   : > { %7334 = vmatmul.mubr.msk.bf16.gmra.mrb[112].mxu1 %vm12192_vm12, %v12190_v41  ;;  %v6730_v38 = vpop.f32.mrb[201].mxu0 }
 0x458   : > { %7337 = vmatprep.mubr.msk.bf16.mxu1 %vm12195_vm2, %v12193_v37  ;;  %v11207_v49 = vadd.f32 %v6730_v38, %v6729_v45  ;;  %v6732_v44 = vpop.f32.mrb[202].mxu0 }
 0x459   : > { %v6733_v30 = vpop.f32.mrb[203].mxu0 }
 0x45a   : > { %v11209_v42 = vadd.f32 %v6733_v30, %v6732_v44 }
 0x45e   : > { %v6735_v23 = vpop.f32.mrb[204].mxu0 }
 0x45f   : > { %7338 = vmatmul.mubr.msk.bf16.gmra.mrb[116].mxu1 %vm12198_vm13, %v12196_v53  ;;  %v6736_v47 = vpop.f32.mrb[205].mxu0 }
 0x460   : > { %7341 = vmatprep.mubr.msk.bf16.mxu1 %vm12201_vm11, %v12199_v54  ;;  %v11217_v12 = vadd.f32 %v6736_v47, %v6735_v23  ;;  %v6738_v28 = vpop.f32.mrb[206].mxu0 }
 0x461   : > { %v6739_v7 = vpop.f32.mrb[207].mxu0 }
 0x462   : > { %v11219_v22 = vadd.f32 %v6739_v7, %v6738_v28 }
 0x466   : > { %v6741_v5 = vpop.f32.mrb[208].mxu0 }
 0x467   : > { %7342 = vmatmul.mubr.msk.bf16.gmra.mrb[120].mxu1 %vm12204_vm9, %v12202_v35  ;;  %v6742_v2 = vpop.f32.mrb[209].mxu0 }
 0x468   : > { %7345 = vmatprep.mubr.msk.bf16.mxu1 %vm12207_vm7, %v12205_v18  ;;  %v11227_v48 = vadd.f32 %v6742_v2, %v6741_v5  ;;  %v6744_v50 = vpop.f32.mrb[210].mxu0 }
 0x469   : > { %v6745_v55 = vpop.f32.mrb[211].mxu0 }
 0x46a   : > { %v11229_v8 = vadd.f32 %v6745_v55, %v6744_v50 }
 0x46e   : > { %v6747_v17 = vpop.f32.mrb[212].mxu0 }
 0x46f   : > { %7346 = vmatmul.mubr.bf16.gmra.mrb[124].mxu1 %v12139_v26  ;;  %v6748_v39 = vpop.f32.mrb[213].mxu0 }
 0x470   : > { %v11232_v15 = vadd.f32 %v6748_v39, %v6747_v17  ;;  %v6750_v56 = vpop.f32.mrb[214].mxu0 }
 0x471   : > { %v6751_v9 = vpop.f32.mrb[215].mxu0 }
 0x472   : > { %v11234_v29 = vadd.f32 %v6751_v9, %v6750_v56 }
 0x476   : > { %v6753_v21 = vpop.f32.mrb[216].mxu0 }
 0x477   : > { %v6754_v13 = vpop.f32.mrb[217].mxu0 }
 0x478   : > { %v11236_v1 = vadd.f32 %v6754_v13, %v6753_v21  ;;  %v6756_v31 = vpop.f32.mrb[218].mxu0 }
 0x479   : > { %v6757_v0 = vpop.f32.mrb[219].mxu0 }
 0x47a   : > { %v11238_v19 = vadd.f32 %v6757_v0, %v6756_v31 }
 0x47e   : > { %v6759_v20 = vpop.f32.mrb[220].mxu0 }
 0x47f   : > { %v6760_v41 = vpop.f32.mrb[221].mxu0 }
 0x480   : > { %v11240_v34 = vadd.f32 %v6760_v41, %v6759_v20  ;;  %v6762_v26 = vpop.f32.mrb[222].mxu0 }
 0x481   : > { %v6763_v37 = vpop.f32.mrb[223].mxu0 }
 0x482   : > { %v11242_v16 = vadd.f32 %v6763_v37, %v6762_v26 }
 0x486   : > { %v6805_v45 = vpop.f32.mrb[224].mxu0 }
 0x487   : > { %v6806_v38 = vpop.f32.mrb[225].mxu0 }
 0x488   : > { %v6807_v44 = vadd.f32 %v6806_v38, %v6805_v45  ;;  %v6808_v53 = vpop.f32.mrb[226].mxu0 }
 0x489   : > { %v6809_v54 = vpop.f32.mrb[227].mxu0 }
 0x48a   : > { %v6941_v30 = vpop.f32.mrb[128].mxu1  ;;  %v7480_v62 = vadd.f32 %v6807_v44, %v11098_v27  ;;  %v6810_v47 = vadd.f32 %v6809_v54, %v6808_v53 }
 0x48b   : > { %v6942_v57 = vpop.f32.mrb[129].mxu1 }
 0x48c   : > { %v6943_v23 = vadd.f32 %v6942_v57, %v6941_v30  ;;  %v6944_v28 = vpop.f32.mrb[130].mxu1  ;;  %v7486_v35 = vadd.f32 %v6810_v47, %v11100_v4 }
 0x48d   : > { %v6945_v7 = vpop.f32.mrb[131].mxu1 }
 0x48e   : > { %v6946_v51 = vadd.f32 %v6945_v7, %v6944_v28  ;;  %v11246_v18 = vadd.f32 %v7480_v62, %v6943_v23  ;;  %v6811_v11 = vpop.f32.mrb[228].mxu0 }
 0x48f   : > { %v6812_v2 = vpop.f32.mrb[229].mxu0 }
 0x490   : > { %v11248_v5 = vadd.f32 %v7486_v35, %v6946_v51  ;;  %v6813_v50 = vadd.f32 %v6812_v2, %v6811_v11  ;;  %v6814_v17 = vpop.f32.mrb[230].mxu0 }
 0x491   : > { %v6815_v56 = vpop.f32.mrb[231].mxu0 }
 0x492   : > { %v6947_v55 = vpop.f32.mrb[132].mxu1  ;;  %v7477_v27 = vadd.f32 %v6813_v50, %v11110_v6  ;;  %v6816_v21 = vadd.f32 %v6815_v56, %v6814_v17 }
 0x493   : > { %v6948_v39 = vpop.f32.mrb[133].mxu1 }
 0x494   : > { %v6949_v9 = vadd.f32 %v6948_v39, %v6947_v55  ;;  %v6950_v13 = vpop.f32.mrb[134].mxu1  ;;  %v7483_v4 = vadd.f32 %v6816_v21, %v11112_v40 }
 0x495   : > { %v6951_v31 = vpop.f32.mrb[135].mxu1 }
 0x496   : > { %v6952_v0 = vadd.f32 %v6951_v31, %v6950_v13  ;;  %v11252_v20 = vadd.f32 %v7477_v27, %v6949_v9  ;;  %v6817_v41 = vpop.f32.mrb[232].mxu0 }
 0x497   : > { %v6818_v37 = vpop.f32.mrb[233].mxu0 }
 0x498   : > { %v11254_v26 = vadd.f32 %v7483_v4, %v6952_v0  ;;  %v6819_v45 = vadd.f32 %v6818_v37, %v6817_v41  ;;  %v6820_v44 = vpop.f32.mrb[234].mxu0 }
 0x499   : > { %v6821_v53 = vpop.f32.mrb[235].mxu0 }
 0x49a   : > { %v6953_v38 = vpop.f32.mrb[136].mxu1  ;;  %v7492_v6 = vadd.f32 %v6819_v45, %v11122_v10  ;;  %v6822_v54 = vadd.f32 %v6821_v53, %v6820_v44 }
 0x49b   : > { %v6954_v30 = vpop.f32.mrb[137].mxu1 }
 0x49c   : > { %v6955_v57 = vadd.f32 %v6954_v30, %v6953_v38  ;;  %v6956_v62 = vpop.f32.mrb[138].mxu1  ;;  %v7498_v40 = vadd.f32 %v6822_v54, %v11124_v63 }
 0x49d   : > { %v6957_v23 = vpop.f32.mrb[139].mxu1 }
 0x49e   : > { %v6958_v47 = vadd.f32 %v6957_v23, %v6956_v62  ;;  %v11258_v28 = vadd.f32 %v7492_v6, %v6955_v57  ;;  %v6823_v7 = vpop.f32.mrb[236].mxu0 }
 0x49f   : > { %v6824_v51 = vpop.f32.mrb[237].mxu0 }
 0x4a0   : > { %v11260_v35 = vadd.f32 %v7498_v40, %v6958_v47  ;;  %v6825_v11 = vadd.f32 %v6824_v51, %v6823_v7  ;;  %v6826_v50 = vpop.f32.mrb[238].mxu0 }
 0x4a1   : > { %v6827_v17 = vpop.f32.mrb[239].mxu0 }
 0x4a2   : > { %v6959_v2 = vpop.f32.mrb[140].mxu1  ;;  %v7489_v10 = vadd.f32 %v6825_v11, %v11134_v3  ;;  %v6828_v56 = vadd.f32 %v6827_v17, %v6826_v50 }
 0x4a3   : > { %v6960_v55 = vpop.f32.mrb[141].mxu1 }
 0x4a4   : > { %v6961_v39 = vadd.f32 %v6960_v55, %v6959_v2  ;;  %v6962_v27 = vpop.f32.mrb[142].mxu1  ;;  %v7495_v63 = vadd.f32 %v6828_v56, %v11136_v43 }
 0x4a5   : > { %v6963_v9 = vpop.f32.mrb[143].mxu1 }
 0x4a6   : > { %v6964_v21 = vadd.f32 %v6963_v9, %v6962_v27  ;;  %v11264_v13 = vadd.f32 %v7489_v10, %v6961_v39  ;;  %v6829_v31 = vpop.f32.mrb[240].mxu0 }
 0x4a7   : > { %v6830_v0 = vpop.f32.mrb[241].mxu0 }
 0x4a8   : > { %v11266_v4 = vadd.f32 %v7495_v63, %v6964_v21  ;;  %v6831_v41 = vadd.f32 %v6830_v0, %v6829_v31  ;;  %v6832_v45 = vpop.f32.mrb[242].mxu0 }
 0x4a9   : > { %v6833_v44 = vpop.f32.mrb[243].mxu0 }
 0x4aa   : > { %v6965_v37 = vpop.f32.mrb[144].mxu1  ;;  %v7504_v3 = vadd.f32 %v6831_v41, %v11146_v58  ;;  %v6834_v53 = vadd.f32 %v6833_v44, %v6832_v45 }
 0x4ab   : > { %v6966_v38 = vpop.f32.mrb[145].mxu1 }
 0x4ac   : > { %v6967_v30 = vadd.f32 %v6966_v38, %v6965_v37  ;;  %v6968_v6 = vpop.f32.mrb[146].mxu1  ;;  %v7510_v43 = vadd.f32 %v6834_v53, %v11148_v24 }
 0x4ad   : > { %v6969_v57 = vpop.f32.mrb[147].mxu1 }
 0x4ae   : > { %v6970_v54 = vadd.f32 %v6969_v57, %v6968_v6  ;;  %v11270_v62 = vadd.f32 %v7504_v3, %v6967_v30  ;;  %v6835_v23 = vpop.f32.mrb[244].mxu0 }
 0x4af   : > { %v6836_v47 = vpop.f32.mrb[245].mxu0 }
 0x4b0   : > { %v11272_v40 = vadd.f32 %v7510_v43, %v6970_v54  ;;  %v6837_v7 = vadd.f32 %v6836_v47, %v6835_v23  ;;  %v6838_v11 = vpop.f32.mrb[246].mxu0 }
 0x4b1   : > { %v6839_v50 = vpop.f32.mrb[247].mxu0 }
 0x4b2   : > { %v6971_v51 = vpop.f32.mrb[148].mxu1  ;;  %v7501_v58 = vadd.f32 %v6837_v7, %v11157_v52  ;;  %v6840_v17 = vadd.f32 %v6839_v50, %v6838_v11 }
 0x4b3   : > { %v6972_v2 = vpop.f32.mrb[149].mxu1 }
 0x4b4   : > { %v6973_v55 = vadd.f32 %v6972_v2, %v6971_v51  ;;  %v6974_v10 = vpop.f32.mrb[150].mxu1  ;;  %v7507_v24 = vadd.f32 %v6840_v17, %v11159_v32 }
 0x4b5   : > { %v6975_v39 = vpop.f32.mrb[151].mxu1 }
 0x4b6   : > { %v6976_v56 = vadd.f32 %v6975_v39, %v6974_v10  ;;  %v11276_v27 = vadd.f32 %v7501_v58, %v6973_v55  ;;  %v6841_v9 = vpop.f32.mrb[248].mxu0 }
 0x4b7   : > { %v6842_v21 = vpop.f32.mrb[249].mxu0 }
 0x4b8   : > { %v11278_v63 = vadd.f32 %v7507_v24, %v6976_v56  ;;  %v6843_v31 = vadd.f32 %v6842_v21, %v6841_v9  ;;  %v6844_v41 = vpop.f32.mrb[250].mxu0 }
 0x4b9   : > { %v6845_v45 = vpop.f32.mrb[251].mxu0 }
 0x4ba   : > { %v6977_v0 = vpop.f32.mrb[152].mxu1  ;;  %v7516_v52 = vadd.f32 %v6843_v31, %v11167_v46  ;;  %v6846_v44 = vadd.f32 %v6845_v45, %v6844_v41 }
 0x4bb   : > { %v6978_v37 = vpop.f32.mrb[153].mxu1 }
 0x4bc   : > { %v6979_v38 = vadd.f32 %v6978_v37, %v6977_v0  ;;  %v6980_v3 = vpop.f32.mrb[154].mxu1  ;;  %v7522_v32 = vadd.f32 %v6846_v44, %v11169_v36 }
 0x4bd   : > { %v6981_v30 = vpop.f32.mrb[155].mxu1 }
 0x4be   : > { %v6982_v53 = vadd.f32 %v6981_v30, %v6980_v3  ;;  %v11282_v6 = vadd.f32 %v7516_v52, %v6979_v38  ;;  %v6847_v57 = vpop.f32.mrb[252].mxu0 }
 0x4bf   : > { %v6848_v54 = vpop.f32.mrb[253].mxu0 }
 0x4c0   : > { %v11284_v43 = vadd.f32 %v7522_v32, %v6982_v53  ;;  %v6849_v23 = vadd.f32 %v6848_v54, %v6847_v57  ;;  %v6850_v7 = vpop.f32.mrb[254].mxu0 }
 0x4c1   : > { %v6851_v11 = vpop.f32.mrb[255].mxu0 }
 0x4c2   : > { %v6983_v47 = vpop.f32.mrb[156].mxu1  ;;  %v7513_v46 = vadd.f32 %v6849_v23, %v11177_v33  ;;  %v6852_v50 = vadd.f32 %v6851_v11, %v6850_v7 }
 0x4c3   : > { %v6984_v51 = vpop.f32.mrb[157].mxu1 }
 0x4c4   : > { %v6985_v2 = vadd.f32 %v6984_v51, %v6983_v47  ;;  %v6986_v58 = vpop.f32.mrb[158].mxu1  ;;  %v7519_v36 = vadd.f32 %v6852_v50, %v11179_v25 }
 0x4c5   : > { %v6987_v55 = vpop.f32.mrb[159].mxu1 }
 0x4c6   : > { %v6988_v17 = vadd.f32 %v6987_v55, %v6986_v58  ;;  %v11288_v10 = vadd.f32 %v7513_v46, %v6985_v2  ;;  %v6853_v39 = vpop.f32.mrb[0].mxu0 }
 0x4c7   : > { %v6854_v56 = vpop.f32.mrb[1].mxu0 }
 0x4c8   : > { %v11290_v24 = vadd.f32 %v7519_v36, %v6988_v17  ;;  %v6855_v9 = vadd.f32 %v6854_v56, %v6853_v39  ;;  %v6856_v31 = vpop.f32.mrb[2].mxu0 }
 0x4c9   : > { %v6857_v41 = vpop.f32.mrb[3].mxu0 }
 0x4ca   : > { %v6989_v21 = vpop.f32.mrb[160].mxu1  ;;  %v7528_v33 = vadd.f32 %v6855_v9, %v11187_v14  ;;  %v6858_v45 = vadd.f32 %v6857_v41, %v6856_v31 }
 0x4cb   : > { %v6990_v0 = vpop.f32.mrb[161].mxu1 }
 0x4cc   : > { %v6991_v37 = vadd.f32 %v6990_v0, %v6989_v21  ;;  %v6992_v52 = vpop.f32.mrb[162].mxu1  ;;  %v7534_v25 = vadd.f32 %v6858_v45, %v11189_v59 }
 0x4cd   : > { %v6993_v38 = vpop.f32.mrb[163].mxu1 }
 0x4ce   : > { %v6994_v44 = vadd.f32 %v6993_v38, %v6992_v52  ;;  %v11294_v3 = vadd.f32 %v7528_v33, %v6991_v37  ;;  %v6859_v30 = vpop.f32.mrb[4].mxu0 }
 0x4cf   : > { %v6860_v53 = vpop.f32.mrb[5].mxu0 }
 0x4d0   : > { %v11296_v32 = vadd.f32 %v7534_v25, %v6994_v44  ;;  %v6861_v57 = vadd.f32 %v6860_v53, %v6859_v30  ;;  %v6862_v23 = vpop.f32.mrb[6].mxu0 }
 0x4d1   : > { %v6863_v7 = vpop.f32.mrb[7].mxu0 }
 0x4d2   : > { %v6995_v54 = vpop.f32.mrb[164].mxu1  ;;  %v7525_v14 = vadd.f32 %v6861_v57, %v11197_v60  ;;  %v6864_v11 = vadd.f32 %v6863_v7, %v6862_v23 }
 0x4d3   : > { %v6996_v47 = vpop.f32.mrb[165].mxu1 }
 0x4d4   : > { %v6997_v51 = vadd.f32 %v6996_v47, %v6995_v54  ;;  %v6998_v46 = vpop.f32.mrb[166].mxu1  ;;  %v7531_v59 = vadd.f32 %v6864_v11, %v11199_v61 }
 0x4d5   : > { %v6999_v2 = vpop.f32.mrb[167].mxu1 }
 0x4d6   : > { %v7000_v50 = vadd.f32 %v6999_v2, %v6998_v46  ;;  %v11300_v58 = vadd.f32 %v7525_v14, %v6997_v51  ;;  %v6865_v55 = vpop.f32.mrb[8].mxu0 }
 0x4d7   : > { %v6866_v17 = vpop.f32.mrb[9].mxu0 }
 0x4d8   : > { %v11302_v36 = vadd.f32 %v7531_v59, %v7000_v50  ;;  %v6867_v39 = vadd.f32 %v6866_v17, %v6865_v55  ;;  %v6868_v9 = vpop.f32.mrb[10].mxu0 }
 0x4d9   : > { %v6869_v31 = vpop.f32.mrb[11].mxu0 }
 0x4da   : > { %v7001_v56 = vpop.f32.mrb[168].mxu1  ;;  %v7540_v60 = vadd.f32 %v6867_v39, %v11207_v49  ;;  %v6870_v41 = vadd.f32 %v6869_v31, %v6868_v9 }
 0x4db   : > { %v7002_v21 = vpop.f32.mrb[169].mxu1 }
 0x4dc   : > { %v7003_v0 = vadd.f32 %v7002_v21, %v7001_v56  ;;  %v7004_v33 = vpop.f32.mrb[170].mxu1  ;;  %v7546_v61 = vadd.f32 %v6870_v41, %v11209_v42 }
 0x4dd   : > { %v7005_v37 = vpop.f32.mrb[171].mxu1 }
 0x4de   : > { %v7006_v45 = vadd.f32 %v7005_v37, %v7004_v33  ;;  %v11306_v52 = vadd.f32 %v7540_v60, %v7003_v0  ;;  %v6871_v38 = vpop.f32.mrb[12].mxu0 }
 0x4df   : > { %v6872_v44 = vpop.f32.mrb[13].mxu0 }
 0x4e0   : > { %v11308_v25 = vadd.f32 %v7546_v61, %v7006_v45  ;;  %v6873_v30 = vadd.f32 %v6872_v44, %v6871_v38  ;;  %v6874_v57 = vpop.f32.mrb[14].mxu0 }
 0x4e1   : > { %v6875_v23 = vpop.f32.mrb[15].mxu0 }
 0x4e2   : > { %v7007_v53 = vpop.f32.mrb[172].mxu1  ;;  %v7537_v49 = vadd.f32 %v6873_v30, %v11217_v12  ;;  %v6876_v7 = vadd.f32 %v6875_v23, %v6874_v57 }
 0x4e3   : > { %v7008_v54 = vpop.f32.mrb[173].mxu1 }
 0x4e4   : > { %v7009_v47 = vadd.f32 %v7008_v54, %v7007_v53  ;;  %v7010_v14 = vpop.f32.mrb[174].mxu1  ;;  %v7543_v42 = vadd.f32 %v6876_v7, %v11219_v22 }
 0x4e5   : > { %v7011_v51 = vpop.f32.mrb[175].mxu1 }
 0x4e6   : > { %v7012_v11 = vadd.f32 %v7011_v51, %v7010_v14  ;;  %v11312_v46 = vadd.f32 %v7537_v49, %v7009_v47  ;;  %v6877_v2 = vpop.f32.mrb[16].mxu0 }
 0x4e7   : > { %v6878_v50 = vpop.f32.mrb[17].mxu0 }
 0x4e8   : > { %v11314_v59 = vadd.f32 %v7543_v42, %v7012_v11  ;;  %v6879_v55 = vadd.f32 %v6878_v50, %v6877_v2  ;;  %v6880_v39 = vpop.f32.mrb[18].mxu0 }
 0x4e9   : > { %v6881_v9 = vpop.f32.mrb[19].mxu0 }
 0x4ea   : > { %v7013_v17 = vpop.f32.mrb[176].mxu1  ;;  %v7552_v12 = vadd.f32 %v6879_v55, %v11227_v48  ;;  %v6882_v31 = vadd.f32 %v6881_v9, %v6880_v39 }
 0x4eb   : > { %v7014_v56 = vpop.f32.mrb[177].mxu1 }
 0x4ec   : > { %v7015_v21 = vadd.f32 %v7014_v56, %v7013_v17  ;;  %v7016_v60 = vpop.f32.mrb[178].mxu1  ;;  %v7558_v22 = vadd.f32 %v6882_v31, %v11229_v8 }
 0x4ed   : > { %v7017_v0 = vpop.f32.mrb[179].mxu1 }
 0x4ee   : > { %v7018_v41 = vadd.f32 %v7017_v0, %v7016_v60  ;;  %v11318_v33 = vadd.f32 %v7552_v12, %v7015_v21  ;;  %v6883_v37 = vpop.f32.mrb[20].mxu0 }
 0x4ef   : > { %v6884_v45 = vpop.f32.mrb[21].mxu0 }
 0x4f0   : > { %v11320_v61 = vadd.f32 %v7558_v22, %v7018_v41  ;;  %v6885_v38 = vadd.f32 %v6884_v45, %v6883_v37  ;;  %v6886_v30 = vpop.f32.mrb[22].mxu0 }
 0x4f1   : > { %v6887_v57 = vpop.f32.mrb[23].mxu0 }
 0x4f2   : > { %v7019_v44 = vpop.f32.mrb[180].mxu1  ;;  %v7549_v48 = vadd.f32 %v6885_v38, %v11232_v15  ;;  %v6888_v23 = vadd.f32 %v6887_v57, %v6886_v30 }
 0x4f3   : > { %v7020_v53 = vpop.f32.mrb[181].mxu1 }
 0x4f4   : > { %v7021_v54 = vadd.f32 %v7020_v53, %v7019_v44  ;;  %v7022_v49 = vpop.f32.mrb[182].mxu1  ;;  %v7555_v8 = vadd.f32 %v6888_v23, %v11234_v29 }
 0x4f5   : > { %v7023_v47 = vpop.f32.mrb[183].mxu1 }
 0x4f6   : > { %v7024_v7 = vadd.f32 %v7023_v47, %v7022_v49  ;;  %v11324_v14 = vadd.f32 %v7549_v48, %v7021_v54  ;;  %v6889_v51 = vpop.f32.mrb[24].mxu0 }
 0x4f7   : > { %v6890_v11 = vpop.f32.mrb[25].mxu0 }
 0x4f8   : > { %v11326_v42 = vadd.f32 %v7555_v8, %v7024_v7  ;;  %v6891_v2 = vadd.f32 %v6890_v11, %v6889_v51  ;;  %v6892_v55 = vpop.f32.mrb[26].mxu0 }
 0x4f9   : > { %v6893_v39 = vpop.f32.mrb[27].mxu0 }
 0x4fa   : > { %v7025_v50 = vpop.f32.mrb[184].mxu1  ;;  %v7564_v15 = vadd.f32 %v6891_v2, %v11236_v1  ;;  %v6894_v9 = vadd.f32 %v6893_v39, %v6892_v55  ;;  %v7924_v2 = vld [vmem:[%s8324_s30 + $0x10] sm:$0xff] }
 0x4fb   : > { %v7026_v17 = vpop.f32.mrb[185].mxu1 }
 0x4fc   : > { %v7027_v56 = vadd.f32 %v7026_v17, %v7025_v50  ;;  %v7028_v12 = vpop.f32.mrb[186].mxu1  ;;  %v7570_v29 = vadd.f32 %v6894_v9, %v11238_v19  ;;  %v7925_v17 = vld [vmem:[%s8324_s30] sm:$0xff] }
 0x4fd   : > { %v7029_v21 = vpop.f32.mrb[187].mxu1 }
 0x4fe   : > { %v7030_v31 = vadd.f32 %v7029_v21, %v7028_v12  ;;  %v11330_v60 = vadd.f32 %v7564_v15, %v7027_v56  ;;  %v6895_v0 = vpop.f32.mrb[28].mxu0  ;;  %v7927_v56 = vld [vmem:[%s8324_s30 + $0x8] sm:$0xff] }
 0x4ff   : > { %v6896_v41 = vpop.f32.mrb[29].mxu0 }
 0x500   : > { %v11332_v22 = vadd.f32 %v7570_v29, %v7030_v31  ;;  %v6897_v37 = vadd.f32 %v6896_v41, %v6895_v0  ;;  %v6898_v38 = vpop.f32.mrb[30].mxu0  ;;  %v7928_v31 = vld [vmem:[%s8324_s30 + $0x30] sm:$0xff] }
 0x501   : > { %v6899_v30 = vpop.f32.mrb[31].mxu0 }
 0x502   : > { %v7031_v45 = vpop.f32.mrb[188].mxu1  ;;  %v7561_v1 = vadd.f32 %v6897_v37, %v11240_v34  ;;  %v6900_v57 = vadd.f32 %v6899_v30, %v6898_v38  ;;  %v7930_v30 = vld [vmem:[%s8324_s30 + $0x38] sm:$0xff] }
 0x503   : > { %v7032_v44 = vpop.f32.mrb[189].mxu1 }
 0x504   : > { %v7033_v53 = vadd.f32 %v7032_v44, %v7031_v45  ;;  %v7034_v48 = vpop.f32.mrb[190].mxu1  ;;  %v7567_v54 = vadd.f32 %v6900_v57, %v11242_v16  ;;  %v7929_v45 = vld [vmem:[%s8324_s30 + $0x20] sm:$0xff] }
 0x505   : > { %v7035_v19 = vpop.f32.mrb[191].mxu1 }
 0x506   : > { %v7036_v23 = vadd.f32 %v7035_v19, %v7034_v48  ;;  %v11336_v49 = vadd.f32 %v7561_v1, %v7033_v53  ;;  %v7931_v1 = vld [vmem:[%s8324_s30 + $0x28] sm:$0xff]  ;;  %v7932_v19 = vld [vmem:[%s8324_s30 + $0x50] sm:$0xff] }
 0x508   : > { %v11338_v47 = vadd.f32 %v7567_v54, %v7036_v23 }
 0x50a   : > { %v7319_v8 = vpop.f32.mrb[96].mxu1 }
 0x50b   : > { %v7479_v7 = vadd.f32 %v11252_v20, %v7319_v8  ;;  %v5016_v51 = vpop.f32.mrb[97].mxu1 }
 0x50c   : > { %v7482_v34 = vadd.f32 %v11246_v18, %v5016_v51  ;;  %v7320_v11 = vpop.f32.mrb[98].mxu1  ;;  %v7926_v18 = vld [vmem:[%s8324_s30 + $0x18] sm:$0xff] }
 0x50d   : > { %v5177_v50 = vadd.f32 %v7924_v2, %v7479_v7  ;;  %v7485_v55 = vadd.f32 %v11254_v26, %v7320_v11  ;;  %v5019_v16 = vpop.f32.mrb[99].mxu1  ;;  %v7933_v7 = vld [vmem:[%s8324_s30 + $0x40] sm:$0xff]  ;;  %v7934_v11 = vld [vmem:[%s8324_s30 + $0x58] sm:$0xff]  ;;  %v7935_v2 = vld [vmem:[%s8324_s30 + $0x48] sm:$0xff] }
 0x50e   : > { %v5175_v39 = vadd.f32 %v7925_v17, %v7482_v34  ;;  %v7488_v15 = vadd.f32 %v11248_v5, %v5019_v16  ;;  %v7936_v17 = vld [vmem:[%s8324_s30 + $0x70] sm:$0xff] }
 0x50f   : > { %5209 = vst [vmem:[%s11348_s18 + $0x10] sm:$0xff] %v5177_v50  ;;  %v5178_v20 = vadd.f32 %v7926_v18, %v7485_v55 }
 0x510   : > { %5207 = vst [vmem:[%s11348_s18] sm:$0xff] %v5175_v39  ;;  %v5176_v26 = vadd.f32 %v7927_v56, %v7488_v15 }
 0x511   : > { %5210 = vst [vmem:[%s11348_s18 + $0x18] sm:$0xff] %v5178_v20  ;;  %v7937_v20 = vld [vmem:[%s8324_s30 + $0x60] sm:$0xff] }
 0x512   : > { %5208 = vst [vmem:[%s11348_s18 + $0x8] sm:$0xff] %v5176_v26  ;;  %v7323_v5 = vpop.f32.mrb[100].mxu1 }
 0x513   : > { %v7491_v9 = vadd.f32 %v11264_v13, %v7323_v5  ;;  %v5032_v12 = vpop.f32.mrb[101].mxu1  ;;  %v7938_v5 = vld [vmem:[%s8324_s30 + $0x78] sm:$0xff] }
 0x514   : > { %v7494_v21 = vadd.f32 %v11258_v28, %v5032_v12  ;;  %v7324_v29 = vpop.f32.mrb[102].mxu1 }
 0x515   : > { %v5181_v0 = vadd.f32 %v7928_v31, %v7491_v9  ;;  %v7497_v41 = vadd.f32 %v11266_v4, %v7324_v29  ;;  %v5035_v37 = vpop.f32.mrb[103].mxu1  ;;  %v7939_v9 = vld [vmem:[%s8324_s30 + $0x68] sm:$0xff]  ;;  %v7940_v31 = vld [vmem:[%s8324_s30 + $0x90] sm:$0xff] }
 0x516   : > { %v5179_v38 = vadd.f32 %v7929_v45, %v7494_v21  ;;  %v7500_v44 = vadd.f32 %v11260_v35, %v5035_v37  ;;  %v7941_v45 = vld [vmem:[%s8324_s30 + $0x80] sm:$0xff] }
 0x517   : > { %5213 = vst [vmem:[%s11348_s18 + $0x30] sm:$0xff] %v5181_v0  ;;  %v5182_v13 = vadd.f32 %v7930_v30, %v7497_v41  ;;  %v7942_v30 = vld [vmem:[%s8324_s30 + $0x98] sm:$0xff] }
 0x518   : > { %5211 = vst [vmem:[%s11348_s18 + $0x20] sm:$0xff] %v5179_v38  ;;  %v5180_v28 = vadd.f32 %v7931_v1, %v7500_v44 }
 0x519   : > { %5214 = vst [vmem:[%s11348_s18 + $0x38] sm:$0xff] %v5182_v13  ;;  %v7943_v13 = vld [vmem:[%s8324_s30 + $0x88] sm:$0xff] }
 0x51a   : > { %5212 = vst [vmem:[%s11348_s18 + $0x28] sm:$0xff] %v5180_v28  ;;  %v7327_v53 = vpop.f32.mrb[104].mxu1 }
 0x51b   : > { %v7503_v4 = vadd.f32 %v11276_v27, %v7327_v53  ;;  %v5048_v57 = vpop.f32.mrb[105].mxu1 }
 0x51c   : > { %v7506_v35 = vadd.f32 %v11270_v62, %v5048_v57  ;;  %v7328_v48 = vpop.f32.mrb[106].mxu1 }
 0x51d   : > { %v5185_v54 = vadd.f32 %v7932_v19, %v7503_v4  ;;  %v7509_v23 = vadd.f32 %v11278_v63, %v7328_v48  ;;  %v5051_v8 = vpop.f32.mrb[107].mxu1  ;;  %v7944_v4 = vld [vmem:[%s8324_s30 + $0xb0] sm:$0xff]  ;;  %v7945_v19 = vld [vmem:[%s8324_s30 + $0xa0] sm:$0xff] }
 0x51e   : > { %v5183_v51 = vadd.f32 %v7933_v7, %v7506_v35  ;;  %v7512_v34 = vadd.f32 %v11272_v40, %v5051_v8  ;;  %v7946_v8 = vld [vmem:[%s8324_s30 + $0xb8] sm:$0xff]  ;;  %v7947_v7 = vld [vmem:[%s8324_s30 + $0xa8] sm:$0xff] }
 0x51f   : > { %5217 = vst [vmem:[%s11348_s18 + $0x50] sm:$0xff] %v5185_v54  ;;  %v5186_v27 = vadd.f32 %v7934_v11, %v7509_v23 }
 0x520   : > { %5215 = vst [vmem:[%s11348_s18 + $0x40] sm:$0xff] %v5183_v51  ;;  %v5184_v62 = vadd.f32 %v7935_v2, %v7512_v34 }
 0x521   : > { %5218 = vst [vmem:[%s11348_s18 + $0x58] sm:$0xff] %v5186_v27  ;;  %v7948_v27 = vld [vmem:[%s8324_s30 + $0xd0] sm:$0xff] }
 0x522   : > { %5216 = vst [vmem:[%s11348_s18 + $0x48] sm:$0xff] %v5184_v62  ;;  %v7331_v50 = vpop.f32.mrb[108].mxu1 }
 0x523   : > { %v7515_v63 = vadd.f32 %v11288_v10, %v7331_v50  ;;  %v5064_v55 = vpop.f32.mrb[109].mxu1 }
 0x524   : > { %v7518_v40 = vadd.f32 %v11282_v6, %v5064_v55  ;;  %v7332_v16 = vpop.f32.mrb[110].mxu1 }
 0x525   : > { %v5189_v39 = vadd.f32 %v7936_v17, %v7515_v63  ;;  %v7521_v15 = vadd.f32 %v11290_v24, %v7332_v16  ;;  %v5067_v18 = vpop.f32.mrb[111].mxu1  ;;  %v7949_v63 = vld [vmem:[%s8324_s30 + $0xc0] sm:$0xff] }
 0x526   : > { %v5187_v56 = vadd.f32 %v7937_v20, %v7518_v40  ;;  %v7524_v26 = vadd.f32 %v11284_v43, %v5067_v18  ;;  %v7952_v20 = vld [vmem:[%s8324_s30 + $0xf0] sm:$0xff] }
 0x527   : > { %5221 = vst [vmem:[%s11348_s18 + $0x70] sm:$0xff] %v5189_v39  ;;  %v5190_v10 = vadd.f32 %v7938_v5, %v7521_v15 }
 0x528   : > { %5219 = vst [vmem:[%s11348_s18 + $0x60] sm:$0xff] %v5187_v56  ;;  %v5188_v6 = vadd.f32 %v7939_v9, %v7524_v26 }
 0x529   : > { %5222 = vst [vmem:[%s11348_s18 + $0x78] sm:$0xff] %v5190_v10  ;;  %v7953_v10 = vld [vmem:[%s8324_s30 + $0xe0] sm:$0xff] }
 0x52a   : > { %5220 = vst [vmem:[%s11348_s18 + $0x68] sm:$0xff] %v5188_v6  ;;  %v7335_v12 = vpop.f32.mrb[112].mxu1 }
 0x52b   : > { %v7527_v24 = vadd.f32 %v11300_v58, %v7335_v12  ;;  %v5080_v21 = vpop.f32.mrb[113].mxu1 }
 0x52c   : > { %v7530_v43 = vadd.f32 %v11294_v3, %v5080_v21  ;;  %v7336_v29 = vpop.f32.mrb[114].mxu1 }
 0x52d   : > { %v5193_v0 = vadd.f32 %v7940_v31, %v7527_v24  ;;  %v7533_v41 = vadd.f32 %v11302_v36, %v7336_v29  ;;  %v5083_v37 = vpop.f32.mrb[115].mxu1 }
 0x52e   : > { %v5191_v38 = vadd.f32 %v7941_v45, %v7530_v43  ;;  %v7536_v44 = vadd.f32 %v11296_v32, %v5083_v37 }
 0x52f   : > { %5225 = vst [vmem:[%s11348_s18 + $0x90] sm:$0xff] %v5193_v0  ;;  %v5194_v58 = vadd.f32 %v7942_v30, %v7533_v41 }
 0x530   : > { %5223 = vst [vmem:[%s11348_s18 + $0x80] sm:$0xff] %v5191_v38  ;;  %v5192_v3 = vadd.f32 %v7943_v13, %v7536_v44 }
 0x531   : > { %5226 = vst [vmem:[%s11348_s18 + $0x98] sm:$0xff] %v5194_v58 }
 0x532   : > { %5224 = vst [vmem:[%s11348_s18 + $0x88] sm:$0xff] %v5192_v3  ;;  %v7339_v1 = vpop.f32.mrb[116].mxu1 }
 0x533   : > { %v7539_v36 = vadd.f32 %v11312_v46, %v7339_v1  ;;  %v5096_v28 = vpop.f32.mrb[117].mxu1 }
 0x534   : > { %v7542_v32 = vadd.f32 %v11306_v52, %v5096_v28  ;;  %v7340_v53 = vpop.f32.mrb[118].mxu1 }
 0x535   : > { %v5197_v57 = vadd.f32 %v7944_v4, %v7539_v36  ;;  %v7545_v35 = vadd.f32 %v11314_v59, %v7340_v53  ;;  %v5099_v48 = vpop.f32.mrb[119].mxu1 }
 0x536   : > { %v5195_v54 = vadd.f32 %v7945_v19, %v7542_v32  ;;  %v7548_v23 = vadd.f32 %v11308_v25, %v5099_v48 }
 0x537   : > { %5229 = vst [vmem:[%s11348_s18 + $0xb0] sm:$0xff] %v5197_v57  ;;  %v5198_v46 = vadd.f32 %v7946_v8, %v7545_v35 }
 0x538   : > { %5227 = vst [vmem:[%s11348_s18 + $0xa0] sm:$0xff] %v5195_v54  ;;  %v5196_v52 = vadd.f32 %v7947_v7, %v7548_v23 }
 0x539   : > { %5230 = vst [vmem:[%s11348_s18 + $0xb8] sm:$0xff] %v5198_v46 }
 0x53a   : > { %5228 = vst [vmem:[%s11348_s18 + $0xa8] sm:$0xff] %v5196_v52  ;;  %v7343_v51 = vpop.f32.mrb[120].mxu1 }
 0x53b   : > { %v7551_v59 = vadd.f32 %v11324_v14, %v7343_v51  ;;  %v5112_v34 = vpop.f32.mrb[121].mxu1  ;;  %v7950_v14 = vld [vmem:[%s8324_s30 + $0xd8] sm:$0xff] }
 0x53c   : > { %v7554_v25 = vadd.f32 %v11318_v33, %v5112_v34  ;;  %v7344_v11 = vpop.f32.mrb[122].mxu1  ;;  %v7951_v33 = vld [vmem:[%s8324_s30 + $0xc8] sm:$0xff] }
 0x53d   : > { %v5201_v2 = vadd.f32 %v7948_v27, %v7551_v59  ;;  %v7557_v62 = vadd.f32 %v11326_v42, %v7344_v11  ;;  %v5115_v50 = vpop.f32.mrb[123].mxu1 }
 0x53e   : > { %v5199_v55 = vadd.f32 %v7949_v63, %v7554_v25  ;;  %v7560_v40 = vadd.f32 %v11320_v61, %v5115_v50 }
 0x53f   : > { %5233 = vst [vmem:[%s11348_s18 + $0xd0] sm:$0xff] %v5201_v2  ;;  %v5202_v16 = vadd.f32 %v7950_v14, %v7557_v62 }
 0x540   : > { %5231 = vst [vmem:[%s11348_s18 + $0xc0] sm:$0xff] %v5199_v55  ;;  %v5200_v17 = vadd.f32 %v7951_v33, %v7560_v40 }
 0x541   : > { %5234 = vst [vmem:[%s11348_s18 + $0xd8] sm:$0xff] %v5202_v16 }
 0x542   : > { %5232 = vst [vmem:[%s11348_s18 + $0xc8] sm:$0xff] %v5200_v17  ;;  %v7347_v42 = vpop.f32.mrb[124].mxu1 }
 0x543   : > { %v7563_v39 = vadd.f32 %v11336_v49, %v7347_v42  ;;  %v5128_v15 = vpop.f32.mrb[125].mxu1 }
 0x544   : > { %v7566_v18 = vadd.f32 %v11330_v60, %v5128_v15  ;;  %v7348_v61 = vpop.f32.mrb[126].mxu1  ;;  %v7954_v60 = vld [vmem:[%s8324_s30 + $0xf8] sm:$0xff] }
 0x545   : > { %v5205_v56 = vadd.f32 %v7952_v20, %v7563_v39  ;;  %v7569_v26 = vadd.f32 %v11338_v47, %v7348_v61  ;;  %v5131_v5 = vpop.f32.mrb[127].mxu1  ;;  %v7955_v47 = vld [vmem:[%s8324_s30 + $0xe8] sm:$0xff] }
 0x546   : > { %v5203_v9 = vadd.f32 %v7953_v10, %v7566_v18  ;;  %v7572_v49 = vadd.f32 %v11332_v22, %v5131_v5 }
 0x547   : > { %5237 = vst [vmem:[%s11348_s18 + $0xf0] sm:$0xff] %v5205_v56  ;;  %v5206_v6 = vadd.f32 %v7954_v60, %v7569_v26 }
 0x548   : > { %5235 = vst [vmem:[%s11348_s18 + $0xe0] sm:$0xff] %v5203_v9  ;;  %v5204_v12 = vadd.f32 %v7955_v47, %v7572_v49 }
 0x549   : > { %5238 = vst [vmem:[%s11348_s18 + $0xf8] sm:$0xff] %v5206_v6 }
 0x54a   : > { %5236 = vst [vmem:[%s11348_s18 + $0xe8] sm:$0xff] %v5204_v12 }
 0x54b   : > { %8055 = shalt.err (!%p8052_p2)
}
 0x54c   : > { %s8056_s25 = scalar_lea.hbm %s11441_s16, 4096  ;;  %s8060_s21 = scalar_lea.hbm %s11494_s3, 8192 }
 0x54d   : > { %p8057_p13 = scmp.ne.s32.totalorder %s11441_s16, %s8056_s25  ;;  %p8061_p4 = scmp.lt.u32.totalorder %s11441_s16, %s11494_s3 }
 0x54e   : > { %p8062_p5 = scmp.lt.u32.totalorder %s8060_s21, %s8056_s25  ;;  %p8064_p11 = scmp.lt.u32.totalorder %s8056_s25, %s11441_s16 }
 0x54f   : > { %p8058_p6 = pnand %p8057_p13, %p12208_p0 }
 0x550   : > { %p8063_p8 = por %p8062_p5, %p8061_p4 }
 0x551   : > { %p8059_p10 = pneg %p8058_p6 }
 0x552   : > { %p8065_p1 = por %p8064_p11, %p8063_p8 }
 0x554   : > { %p8066_p3 = pnand %p8065_p1, %p8059_p10 }
 0x556   : > { %8069 = shalt.err (!%p8066_p3)
}
 0x557   : > { %s8124_s30 = smov 128   ;;  %s8125_s18 = smov 8  }
 0x558   : > { %7679 = dma.vmem_to_hbm [thread:$0]  (%p12208_p0), %s11443_s17, 4096, %s11441_s16, %s5240_s27, %s8124_s30, %s8124_s30, %s8125_s18  }
 0x559 PF: > { %s5268_s20 = sand.u32 1, %s8100_s12   ;;  %p12209_p7 = scmp.ne.s32.totalorder %s11714_s19, 0 }
 0x55a   : > { %p12210_p9 = scmp.ge.s32.totalorder %s8112_s15, 2  ;;  %s5269_s24 = scalar_lea.sflag [#allocation5], %s5268_s20 }
 0x55c   : > { %p7693_p12 = pnand %p12210_p9, %p12209_p7 }
 0x55e   : > { %8095 = dma.done.wait (!%p7693_p12), %s5269_s24, 4096  }
 0x55f   : > { %8097 = vsyncadd (!%p7693_p12), %s5269_s24, 4294963200  ;;  %p17_p2 = scmp.ge.s32.totalorder %s8256_s4, 4   ;;  %s12211_s12 = smov %s8104_s13 }
 0x560   : > { %s12212_s13 = smov %s8108_s14  ;;  %s12213_s14 = smov %s8272_s9 }
 0x561   : > { %s12214_s15 = smov %s8256_s4  ;;  %19 = sbr.rel (!%p17_p2) target bundleno = 6 (0x6), region = 92 }
 0x568   :  { %5274 = vsyncpa [#allocation4], 1 }
 0x569   :  { %5276 = vsyncpa [#allocation4 + $0x1], 1 }
 0x56a   :  { %5277 = vsyncpa [#allocation7], 1 }
 0x56b   :  { %5278 = vsyncpa [#allocation5], 1 }
 0x56c   :  { %5280 = vsyncpa [#allocation5 + $0x1], 1 }

</bundles_post_ra>
